<compile_context>
chip_gen: v7x
topology: tpu7x:2x2x1
jax: 0.10.0
libtpu: 0.0.40
codegen_flags: <defaults>
</compile_context>

<pallas_src>
import functools
import math

import jax
import jax.numpy as jnp
from jax.experimental import pallas as pl
from jax.experimental.pallas import tpu as pltpu


def _flash_attn_kernel(q_ref, k_ref, v_ref, o_ref, m_sc, l_sc, *, scale):
    ki = pl.program_id(2)

    @pl.when(ki == 0)
    def _():
        m_sc[...] = jnp.full(m_sc.shape, -jnp.inf, dtype=m_sc.dtype)
        l_sc[...] = jnp.zeros(l_sc.shape, dtype=l_sc.dtype)
        # The f32 output tile doubles as the flash accumulator (no acc scratch,
        # no epilogue copy); zero it so the alpha-rescale below is safe.
        o_ref[...] = jnp.zeros(o_ref.shape, dtype=o_ref.dtype)

    # Fold the (bug-faithful) * sqrt(d_model) scale into K: tk*D multiplies per
    # step instead of repeating tq*D multiplies on the (larger) Q tile.
    q = q_ref[...]                                                  # (bb, TQ, D)
    k = k_ref[...] * jnp.asarray(scale, dtype=k_ref.dtype)          # (bb, TK, D)
    v = v_ref[...]                                                  # (bb, TK, D)

    # scores = q @ k^T (batched, no explicit transpose). Kept in f32 because
    # the amplified logits make the softmax nearly one-hot.
    s = jnp.einsum("bqd,bkd->bqk", q, k, preferred_element_type=jnp.float32)

    # Online (flash) softmax accumulation over key tiles.
    m_prev = m_sc[...]
    m_new = jnp.maximum(m_prev, jnp.max(s, axis=-1, keepdims=True))
    alpha = jnp.exp(m_prev - m_new)
    p = jnp.exp(s - m_new)                                          # unnormalized probs
    l_new = alpha * l_sc[...] + jnp.sum(p, axis=-1, keepdims=True)

    # PV matmul in bf16 with f32 accumulation: p (in [0,1]) and v are
    # insensitive to bf16 rounding, and bf16 inputs run at full MXU rate.
    pv = jnp.einsum(
        "bqk,bkd->bqd",
        p.astype(jnp.bfloat16),
        v.astype(jnp.bfloat16),
        preferred_element_type=jnp.float32,
    )
    acc = alpha * o_ref[...] + pv

    m_sc[...] = m_new
    l_sc[...] = l_new

    last = ki == pl.num_programs(2) - 1

    @pl.when(jnp.logical_not(last))
    def _():
        o_ref[...] = acc

    @pl.when(last)
    def _():
        # Deferred normalization: one (TQ, D) scale, reciprocal on the EUP.
        o_ref[...] = acc * pl.reciprocal(l_new, approx=True)


def attention(query, key, value, mask=None, *, d_model=None, tq=None, tk=None, bb=None):
    """Fused attention matching the torch Model.forward (inference mode)."""
    del mask  # accepted but unused by the torch forward
    B, S, D = query.shape
    assert query.dtype == jnp.float32, "output tile is used as the f32 accumulator"
    if d_model is None:
        d_model = D
    # Faithful to the torch code: qk.div(inv_scale_factor) with
    # inv_scale_factor = 1/sqrt(d_model)  ==  qk * sqrt(d_model).
    scale = math.sqrt(d_model)

    # Large query tile (resident across the key axis) maximizes K/V reuse.
    if tq is None:
        tq = min(S, 512)
    # tk = 256 fills the 256-wide MXUs on v6e/v7x; harmless on v5e.
    if tk is None:
        tk = min(S, 256)
    if bb is None:
        # For tiny sequences, process several batch elements per grid step to
        # amortize per-step overhead, keeping >= 2 parallel steps for the two
        # v7x TensorCores.
        bb = 1
        if S <= 128 and B > 1:
            bb = max(1, B // 2)
            while bb > 1 and B % bb != 0:
                bb -= 1
    assert S % tq == 0 and S % tk == 0, "sequence length must divide tile sizes"
    assert B % bb == 0, "batch must divide the batch block"

    grid = (B // bb, S // tq, S // tk)

    q_spec = pl.BlockSpec((bb, tq, D), lambda b, qi, ki: (b, qi, 0))
    kv_spec = pl.BlockSpec((bb, tk, D), lambda b, qi, ki: (b, ki, 0))
    o_spec = pl.BlockSpec((bb, tq, D), lambda b, qi, ki: (b, qi, 0))

    kernel = functools.partial(_flash_attn_kernel, scale=scale)

    return pl.pallas_call(
        kernel,
        out_shape=jax.ShapeDtypeStruct((B, S, D), query.dtype),
        grid_spec=pltpu.PrefetchScalarGridSpec(
            num_scalar_prefetch=0,
            grid=grid,
            in_specs=[q_spec, kv_spec, kv_spec],
            out_specs=o_spec,
            scratch_shapes=[
                pltpu.VMEM((bb, tq, 1), jnp.float32),   # running max
                pltpu.VMEM((bb, tq, 1), jnp.float32),   # running denominator
            ],
        ),
        compiler_params=pltpu.CompilerParams(
            dimension_semantics=("parallel", "parallel", "arbitrary"),
        ),
    )(query, key, value)


def _reference(query, key, value, d_model):
    scale = math.sqrt(d_model)
    qk = jnp.einsum("bqd,bkd->bqk", query, key) * scale
    p = jax.nn.softmax(qk, axis=-1)
    return jnp.einsum("bqk,bkd->bqd", p, value)


if __name__ == "__main__":
    d_model = 512

    def run_case(B, S, D):
        k0, k1, k2 = jax.random.split(jax.random.PRNGKey(0), 3)
        q = jax.random.normal(k0, (B, S, D), dtype=jnp.float32)
        k = jax.random.normal(k1, (B, S, D), dtype=jnp.float32)
        v = jax.random.normal(k2, (B, S, D), dtype=jnp.float32)

        out = attention(q, k, v, None, d_model=D)
        out = jax.block_until_ready(out)

        ref = _reference(q, k, v, D)
        assert out.shape == (B, S, D)
        # Loose-ish tolerance: approx reciprocal + bf16 PV matmul + extremely
        # peaked softmax (logits are multiplied by sqrt(d_model), as in torch).
        assert jnp.allclose(out, ref, atol=2e-2, rtol=2e-2), (
            f"mismatch vs reference for shape {(B, S, D)}"
        )

    # Exact shape family of the original module: exercises batch blocking
    # (bb=4, whole seq per tile, grid=(2,1,1)).
    run_case(8, 64, d_model)
    # Longer sequence: exercises the multi-key-tile online-softmax path
    # (tq=512, tk=256, grid=(2,1,2)).
    run_case(2, 512, d_model)

    print("KERNEL_OK")
</pallas_src>

<mosaic_0001>
module attributes {stable_mosaic.version = 11 : i64} {
  func.func @_flash_attn_kernel(%arg0: i32, %arg1: i32, %arg2: i32, %arg3: memref<4x64x512xf32, #tpu.memory_space<vmem>>, %arg4: memref<4x64x512xf32, #tpu.memory_space<vmem>>, %arg5: memref<4x64x512xf32, #tpu.memory_space<vmem>>, %arg6: memref<4x64x512xf32, #tpu.memory_space<vmem>>, %arg7: memref<4x64x1xf32, #tpu.memory_space<vmem>>, %arg8: memref<4x64x1xf32, #tpu.memory_space<vmem>>) attributes {dimension_semantics = [#tpu.dimension_semantics<parallel>, #tpu.dimension_semantics<parallel>, #tpu.dimension_semantics<arbitrary>], iteration_bounds = array<i64: 2, 1, 1>, scalar_prefetch = 0 : i64, scratch_operands = 2 : i64, tpu.core_type = #tpu.core_type<tc>, window_params = [{transform_indices = @transform_0, window_bounds = array<i64: 4, 64, 512>}, {transform_indices = @transform_1, window_bounds = array<i64: 4, 64, 512>}, {transform_indices = @transform_2, window_bounds = array<i64: 4, 64, 512>}, {transform_indices = @transform_3, window_bounds = array<i64: 4, 64, 512>}]} {
    %c0_i32 = arith.constant 0 : i32
    %0 = arith.cmpi eq, %arg2, %c0_i32 : i32
    %1 = arith.extui %0 : i1 to i32
    %c0_i32_0 = arith.constant 0 : i32
    %2 = arith.cmpi ne, %1, %c0_i32_0 : i32
    scf.if %2 {
      %cst_31 = arith.constant 0xFF800000 : f32
      %38 = vector.broadcast %cst_31 : f32 to vector<4x64x1xf32>
      %c0_32 = arith.constant 0 : index
      %c0_33 = arith.constant 0 : index
      %c0_34 = arith.constant 0 : index
      %39 = vector.load %arg7[%c0_32, %c0_33, %c0_34] : memref<4x64x1xf32, #tpu.memory_space<vmem>>, vector<4x64x1xf32>
      tpu.vector_store %arg7[%c0_32, %c0_33, %c0_34], %38 {strides = array<i32>} : memref<4x64x1xf32, #tpu.memory_space<vmem>>, vector<4x64x1xf32>,
      %cst_35 = arith.constant 0.000000e+00 : f32
      %40 = vector.broadcast %cst_35 : f32 to vector<4x64x1xf32>
      %c0_36 = arith.constant 0 : index
      %c0_37 = arith.constant 0 : index
      %c0_38 = arith.constant 0 : index
      %41 = vector.load %arg8[%c0_36, %c0_37, %c0_38] : memref<4x64x1xf32, #tpu.memory_space<vmem>>, vector<4x64x1xf32>
      tpu.vector_store %arg8[%c0_36, %c0_37, %c0_38], %40 {strides = array<i32>} : memref<4x64x1xf32, #tpu.memory_space<vmem>>, vector<4x64x1xf32>,
      %cst_39 = arith.constant 0.000000e+00 : f32
      %42 = vector.broadcast %cst_39 : f32 to vector<4x64x512xf32>
      %c0_40 = arith.constant 0 : index
      %c0_41 = arith.constant 0 : index
      %c0_42 = arith.constant 0 : index
      %43 = vector.load %arg6[%c0_40, %c0_41, %c0_42] : memref<4x64x512xf32, #tpu.memory_space<vmem>>, vector<4x64x512xf32>
      tpu.vector_store %arg6[%c0_40, %c0_41, %c0_42], %42 {strides = array<i32>} : memref<4x64x512xf32, #tpu.memory_space<vmem>>, vector<4x64x512xf32>,
    } else {
    }
    %c0 = arith.constant 0 : index
    %c0_1 = arith.constant 0 : index
    %c0_2 = arith.constant 0 : index
    %3 = vector.load %arg3[%c0, %c0_1, %c0_2] : memref<4x64x512xf32, #tpu.memory_space<vmem>>, vector<4x64x512xf32>
    %c0_3 = arith.constant 0 : index
    %c0_4 = arith.constant 0 : index
    %c0_5 = arith.constant 0 : index
    %4 = vector.load %arg4[%c0_3, %c0_4, %c0_5] : memref<4x64x512xf32, #tpu.memory_space<vmem>>, vector<4x64x512xf32>
    %cst = arith.constant 22.6274166 : f32
    %5 = vector.broadcast %cst : f32 to vector<4x64x512xf32>
    %6 = arith.mulf %4, %5 : vector<4x64x512xf32>
    %c0_6 = arith.constant 0 : index
    %c0_7 = arith.constant 0 : index
    %c0_8 = arith.constant 0 : index
    %7 = vector.load %arg5[%c0_6, %c0_7, %c0_8] : memref<4x64x512xf32, #tpu.memory_space<vmem>>, vector<4x64x512xf32>
    "tpu.trace_start"() <{level = 10 : i32, message = "bqd,bkd->bqk"}> : () -> ()
    %cst_9 = arith.constant dense<0.000000e+00> : vector<4x64x64xf32>
    %8 = tpu.matmul %3, %6, %cst_9 {dimension_numbers = #tpu.dot_dimension_numbers<[2], [2], [1], [1], [0, 0, 0, 1, 1, 1], [0], [0]>} : vector<4x64x512xf32>, vector<4x64x512xf32>, vector<4x64x64xf32> -> vector<4x64x64xf32>
    "tpu.trace_stop"() : () -> ()
    %c0_10 = arith.constant 0 : index
    %c0_11 = arith.constant 0 : index
    %c0_12 = arith.constant 0 : index
    %9 = vector.load %arg7[%c0_10, %c0_11, %c0_12] : memref<4x64x1xf32, #tpu.memory_space<vmem>>, vector<4x64x1xf32>
    %cst_13 = arith.constant dense<0xFF800000> : vector<4x64xf32>
    %10 = vector.multi_reduction <maximumf>, %8, %cst_13 [2] : vector<4x64x64xf32> to vector<4x64xf32>
    %11 = vector.shape_cast %10 : vector<4x64xf32> to vector<4x64x1xf32>
    %12 = arith.maximumf %9, %11 : vector<4x64x1xf32>
    %13 = arith.subf %9, %12 : vector<4x64x1xf32>
    %14 = math.exp %13 : vector<4x64x1xf32>
    %15 = vector.broadcast %12 : vector<4x64x1xf32> to vector<4x64x64xf32>
    %16 = arith.subf %8, %15 : vector<4x64x64xf32>
    %17 = math.exp %16 : vector<4x64x64xf32>
    %c0_14 = arith.constant 0 : index
    %c0_15 = arith.constant 0 : index
    %c0_16 = arith.constant 0 : index
    %18 = vector.load %arg8[%c0_14, %c0_15, %c0_16] : memref<4x64x1xf32, #tpu.memory_space<vmem>>, vector<4x64x1xf32>
    %19 = arith.mulf %14, %18 : vector<4x64x1xf32>
    %cst_17 = arith.constant dense<0.000000e+00> : vector<4x64xf32>
    %20 = vector.multi_reduction <add>, %17, %cst_17 [2] : vector<4x64x64xf32> to vector<4x64xf32>
    %21 = vector.shape_cast %20 : vector<4x64xf32> to vector<4x64x1xf32>
    %22 = arith.addf %19, %21 : vector<4x64x1xf32>
    %23 = arith.truncf %17 : vector<4x64x64xf32> to vector<4x64x64xbf16>
    %24 = arith.truncf %7 : vector<4x64x512xf32> to vector<4x64x512xbf16>
    "tpu.trace_start"() <{level = 10 : i32, message = "bqk,bkd->bqd"}> : () -> ()
    %cst_18 = arith.constant dense<0.000000e+00> : vector<4x64x512xf32>
    %25 = tpu.matmul %23, %24, %cst_18 {dimension_numbers = #tpu.dot_dimension_numbers<[2], [1], [1], [2], [0, 0, 0, 1, 1, 2], [0], [0]>} : vector<4x64x64xbf16>, vector<4x64x512xbf16>, vector<4x64x512xf32> -> vector<4x64x512xf32>
    "tpu.trace_stop"() : () -> ()
    %c0_19 = arith.constant 0 : index
    %c0_20 = arith.constant 0 : index
    %c0_21 = arith.constant 0 : index
    %26 = vector.load %arg6[%c0_19, %c0_20, %c0_21] : memref<4x64x512xf32, #tpu.memory_space<vmem>>, vector<4x64x512xf32>
    %27 = vector.broadcast %14 : vector<4x64x1xf32> to vector<4x64x512xf32>
    %28 = arith.mulf %27, %26 : vector<4x64x512xf32>
    %29 = arith.addf %28, %25 : vector<4x64x512xf32>
    %c0_22 = arith.constant 0 : index
    %c0_23 = arith.constant 0 : index
    %c0_24 = arith.constant 0 : index
    %30 = vector.load %arg7[%c0_22, %c0_23, %c0_24] : memref<4x64x1xf32, #tpu.memory_space<vmem>>, vector<4x64x1xf32>
    tpu.vector_store %arg7[%c0_22, %c0_23, %c0_24], %12 {strides = array<i32>} : memref<4x64x1xf32, #tpu.memory_space<vmem>>, vector<4x64x1xf32>,
    %c0_25 = arith.constant 0 : index
    %c0_26 = arith.constant 0 : index
    %c0_27 = arith.constant 0 : index
    %31 = vector.load %arg8[%c0_25, %c0_26, %c0_27] : memref<4x64x1xf32, #tpu.memory_space<vmem>>, vector<4x64x1xf32>
    tpu.vector_store %arg8[%c0_25, %c0_26, %c0_27], %22 {strides = array<i32>} : memref<4x64x1xf32, #tpu.memory_space<vmem>>, vector<4x64x1xf32>,
    %c0_i32_28 = arith.constant 0 : i32
    %32 = arith.cmpi eq, %arg2, %c0_i32_28 : i32
    %true = arith.constant true
    %33 = arith.xori %32, %true : i1
    %34 = arith.extui %33 : i1 to i32
    %c0_i32_29 = arith.constant 0 : i32
    %35 = arith.cmpi ne, %34, %c0_i32_29 : i32
    scf.if %35 {
      %c0_31 = arith.constant 0 : index
      %c0_32 = arith.constant 0 : index
      %c0_33 = arith.constant 0 : index
      %38 = vector.load %arg6[%c0_31, %c0_32, %c0_33] : memref<4x64x512xf32, #tpu.memory_space<vmem>>, vector<4x64x512xf32>
      tpu.vector_store %arg6[%c0_31, %c0_32, %c0_33], %29 {strides = array<i32>} : memref<4x64x512xf32, #tpu.memory_space<vmem>>, vector<4x64x512xf32>,
    } else {
    }
    %36 = arith.extui %32 : i1 to i32
    %c0_i32_30 = arith.constant 0 : i32
    %37 = arith.cmpi ne, %36, %c0_i32_30 : i32
    scf.if %37 {
      %38 = tpu.reciprocal %22 {approx = true} : vector<4x64x1xf32> -> vector<4x64x1xf32>
      %39 = vector.broadcast %38 : vector<4x64x1xf32> to vector<4x64x512xf32>
      %40 = arith.mulf %29, %39 : vector<4x64x512xf32>
      %c0_31 = arith.constant 0 : index
      %c0_32 = arith.constant 0 : index
      %c0_33 = arith.constant 0 : index
      %41 = vector.load %arg6[%c0_31, %c0_32, %c0_33] : memref<4x64x512xf32, #tpu.memory_space<vmem>>, vector<4x64x512xf32>
      tpu.vector_store %arg6[%c0_31, %c0_32, %c0_33], %40 {strides = array<i32>} : memref<4x64x512xf32, #tpu.memory_space<vmem>>, vector<4x64x512xf32>,
    } else {
    }
    return
  }
  func.func @transform_0(%arg0: i32, %arg1: i32, %arg2: i32) -> (i32, i32, i32) {
    %c0_i32 = arith.constant 0 : i32
    %c0_i32_0 = arith.constant 0 : i32
    return %arg0, %arg1, %c0_i32 : i32, i32, i32
  }
  func.func @transform_1(%arg0: i32, %arg1: i32, %arg2: i32) -> (i32, i32, i32) {
    %c0_i32 = arith.constant 0 : i32
    %c0_i32_0 = arith.constant 0 : i32
    return %arg0, %arg2, %c0_i32 : i32, i32, i32
  }
  func.func @transform_2(%arg0: i32, %arg1: i32, %arg2: i32) -> (i32, i32, i32) {
    %c0_i32 = arith.constant 0 : i32
    %c0_i32_0 = arith.constant 0 : i32
    return %arg0, %arg2, %c0_i32 : i32, i32, i32
  }
  func.func @transform_3(%arg0: i32, %arg1: i32, %arg2: i32) -> (i32, i32, i32) {
    %c0_i32 = arith.constant 0 : i32
    %c0_i32_0 = arith.constant 0 : i32
    return %arg0, %arg1, %c0_i32 : i32, i32, i32
  }
}

</mosaic_0001>

<bundles_post_ra>
// kernel: tpu_custom_call.1
= control target key start
LH: loop header
LB: loop body
LE: loop exit
PB: predicated region body
PF: predicated region fallthrough
CT: control target
= control target key end

     0   :  { %s7611_s0 = inlined_call_operand.hbm [shape: f32[8,64,512], index: 0, kind: input, shape index: {}]   ;;  %s7612_s1 = inlined_call_operand.hbm [shape: f32[8,64,512], index: 1, kind: input, shape index: {}]   ;;  %s7613_s2 = inlined_call_operand.hbm [shape: f32[8,64,512], index: 2, kind: input, shape index: {}]   ;;  %s7614_s3 = inlined_call_operand.hbm [shape: f32[8,64,512], index: 3, kind: output, shape index: {}]  }
   0x1   :  { %7675 = sst [smem:[#allocation92_spill]] %s7612_s1 }
   0x2   :  { %8 = vsyncpa [#allocation5], 0 }
   0x3   :  { %10 = vsyncpa [#allocation5 + $0x1], 0 }
   0x4   :  { %11 = vsyncpa [#allocation8], 0 }
   0x5   :  { %13 = vsyncpa [#allocation8 + $0x1], 0 }
   0x6   :  { %14 = vsyncpa [#allocation6], 0 }
   0x7   :  { %16 = vsyncpa [#allocation6 + $0x1], 0  ;;  %s5370_s12 = smov 0   ;;  %s5372_s13 = smov 0  }
   0x8   :  { %s5374_s14 = smov 0   ;;  %s5376_s15 = smov 0  }
   0x9   :  { %s5378_s16 = smov 0   ;;  %s5380_s17 = smov 0  }
   0xa LB: > { %7676 = sst [smem:[#allocation14_spill]] %s5333_s16  ;;  %s5401_s18 = sadd.s32 4294967295, %s5337_s17   ;;  %s5337_s17 = sphi %s5380_s17, %s22_s17   ;;  %s5333_s16 = sphi %s5378_s16, %s7972_s16   ;;  %s5329_s15 = sphi %s5376_s15, %s7971_s15   ;;  %s5325_s14 = sphi %s5374_s14, %s7975_s14   ;;  %s5321_s13 = sphi %s5372_s13, %s7974_s13   ;;  %s5317_s12 = sphi %s5370_s12, %s7973_s12  }
   0xb   : > { %s4630_s19 = sadd.s32 4294967294, %s5337_s17   ;;  %s41_s20 = sadd.s32 1, %s5333_s16 }
   0xc   : > { %s50_s21 = sadd.s32 1, %s5325_s14  ;;  %p43_p0 = scmp.ge.s32.totalorder %s41_s20, 2 }
   0xd   : > { %p57_p1 = scmp.ne.s32.totalorder %s5325_s14, %s5321_s13  ;;  %p58_p2 = scmp.eq.s32.totalorder %s5337_s17, 0 }
   0xe   : > { %p63_p3 = scmp.ne.s32.totalorder %s5321_s13, %s5317_s12  ;;  %s7977_s20 = smov (%p43_p0, %s41_s20), 0 }
   0xf   : > { %7677 = sst [smem:[#allocation15_spill]] %s7977_s20  ;;  %p5413_p4 = por %p58_p2, %p57_p1 }
  0x10   : > { %p64_p5 = scmp.eq.s32.totalorder %s5401_s18, 0  ;;  %s45_s23 = ssub.s32 %s5333_s16, %s7977_s20 }
  0x11   : > { %p145_p6 = scmp.eq.s32.totalorder %s5401_s18, 1  ;;  %p48_p7 = scmp.eq.s32.totalorder %s45_s23, 0 }
  0x12   : > { %p5421_p8 = por %p64_p5, %p63_p3  ;;  %p151_p10 = scmp.eq.s32.totalorder %s4630_s19, 1 }
  0x13   : > { %p5425_p9 = por %p145_p6, %p57_p1  ;;  %p4910_p13 = scmp.lt.s32.totalorder %s5337_s17, 2 }
  0x14   : > { %s7679_s24 = scalar_select %p5421_p8, 1, 0 }
  0x15   : > { %s7680_s25 = scalar_select %p5425_p9, 1, 0 }
  0x16   : > { %s5430_s26 = scalar_select %p48_p7, %s5325_s14, %s50_s21  }
  0x17   : > { %p5432_p11 = por %p151_p10, %p63_p3  ;;  %s7617_s28 = sand.u32 1, %s5325_s14  }
  0x18   : > { %7681 = sst [smem:[#allocation16_spill]] %s5430_s26  ;;  %s5441_s29 = sshll.u32 %s7617_s28, 10 }
  0x19   : > { %s7682_s27 = scalar_select %p5432_p11, 1, 0 }
  0x1a   : > { %s5444_s30 = sshll.u32 %s5333_s16, 14  ;;  %p5448_p0 = pnand %p4910_p13, %p5413_p4 }
  0x1b   : > { %s196_s5 = sand.u32 1, %s5337_s17   ;;  %s7684_s1 = sld [smem:[#allocation92_spill]] }
  0x1c   : > { %s200_s9 = scalar_lea.vmem [#allocation7], %s5441_s29  ;;  %s5464_s11 = scalar_lea.sflag [#allocation8], %s196_s5 }
  0x1d   : > { %s211_s10 = sshll.u32 %s200_s9, 4  ;;  %p5470_p4 = pneg %p5448_p0  ;;  %s5461_s10 = int_to_ptr.vmem [resolvable:$true] %s211_s10 }
  0x21   : > { %s5457_s8 = scalar_lea.hbm %s7684_s1, %s5444_s30  ;;  %s5166_s6 = scalar_lea.hbm %s7684_s1, 32768 }
  0x22   : > { %s5161_s19 = scalar_lea.hbm %s5457_s8, 16384  ;;  %p5167_p7 = scmp.lt.u32.totalorder %s5457_s8, %s7684_s1 }
  0x23   : > { %p5162_p3 = scmp.ne.s32.totalorder %s5457_s8, %s5161_s19  ;;  %p5168_p10 = scmp.lt.u32.totalorder %s5166_s6, %s5161_s19 }
  0x24   : > { %p5170_p12 = scmp.lt.u32.totalorder %s5161_s19, %s5457_s8 }
  0x25   : > { %p5164_p5 = pnand %p5470_p4, %p5162_p3  ;;  %p5169_p13 = por %p5168_p10, %p5167_p7 }
  0x27   : > { %p5165_p6 = pneg %p5164_p5  ;;  %p5171_p1 = por %p5170_p12, %p5169_p13 }
  0x29   : > { %p5172_p2 = pnand %p5171_p1, %p5165_p6 }
  0x2b   : > { %5175 = shalt.err (!%p5172_p2)
}
  0x2c   : > { %s5176_s5 = scalar_lea.vmem %s5461_s10, 16384  ;;  %s5339_s22 = smov [#allocation7]  }
  0x2d   : > { %p5177_p3 = scmp.ne.s32.totalorder %s5461_s10, %s5176_s5  ;;  %s5181_s23 = sshll.u32 %s5339_s22, 4  ;;  %s5182_s23 = int_to_ptr.vmem [resolvable:$false] %s5181_s23 }
  0x2e   : > { %s5183_s7 = scalar_lea.vmem %s5182_s23, 32768  ;;  %p5184_p9 = scmp.lt.s32.totalorder %s5461_s10, %s5182_s23 }
  0x2f   : > { %p5179_p5 = pnand %p5177_p3, %p5470_p4  ;;  %p5185_p8 = scmp.lt.s32.totalorder %s5183_s7, %s5176_s5 }
  0x31   : > { %p5180_p11 = pneg %p5179_p5  ;;  %p5186_p7 = por %p5185_p8, %p5184_p9 }
  0x33   : > { %p5187_p10 = pnand %p5186_p7, %p5180_p11 }
  0x35   : > { %5190 = shalt.err (!%p5187_p10)
}
  0x36   : > { %s7618_s19 = smov 512   ;;  %s7620_s6 = smov 32  }
  0x37   : > { %4902 = dma.hbm_to_vmem [thread:$0]  (!%p5448_p0), %s5457_s8, 16384, %s5461_s10, %s5464_s11, %s7618_s19, %s7618_s19, %s7620_s6  }
  0x38   : > { %p7686_p8 = scmp.lt.s32.totalorder %s5337_s17, 3  ;;  %p7687_p9 = scmp.ge.s32.totalorder %s5337_s17, 1 }
  0x39   : > { %s5509_s23 = scalar_lea.hbm %s7611_s0, %s5444_s30  ;;  %s175_s7 = scalar_lea.vmem [#allocation4], %s5441_s29 }
  0x3a   : > { %p5501_p11 = pnand %p7687_p9, %p7686_p8  ;;  %s186_s28 = sshll.u32 %s175_s7, 4  ;;  %s5512_s28 = int_to_ptr.vmem [resolvable:$true] %s186_s28 }
  0x3b   : > { %s5518_s19 = scalar_lea.hbm %s7613_s2, %s5444_s30  ;;  %s7689_s6 = sand.u32 1, %s5325_s14  }
  0x3c   : > { %s7688_s9 = scalar_select %p5501_p11, 1, 0 }
  0x3d   : > { %s5522_s1 = scalar_lea.sflag [#allocation5], %s7689_s6  ;;  %s5191_s20 = scalar_lea.hbm %s5509_s23, 16384 }
  0x3e   : > { %p5192_p12 = scmp.ne.s32.totalorder %s5509_s23, %s5191_s20  ;;  %s5196_s16 = scalar_lea.hbm %s7611_s0, 32768 }
  0x3f   : > { %p5197_p6 = scmp.lt.u32.totalorder %s5509_s23, %s7611_s0  ;;  %p5198_p13 = scmp.lt.u32.totalorder %s5196_s16, %s5191_s20 }
  0x40   : > { %p5194_p1 = pnand %p5192_p12, %p5470_p4  ;;  %p5200_p5 = scmp.lt.u32.totalorder %s5191_s20, %s5509_s23 }
  0x41   : > { %p5199_p3 = por %p5198_p13, %p5197_p6 }
  0x42   : > { %p5195_p2 = pneg %p5194_p1 }
  0x43   : > { %p5201_p7 = por %p5200_p5, %p5199_p3 }
  0x45   : > { %p5202_p10 = pnand %p5201_p7, %p5195_p2 }
  0x47   : > { %5205 = shalt.err (!%p5202_p10)
}
  0x48   : > { %s5206_s30 = scalar_lea.vmem %s5512_s28, 16384  ;;  %s5342_s6 = smov [#allocation4]  }
  0x49   : > { %p5207_p8 = scmp.ne.s32.totalorder %s5512_s28, %s5206_s30  ;;  %s5211_s8 = sshll.u32 %s5342_s6, 4  ;;  %s5212_s8 = int_to_ptr.vmem [resolvable:$false] %s5211_s8 }
  0x4a   : > { %s5213_s26 = scalar_lea.vmem %s5212_s8, 32768  ;;  %p5214_p1 = scmp.lt.s32.totalorder %s5512_s28, %s5212_s8 }
  0x4b   : > { %p5209_p9 = pnand %p5207_p8, %p5470_p4  ;;  %p5215_p11 = scmp.lt.s32.totalorder %s5213_s26, %s5206_s30 }
  0x4d   : > { %p5210_p12 = pneg %p5209_p9  ;;  %p5216_p6 = por %p5215_p11, %p5214_p1 }
  0x4f   : > { %p5217_p13 = pnand %p5216_p6, %p5210_p12 }
  0x51   : > { %5220 = shalt.err (!%p5217_p13)
}
  0x52   : > { %s7690_s16 = smov 32   ;;  %s7691_s20 = smov 512  }
  0x53   : > { %4899 = dma.hbm_to_vmem [thread:$0]  (!%p5448_p0), %s5509_s23, 16384, %s5512_s28, %s5522_s1, %s7691_s20, %s7691_s20, %s7690_s16  }
  0x54   : > { %s225_s10 = scalar_lea.vmem [#allocation9], %s5441_s29  ;;  %s5221_s22 = scalar_lea.hbm %s5518_s19, 16384 }
  0x55   : > { %s236_s5 = sshll.u32 %s225_s10, 4  ;;  %p5222_p11 = scmp.ne.s32.totalorder %s5518_s19, %s5221_s22  ;;  %s5550_s5 = int_to_ptr.vmem [resolvable:$true] %s236_s5 }
  0x56   : > { %s5226_s6 = scalar_lea.hbm %s7613_s2, 32768  ;;  %p5227_p5 = scmp.lt.u32.totalorder %s5518_s19, %s7613_s2 }
  0x57   : > { %p5224_p2 = pnand %p5222_p11, %p5470_p4  ;;  %p5228_p7 = scmp.lt.u32.totalorder %s5226_s6, %s5221_s22 }
  0x58   : > { %p5230_p8 = scmp.lt.u32.totalorder %s5221_s22, %s5518_s19 }
  0x59   : > { %p5225_p3 = pneg %p5224_p2  ;;  %p5229_p10 = por %p5228_p7, %p5227_p5 }
  0x5b   : > { %p5231_p9 = por %p5230_p8, %p5229_p10 }
  0x5d   : > { %p5232_p12 = pnand %p5231_p9, %p5225_p3 }
  0x5f   : > { %5235 = shalt.err (!%p5232_p12)
}
  0x60   : > { %s5236_s1 = scalar_lea.vmem %s5550_s5, 16384  ;;  %s5343_s28 = smov [#allocation9]  }
  0x61   : > { %p5237_p1 = scmp.ne.s32.totalorder %s5550_s5, %s5236_s1  ;;  %s5241_s29 = sshll.u32 %s5343_s28, 4  ;;  %s5242_s29 = int_to_ptr.vmem [resolvable:$false] %s5241_s29 }
  0x62   : > { %s5243_s23 = scalar_lea.vmem %s5242_s29, 32768  ;;  %p5244_p11 = scmp.lt.s32.totalorder %s5550_s5, %s5242_s29 }
  0x63   : > { %p5239_p6 = pnand %p5237_p1, %p5470_p4  ;;  %p5245_p2 = scmp.lt.s32.totalorder %s5243_s23, %s5236_s1 }
  0x65   : > { %p5240_p13 = pneg %p5239_p6  ;;  %p5246_p5 = por %p5245_p2, %p5244_p11 }
  0x67   : > { %p5247_p7 = pnand %p5246_p5, %p5240_p13 }
  0x69   : > { %5250 = shalt.err (!%p5247_p7)
}
  0x6a   : > { %4905 = dma.hbm_to_vmem [thread:$0]  (!%p5448_p0), %s5518_s19, 16384, %s5550_s5, %s5464_s11, %s7691_s20, %s7691_s20, %s7690_s16  }
  0x6b   : > { %p7692_p4 = scmp.ne.s32.totalorder %s7688_s9, 0 }
  0x6d   : > { %248 = sbr.rel (%p7692_p4) target bundleno = 1119 (0x45f), region = 32 }
  0x74   : > { %s5580_s21 = sand.u32 1, %s5321_s13   ;;  %p7693_p3 = scmp.ne.s32.totalorder %s7679_s24, 0 }
  0x75   : > { %s5583_s10 = sshll.u32 %s5580_s21, 10  ;;  %s251_s4 = scalar_lea.sflag [#allocation5], %s5580_s21 }
  0x76   : > { %s5587_s22 = scalar_lea.vmem [#allocation4], %s5583_s10 }
  0x77   : > { %5304 = dma.done.wait (%p7693_p3), %s251_s4, 16384  }
  0x78   : > { %5306 = vsyncadd (%p7693_p3), %s251_s4, 4294950912  ;;  %s259_s11 = sand.u32 1, %s5401_s18   ;;  %s5595_s9 = scalar_lea.vmem [#allocation7], %s5583_s10 }
  0x79   : > { %s260_s19 = scalar_lea.sflag [#allocation8], %s259_s11 }
  0x7a   : > { %5308 = dma.done.wait (%p7693_p3), %s260_s19, 32768  }
  0x7b   : > { %5310 = vsyncadd (%p7693_p3), %s260_s19, 4294934528  ;;  %v640_v0 = vld [vmem:[%s5595_s9 + $0x8] sm:$0xff]  ;;  %v639_v6 = vld [vmem:[%s5595_s9] sm:$0xff]  ;;  %vm318_vm0 = vcmask 7168   ;;  %vm1895_vm1 = vcmask 523264   ;;  %s6097_s18 = scalar_lea.vmem [#allocation9], %s5583_s10 }
  0x7c   : > { %v644_v1 = vld [vmem:[%s5595_s9 + $0x28] sm:$0xff]  ;;  %v768_v3 = vmul.f32 22.627417, %v640_v0  ;;  %v643_v9 = vld [vmem:[%s5595_s9 + $0x20] sm:$0xff]  ;;  %v767_v12 = vmul.f32 22.627417, %v639_v6 }
  0x7d   : > { %v672_v2 = vld [vmem:[%s5595_s9 + $0x108] sm:$0xff]  ;;  %v772_v4 = vmul.f32 22.627417, %v644_v1  ;;  %v671_v10 = vld [vmem:[%s5595_s9 + $0x100] sm:$0xff]  ;;  %v771_v13 = vmul.f32 22.627417, %v643_v9 }
  0x7e   : > { %v676_v5 = vld [vmem:[%s5595_s9 + $0x128] sm:$0xff]  ;;  %v800_v7 = vmul.f32 22.627417, %v672_v2  ;;  %v675_v14 = vld [vmem:[%s5595_s9 + $0x120] sm:$0xff]  ;;  %v799_v17 = vmul.f32 22.627417, %v671_v10 }
  0x7f   : > { %v804_v8 = vmul.f32 22.627417, %v676_v5  ;;  %v4696_v11 = vpack.c.bf16 %v772_v4, %v768_v3  ;;  %v648_v15 = vld [vmem:[%s5595_s9 + $0x48] sm:$0xff]  ;;  %v803_v18 = vmul.f32 22.627417, %v675_v14  ;;  %v4698_v21 = vpack.c.bf16 %v771_v13, %v767_v12  ;;  %v647_v25 = vld [vmem:[%s5595_s9 + $0x40] sm:$0xff] }
  0x80   : > { %v652_v19 = vld [vmem:[%s5595_s9 + $0x68] sm:$0xff]  ;;  %v776_v22 = vmul.f32 22.627417, %v648_v15  ;;  %v651_v29 = vld [vmem:[%s5595_s9 + $0x60] sm:$0xff]  ;;  %v775_v32 = vmul.f32 22.627417, %v647_v25 }
  0x81   : > { %v4728_v16 = vpack.c.bf16 %v804_v8, %v800_v7  ;;  %v680_v20 = vld [vmem:[%s5595_s9 + $0x148] sm:$0xff]  ;;  %4697 = vmatprep.subr.bf16.mxu0 %v4696_v11  ;;  %v780_v23 = vmul.f32 22.627417, %v652_v19  ;;  %v4730_v26 = vpack.c.bf16 %v803_v18, %v799_v17  ;;  %v679_v30 = vld [vmem:[%s5595_s9 + $0x140] sm:$0xff]  ;;  %v779_v33 = vmul.f32 22.627417, %v651_v29 }
  0x82   : > { %v684_v24 = vld [vmem:[%s5595_s9 + $0x168] sm:$0xff]  ;;  %v808_v27 = vmul.f32 22.627417, %v680_v20  ;;  %4699 = vmatpush1.bf16.xpose.msra.mxu0 %v4698_v21  ;;  %v683_v34 = vld [vmem:[%s5595_s9 + $0x160] sm:$0xff]  ;;  %v807_v37 = vmul.f32 22.627417, %v679_v30 }
  0x83   : > { %4729 = vmatprep.subr.bf16.mxu1 %v4728_v16  ;;  %v812_v28 = vmul.f32 22.627417, %v684_v24  ;;  %v4700_v31 = vpack.c.bf16 %v780_v23, %v776_v22  ;;  %v656_v35 = vld [vmem:[%s5595_s9 + $0x88] sm:$0xff]  ;;  %v811_v38 = vmul.f32 22.627417, %v683_v34  ;;  %v4702_v46 = vpack.c.bf16 %v779_v33, %v775_v32  ;;  %v655_v47 = vld [vmem:[%s5595_s9 + $0x80] sm:$0xff] }
  0x84   : > { %4731 = vmatpush1.bf16.xpose.msra.mxu1 %v4730_v26  ;;  %v660_v39 = vld [vmem:[%s5595_s9 + $0xa8] sm:$0xff]  ;;  %v784_v41 = vmul.f32 22.627417, %v656_v35  ;;  %v659_v48 = vld [vmem:[%s5595_s9 + $0xa0] sm:$0xff]  ;;  %v783_v56 = vmul.f32 22.627417, %v655_v47 }
  0x85   : > { %v4732_v36 = vpack.c.bf16 %v812_v28, %v808_v27  ;;  %v688_v40 = vld [vmem:[%s5595_s9 + $0x188] sm:$0xff]  ;;  %4701 = vmatprep.subr.bf16.mxu0 %v4700_v31  ;;  %v788_v42 = vmul.f32 22.627417, %v660_v39  ;;  %v4734_v49 = vpack.c.bf16 %v811_v38, %v807_v37  ;;  %v687_v51 = vld [vmem:[%s5595_s9 + $0x180] sm:$0xff]  ;;  %v787_v57 = vmul.f32 22.627417, %v659_v48 }
  0x86   : > { %v692_v43 = vld [vmem:[%s5595_s9 + $0x1a8] sm:$0xff]  ;;  %v816_v44 = vmul.f32 22.627417, %v688_v40  ;;  %v691_v52 = vld [vmem:[%s5595_s9 + $0x1a0] sm:$0xff]  ;;  %v815_v60 = vmul.f32 22.627417, %v687_v51 }
  0x87   : > { %4733 = vmatprep.subr.bf16.mxu1 %v4732_v36  ;;  %v820_v45 = vmul.f32 22.627417, %v692_v43  ;;  %v4704_v50 = vpack.c.bf16 %v788_v42, %v784_v41  ;;  %v664_v54 = vld [vmem:[%s5595_s9 + $0xc8] sm:$0xff]  ;;  %v819_v61 = vmul.f32 22.627417, %v691_v52  ;;  %v4706_v4 = vpack.c.bf16 %v787_v57, %v783_v56  ;;  %v663_v7 = vld [vmem:[%s5595_s9 + $0xc0] sm:$0xff] }
  0x88   : > { %v668_v55 = vld [vmem:[%s5595_s9 + $0xe8] sm:$0xff]  ;;  %v792_v63 = vmul.f32 22.627417, %v664_v54  ;;  %v667_v8 = vld [vmem:[%s5595_s9 + $0xe0] sm:$0xff]  ;;  %v642_v12 = vld [vmem:[%s5595_s9 + $0x18] sm:$0xff]  ;;  %s7301_s24 = scalar_lea.vmem [#allocation10], %s5583_s10 }
  0x89   : > { %v4736_v53 = vpack.c.bf16 %v820_v45, %v816_v44  ;;  %v696_v58 = vld [vmem:[%s5595_s9 + $0x1c8] sm:$0xff]  ;;  %v796_v0 = vmul.f32 22.627417, %v668_v55  ;;  %v4738_v5 = vpack.c.bf16 %v819_v61, %v815_v60  ;;  %v695_v9 = vld [vmem:[%s5595_s9 + $0x1c0] sm:$0xff]  ;;  %v646_v13 = vld [vmem:[%s5595_s9 + $0x38] sm:$0xff]  ;;  %s4695_s16 = sshll.u32 %s5329_s15, 14 }
  0x8a   : > { %v700_v59 = vld [vmem:[%s5595_s9 + $0x1e8] sm:$0xff]  ;;  %4703 = vmatpush1.bf16.xpose.msra.mxu0 %v4702_v46  ;;  %v824_v2 = vmul.f32 22.627417, %v696_v58  ;;  %v699_v11 = vld [vmem:[%s5595_s9 + $0x1e0] sm:$0xff]  ;;  %v674_v14 = vld [vmem:[%s5595_s9 + $0x118] sm:$0xff]  ;;  %s4490_s20 = sshll.u32 %s7301_s24, 4  ;;  %s7548_s7 = scalar_lea.hbm %s7614_s3, %s4695_s16  ;;  %s7550_s20 = int_to_ptr.vmem [resolvable:$true] %s4490_s20 }
  0x8b   : > { %v512_v62 = vld [vmem:[%s5587_s22 + $0x8] sm:$0xff]  ;;  %4705 = vmatprep.subr.bf16.mxu0 %v4704_v50  ;;  %v828_v3 = vmul.f32 22.627417, %v700_v59  ;;  %v4708_v6 = vpack.c.bf16 %v796_v0, %v792_v63  ;;  %v678_v15 = vld [vmem:[%s5595_s9 + $0x138] sm:$0xff]  ;;  %v791_v16 = vmul.f32 22.627417, %v663_v7 }
  0x8c   : > { %4735 = vmatpush1.bf16.xpose.msra.mxu1 %v4734_v49  ;;  %v544_v1 = vld [vmem:[%s5587_s22 + $0x108] sm:$0xff]  ;;  %1087 = vmatprep.mubr.f32.mxu0 %v512_v62  ;;  %v795_v17 = vmul.f32 22.627417, %v667_v8  ;;  %v823_v18 = vmul.f32 22.627417, %v695_v9  ;;  %v641_v27 = vld [vmem:[%s5595_s9 + $0x10] sm:$0xff] }
  0x8d   : > { %4737 = vmatprep.subr.bf16.mxu1 %v4736_v53  ;;  %1297 = vmatprep.mubr.f32.mxu1 %v544_v1  ;;  %v4740_v10 = vpack.c.bf16 %v828_v3, %v824_v2  ;;  %v827_v19 = vmul.f32 22.627417, %v699_v11  ;;  %v770_v20 = vmul.f32 22.627417, %v642_v12  ;;  %v774_v21 = vmul.f32 22.627417, %v646_v13 }
  0x8e   : > { %v802_v22 = vmul.f32 22.627417, %v674_v14  ;;  %v806_v23 = vmul.f32 22.627417, %v678_v15  ;;  %v4710_v24 = vpack.c.bf16 %v795_v17, %v791_v16  ;;  %v645_v28 = vld [vmem:[%s5595_s9 + $0x30] sm:$0xff]  ;;  %v650_v32 = vld [vmem:[%s5595_s9 + $0x58] sm:$0xff] }
  0x8f   : > { %v4742_v25 = vpack.c.bf16 %v827_v19, %v823_v18  ;;  %v4712_v26 = vpack.c.bf16 %v774_v21, %v770_v20  ;;  %v673_v30 = vld [vmem:[%s5595_s9 + $0x110] sm:$0xff]  ;;  %v654_v33 = vld [vmem:[%s5595_s9 + $0x78] sm:$0xff]  ;;  %v769_v34 = vmul.f32 22.627417, %v641_v27  ;;  %v773_v35 = vmul.f32 22.627417, %v645_v28 }
  0x90   : > { %v4744_v29 = vpack.c.bf16 %v806_v23, %v802_v22  ;;  %v677_v31 = vld [vmem:[%s5595_s9 + $0x130] sm:$0xff]  ;;  %v682_v36 = vld [vmem:[%s5595_s9 + $0x158] sm:$0xff]  ;;  %v801_v38 = vmul.f32 22.627417, %v673_v30  ;;  %v778_v40 = vmul.f32 22.627417, %v650_v32 }
  0x91   : > { %v686_v37 = vld [vmem:[%s5595_s9 + $0x178] sm:$0xff]  ;;  %v805_v39 = vmul.f32 22.627417, %v677_v31  ;;  %v782_v41 = vmul.f32 22.627417, %v654_v33  ;;  %v511_v44 = vld [vmem:[%s5587_s22] sm:$0xff]  ;;  %v4714_v46 = vpack.c.bf16 %v773_v35, %v769_v34 }
  0x92   : > { %4707 = vmatpush1.bf16.xpose.msra.mxu0 %v4706_v4  ;;  %v810_v42 = vmul.f32 22.627417, %v682_v36  ;;  %v814_v43 = vmul.f32 22.627417, %v686_v37  ;;  %v543_v45 = vld [vmem:[%s5587_s22 + $0x100] sm:$0xff]  ;;  %v516_v48 = vld [vmem:[%s5587_s22 + $0x28] sm:$0xff] }
  0x93   : > { %4709 = vmatprep.subr.bf16.mxu0 %v4708_v6  ;;  %v4746_v47 = vpack.c.bf16 %v805_v39, %v801_v38  ;;  %v649_v49 = vld [vmem:[%s5595_s9 + $0x50] sm:$0xff]  ;;  %v548_v51 = vld [vmem:[%s5587_s22 + $0x128] sm:$0xff]  ;;  %v4716_v52 = vpack.c.bf16 %v782_v41, %v778_v40  ;;  %v515_v55 = vld [vmem:[%s5587_s22 + $0x20] sm:$0xff]  ;;  %s4473_s30 = scalar_lea.sflag [#allocation6], %s5580_s21  ;;  %s5251_s6 = scalar_lea.vmem %s7550_s20, 16384 }
  0x94   : > { %4739 = vmatpush1.bf16.xpose.msra.mxu1 %v4738_v5  ;;  %v653_v50 = vld [vmem:[%s5595_s9 + $0x70] sm:$0xff]  ;;  %v4748_v56 = vpack.c.bf16 %v814_v43, %v810_v42  ;;  %v658_v57 = vld [vmem:[%s5595_s9 + $0x98] sm:$0xff]  ;;  %v777_v59 = vmul.f32 22.627417, %v649_v49  ;;  %v547_v63 = vld [vmem:[%s5587_s22 + $0x120] sm:$0xff]  ;;  %p5252_p0 = scmp.ne.s32.totalorder %s7550_s20, %s5251_s6  ;;  %p7967_p10 = scmp.ne.s32.totalorder %s7680_s25, 0 }
  0x95   : > { %4741 = vmatprep.subr.bf16.mxu1 %v4740_v10  ;;  %v681_v53 = vld [vmem:[%s5595_s9 + $0x150] sm:$0xff]  ;;  %v662_v58 = vld [vmem:[%s5595_s9 + $0xb8] sm:$0xff]  ;;  %v781_v60 = vmul.f32 22.627417, %v653_v50  ;;  %v520_v0 = vld [vmem:[%s5587_s22 + $0x48] sm:$0xff]  ;;  %s5347_s8 = smov [#allocation10]  }
  0x96   : > { %v685_v54 = vld [vmem:[%s5595_s9 + $0x170] sm:$0xff]  ;;  %v690_v61 = vld [vmem:[%s5595_s9 + $0x198] sm:$0xff]  ;;  %v809_v1 = vmul.f32 22.627417, %v681_v53  ;;  %v552_v3 = vld [vmem:[%s5587_s22 + $0x148] sm:$0xff]  ;;  %p5253_p8 = pnand %p5252_p0, %p7967_p10  ;;  %s5255_s26 = sshll.u32 %s5347_s8, 4  ;;  %s5256_s26 = int_to_ptr.vmem [resolvable:$false] %s5255_s26 }
  0x97   : > { %v694_v62 = vld [vmem:[%s5595_s9 + $0x1b8] sm:$0xff]  ;;  %v813_v2 = vmul.f32 22.627417, %v685_v54  ;;  %v786_v4 = vmul.f32 22.627417, %v658_v57  ;;  %v519_v8 = vld [vmem:[%s5587_s22 + $0x40] sm:$0xff]  ;;  %v4718_v10 = vpack.c.bf16 %v781_v60, %v777_v59  ;;  %p5258_p12 = scmp.lt.s32.totalorder %s7550_s20, %s5256_s26 }
  0x98   : > { %v790_v5 = vmul.f32 22.627417, %v662_v58  ;;  %v818_v6 = vmul.f32 22.627417, %v690_v61  ;;  %v822_v7 = vmul.f32 22.627417, %v694_v62  ;;  %p5254_p9 = pneg %p5253_p8 }
  0x99   : > { %v551_v9 = vld [vmem:[%s5587_s22 + $0x140] sm:$0xff]  ;;  %v4750_v11 = vpack.c.bf16 %v813_v2, %v809_v1  ;;  %v524_v12 = vld [vmem:[%s5587_s22 + $0x68] sm:$0xff]  ;;  %v657_v13 = vld [vmem:[%s5595_s9 + $0x90] sm:$0xff]  ;;  %s5257_s1 = scalar_lea.vmem %s5256_s26, 32768 }
  0x9a   : > { %4711 = vmatpush1.bf16.xpose.msra.mxu0 %v4710_v24  ;;  %v661_v14 = vld [vmem:[%s5595_s9 + $0xb0] sm:$0xff]  ;;  %v556_v15 = vld [vmem:[%s5587_s22 + $0x168] sm:$0xff]  ;;  %v4720_v16 = vpack.c.bf16 %v790_v5, %v786_v4  ;;  %v523_v19 = vld [vmem:[%s5587_s22 + $0x60] sm:$0xff]  ;;  %v4752_v20 = vpack.c.bf16 %v822_v7, %v818_v6  ;;  %v785_v23 = vmul.f32 22.627417, %v657_v13  ;;  %p5259_p1 = scmp.lt.s32.totalorder %s5257_s1, %s5251_s6 }
  0x9b   : > { %4713 = vmatprep.subr.bf16.mxu0 %v4712_v26  ;;  %v689_v17 = vld [vmem:[%s5595_s9 + $0x190] sm:$0xff]  ;;  %v666_v21 = vld [vmem:[%s5595_s9 + $0xd8] sm:$0xff]  ;;  %v789_v24 = vmul.f32 22.627417, %v661_v14  ;;  %v555_v27 = vld [vmem:[%s5587_s22 + $0x160] sm:$0xff] }
  0x9c   : > { %4743 = vmatpush1.bf16.xpose.msra.mxu1 %v4742_v25  ;;  %v693_v18 = vld [vmem:[%s5595_s9 + $0x1b0] sm:$0xff]  ;;  %v670_v22 = vld [vmem:[%s5595_s9 + $0xf8] sm:$0xff]  ;;  %v528_v28 = vld [vmem:[%s5587_s22 + $0x88] sm:$0xff]  ;;  %v794_v32 = vmul.f32 22.627417, %v666_v21  ;;  %p5260_p6 = por %p5259_p1, %p5258_p12 }
  0x9d   : > { %4745 = vmatprep.subr.bf16.mxu1 %v4744_v29  ;;  %v698_v25 = vld [vmem:[%s5595_s9 + $0x1d8] sm:$0xff]  ;;  %v817_v29 = vmul.f32 22.627417, %v689_v17  ;;  %v821_v30 = vmul.f32 22.627417, %v693_v18  ;;  %v560_v31 = vld [vmem:[%s5587_s22 + $0x188] sm:$0xff]  ;;  %v4722_v38 = vpack.c.bf16 %v789_v24, %v785_v23 }
  0x9e   : > { %v702_v26 = vld [vmem:[%s5595_s9 + $0x1f8] sm:$0xff]  ;;  %v798_v33 = vmul.f32 22.627417, %v670_v22  ;;  %v826_v34 = vmul.f32 22.627417, %v698_v25  ;;  %v527_v36 = vld [vmem:[%s5587_s22 + $0x80] sm:$0xff]  ;;  %p5261_p13 = pnand %p5260_p6, %p5254_p9 }
  0x9f   : > { %v830_v35 = vmul.f32 22.627417, %v702_v26  ;;  %v559_v37 = vld [vmem:[%s5587_s22 + $0x180] sm:$0xff]  ;;  %v4754_v39 = vpack.c.bf16 %v821_v30, %v817_v29  ;;  %v532_v40 = vld [vmem:[%s5587_s22 + $0xa8] sm:$0xff]  ;;  %v665_v41 = vld [vmem:[%s5595_s9 + $0xd0] sm:$0xff] }
  0xa0   : > { %v669_v42 = vld [vmem:[%s5595_s9 + $0xf0] sm:$0xff]  ;;  %v564_v43 = vld [vmem:[%s5587_s22 + $0x1a8] sm:$0xff]  ;;  %v567_v1 = vld [vmem:[%s5587_s22 + $0x1c0] sm:$0xff] }
  0xa1   : > { %1088 = vmatmul.mubr.f32.vlgmr.msra.gmra.mrb[0].mxu0 %v511_v44  ;;  %v4724_v44 = vpack.c.bf16 %v798_v33, %v794_v32  ;;  %v704_v49 = vld [vmem:[%s5595_s9 + $0x208] sm:$0xff]  ;;  %v703_v5 = vld [vmem:[%s5595_s9 + $0x200] sm:$0xff]  ;;  %v546_v23 = vld [vmem:[%s5587_s22 + $0x118] sm:$0xff] }
  0xa2   : > { %4715 = vmatpush1.bf16.xpose.msra.mxu0 %v4714_v46  ;;  %1092 = vmatprep.mubr.f32.mxu0 %v516_v48  ;;  %v701_v46 = vld [vmem:[%s5595_s9 + $0x1f0] sm:$0xff]  ;;  %v4756_v48 = vpack.c.bf16 %v830_v35, %v826_v34  ;;  %v708_v50 = vld [vmem:[%s5595_s9 + $0x228] sm:$0xff]  ;;  %v832_v60 = vmul.f32 22.627417, %v704_v49  ;;  %v707_v6 = vld [vmem:[%s5595_s9 + $0x220] sm:$0xff] }
  0xa3   : > { %1298 = vmatmul.mubr.f32.vlgmr.msra.gmra.mrb[0].mxu1 %v543_v45  ;;  %4717 = vmatprep.subr.bf16.mxu0 %v4716_v52  ;;  %v697_v45 = vld [vmem:[%s5595_s9 + $0x1d0] sm:$0xff]  ;;  %v797_v52 = vmul.f32 22.627417, %v669_v42  ;;  %v736_v53 = vld [vmem:[%s5595_s9 + $0x308] sm:$0xff]  ;;  %v829_v58 = vmul.f32 22.627417, %v701_v46 }
  0xa4   : > { %4747 = vmatpush1.bf16.xpose.msra.mxu1 %v4746_v47  ;;  %1302 = vmatprep.mubr.f32.mxu1 %v548_v51  ;;  %v531_v47 = vld [vmem:[%s5587_s22 + $0xa0] sm:$0xff]  ;;  %v793_v51 = vmul.f32 22.627417, %v665_v41  ;;  %v740_v54 = vld [vmem:[%s5595_s9 + $0x328] sm:$0xff]  ;;  %v825_v57 = vmul.f32 22.627417, %v697_v45 }
  0xa5   : > { %1093 = vmatmul.mubr.f32.gmra.mrb[2].mxu0 %v515_v55  ;;  %4749 = vmatprep.subr.bf16.mxu1 %v4748_v56  ;;  %v563_v55 = vld [vmem:[%s5587_s22 + $0x1a0] sm:$0xff]  ;;  %v536_v56 = vld [vmem:[%s5587_s22 + $0xc8] sm:$0xff]  ;;  %v836_v61 = vmul.f32 22.627417, %v708_v50  ;;  %v864_v62 = vmul.f32 22.627417, %v736_v53 }
  0xa6   : > { %1097 = vmatprep.mubr.f32.mxu0 %v520_v0  ;;  %v568_v59 = vld [vmem:[%s5587_s22 + $0x1c8] sm:$0xff]  ;;  %v535_v0 = vld [vmem:[%s5587_s22 + $0xc0] sm:$0xff]  ;;  %v4726_v2 = vpack.c.bf16 %v797_v52, %v793_v51  ;;  %v545_v29 = vld [vmem:[%s5587_s22 + $0x110] sm:$0xff] }
  0xa7   : > { %1303 = vmatmul.mubr.f32.gmra.mrb[2].mxu1 %v547_v63  ;;  %v868_v63 = vmul.f32 22.627417, %v740_v54  ;;  %v540_v4 = vld [vmem:[%s5587_s22 + $0xe8] sm:$0xff]  ;;  %v518_v32 = vld [vmem:[%s5587_s22 + $0x38] sm:$0xff]  ;;  %v711_v33 = vld [vmem:[%s5595_s9 + $0x240] sm:$0xff] }
  0xa8   : > { %1307 = vmatprep.mubr.f32.mxu1 %v552_v3  ;;  %v4758_v3 = vpack.c.bf16 %v829_v58, %v825_v57  ;;  %v572_v7 = vld [vmem:[%s5587_s22 + $0x1e8] sm:$0xff]  ;;  %v715_v34 = vld [vmem:[%s5595_s9 + $0x260] sm:$0xff]  ;;  %v550_v35 = vld [vmem:[%s5587_s22 + $0x138] sm:$0xff] }
  0xa9   : > { %1098 = vmatmul.mubr.f32.gmra.mrb[4].mxu0 %v519_v8  ;;  %v4760_v8 = vpack.c.bf16 %v836_v61, %v832_v60  ;;  %v712_v13 = vld [vmem:[%s5595_s9 + $0x248] sm:$0xff]  ;;  %v554_v51 = vld [vmem:[%s5587_s22 + $0x158] sm:$0xff]  ;;  %v553_v57 = vld [vmem:[%s5587_s22 + $0x150] sm:$0xff] }
  0xaa   : > { %4719 = vmatpush1.bf16.xpose.msra.mxu0 %v4718_v10  ;;  %1102 = vmatprep.mubr.f32.mxu0 %v524_v12  ;;  %v739_v10 = vld [vmem:[%s5595_s9 + $0x320] sm:$0xff]  ;;  %v4792_v12 = vpack.c.bf16 %v868_v63, %v864_v62  ;;  %v716_v14 = vld [vmem:[%s5595_s9 + $0x268] sm:$0xff]  ;;  %v840_v24 = vmul.f32 22.627417, %v712_v13  ;;  %v526_v60 = vld [vmem:[%s5587_s22 + $0x78] sm:$0xff] }
  0xab   : > { %1308 = vmatmul.mubr.f32.gmra.mrb[4].mxu1 %v551_v9  ;;  %4721 = vmatprep.subr.bf16.mxu0 %v4720_v16  ;;  %v735_v9 = vld [vmem:[%s5595_s9 + $0x300] sm:$0xff]  ;;  %v835_v16 = vmul.f32 22.627417, %v707_v6  ;;  %v744_v17 = vld [vmem:[%s5595_s9 + $0x348] sm:$0xff]  ;;  %v867_v22 = vmul.f32 22.627417, %v739_v10 }
  0xac   : > { %4751 = vmatpush1.bf16.xpose.msra.mxu1 %v4750_v11  ;;  %1312 = vmatprep.mubr.f32.mxu1 %v556_v15  ;;  %v539_v11 = vld [vmem:[%s5587_s22 + $0xe0] sm:$0xff]  ;;  %v831_v15 = vmul.f32 22.627417, %v703_v5  ;;  %v748_v18 = vld [vmem:[%s5595_s9 + $0x368] sm:$0xff]  ;;  %v863_v21 = vmul.f32 22.627417, %v735_v9 }
  0xad   : > { %1103 = vmatmul.mubr.f32.gmra.mrb[6].mxu0 %v523_v19  ;;  %4753 = vmatprep.subr.bf16.mxu1 %v4752_v20  ;;  %v571_v19 = vld [vmem:[%s5587_s22 + $0x1e0] sm:$0xff]  ;;  %v514_v20 = vld [vmem:[%s5587_s22 + $0x18] sm:$0xff]  ;;  %v844_v25 = vmul.f32 22.627417, %v716_v14  ;;  %v872_v26 = vmul.f32 22.627417, %v744_v17 }
  0xae   : > { %1107 = vmatprep.mubr.f32.mxu0 %v528_v28  ;;  %v513_v28 = vld [vmem:[%s5587_s22 + $0x10] sm:$0xff]  ;;  %v4762_v30 = vpack.c.bf16 %v835_v16, %v831_v15  ;;  %v720_v41 = vld [vmem:[%s5595_s9 + $0x288] sm:$0xff]  ;;  %v719_v61 = vld [vmem:[%s5595_s9 + $0x280] sm:$0xff] }
  0xaf   : > { %1313 = vmatmul.mubr.f32.gmra.mrb[6].mxu1 %v555_v27  ;;  %v876_v27 = vmul.f32 22.627417, %v748_v18  ;;  %v724_v42 = vld [vmem:[%s5595_s9 + $0x2a8] sm:$0xff]  ;;  %v848_v52 = vmul.f32 22.627417, %v720_v41  ;;  %v723_v62 = vld [vmem:[%s5595_s9 + $0x2a0] sm:$0xff] }
  0xb0   : > { %1317 = vmatprep.mubr.f32.mxu1 %v560_v31  ;;  %v4794_v31 = vpack.c.bf16 %v867_v22, %v863_v21  ;;  %v752_v45 = vld [vmem:[%s5595_s9 + $0x388] sm:$0xff]  ;;  %v852_v53 = vmul.f32 22.627417, %v724_v42  ;;  %v558_v63 = vld [vmem:[%s5587_s22 + $0x178] sm:$0xff]  ;;  %v561_v21 = vld [vmem:[%s5587_s22 + $0x190] sm:$0xff] }
  0xb1   : > { %1108 = vmatmul.mubr.f32.gmra.mrb[8].mxu0 %v527_v36  ;;  %v4764_v36 = vpack.c.bf16 %v844_v25, %v840_v24  ;;  %v756_v46 = vld [vmem:[%s5595_s9 + $0x3a8] sm:$0xff]  ;;  %v880_v54 = vmul.f32 22.627417, %v752_v45  ;;  %v562_v15 = vld [vmem:[%s5587_s22 + $0x198] sm:$0xff]  ;;  %v727_v25 = vld [vmem:[%s5595_s9 + $0x2c0] sm:$0xff] }
  0xb2   : > { %4723 = vmatpush1.bf16.xpose.msra.mxu0 %v4722_v38  ;;  %1112 = vmatprep.mubr.f32.mxu0 %v532_v40  ;;  %v747_v38 = vld [vmem:[%s5595_s9 + $0x360] sm:$0xff]  ;;  %v4796_v40 = vpack.c.bf16 %v876_v27, %v872_v26  ;;  %v728_v5 = vld [vmem:[%s5595_s9 + $0x2c8] sm:$0xff]  ;;  %v534_v24 = vld [vmem:[%s5587_s22 + $0xb8] sm:$0xff] }
  0xb3   : > { %1318 = vmatmul.mubr.f32.gmra.mrb[8].mxu1 %v559_v37  ;;  %4725 = vmatprep.subr.bf16.mxu0 %v4724_v44  ;;  %v743_v37 = vld [vmem:[%s5595_s9 + $0x340] sm:$0xff]  ;;  %v843_v44 = vmul.f32 22.627417, %v715_v34  ;;  %v875_v50 = vmul.f32 22.627417, %v747_v38  ;;  %v732_v6 = vld [vmem:[%s5595_s9 + $0x2e8] sm:$0xff] }
  0xb4   : > { %4755 = vmatpush1.bf16.xpose.msra.mxu1 %v4754_v39  ;;  %1322 = vmatprep.mubr.f32.mxu1 %v564_v43  ;;  %v517_v39 = vld [vmem:[%s5587_s22 + $0x30] sm:$0xff]  ;;  %v839_v43 = vmul.f32 22.627417, %v711_v33  ;;  %v871_v49 = vmul.f32 22.627417, %v743_v37  ;;  %v760_v9 = vld [vmem:[%s5595_s9 + $0x3c8] sm:$0xff] }
  0xb5   : > { %1113 = vmatmul.mubr.f32.gmra.mrb[10].mxu0 %v531_v47  ;;  %4757 = vmatprep.subr.bf16.mxu1 %v4756_v48  ;;  %v549_v47 = vld [vmem:[%s5587_s22 + $0x130] sm:$0xff]  ;;  %v522_v48 = vld [vmem:[%s5587_s22 + $0x58] sm:$0xff]  ;;  %v764_v10 = vld [vmem:[%s5595_s9 + $0x3e8] sm:$0xff]  ;;  %v856_v16 = vmul.f32 22.627417, %v728_v5 }
  0xb6   : > { %1117 = vmatprep.mubr.f32.mxu0 %v536_v56  ;;  %v521_v56 = vld [vmem:[%s5587_s22 + $0x50] sm:$0xff]  ;;  %v4766_v58 = vpack.c.bf16 %v843_v44, %v839_v43  ;;  %v860_v17 = vmul.f32 22.627417, %v732_v6  ;;  %v888_v18 = vmul.f32 22.627417, %v760_v9  ;;  %v731_v26 = vld [vmem:[%s5595_s9 + $0x2e0] sm:$0xff] }
  0xb7   : > { %1323 = vmatmul.mubr.f32.gmra.mrb[10].mxu1 %v563_v55  ;;  %v884_v55 = vmul.f32 22.627417, %v756_v46  ;;  %v566_v27 = vld [vmem:[%s5587_s22 + $0x1b8] sm:$0xff] }
  0xb8   : > { %1327 = vmatprep.mubr.f32.mxu1 %v568_v59  ;;  %v4798_v59 = vpack.c.bf16 %v875_v50, %v871_v49  ;;  %v706_v33 = vld [vmem:[%s5595_s9 + $0x218] sm:$0xff]  ;;  %v569_v49 = vld [vmem:[%s5587_s22 + $0x1d0] sm:$0xff] }
  0xb9   : > { %1118 = vmatmul.mubr.f32.gmra.mrb[12].mxu0 %v535_v0  ;;  %v4768_v0 = vpack.c.bf16 %v852_v53, %v848_v52  ;;  %v710_v34 = vld [vmem:[%s5595_s9 + $0x238] sm:$0xff]  ;;  %v834_v44 = vmul.f32 22.627417, %v706_v33  ;;  %v705_v53 = vld [vmem:[%s5595_s9 + $0x210] sm:$0xff] }
  0xba   : > { %4727 = vmatpush1.bf16.xpose.msra.mxu0 %v4726_v2  ;;  %1122 = vmatprep.mubr.f32.mxu0 %v540_v4  ;;  %v755_v2 = vld [vmem:[%s5595_s9 + $0x3a0] sm:$0xff]  ;;  %v4800_v4 = vpack.c.bf16 %v884_v55, %v880_v54  ;;  %v738_v37 = vld [vmem:[%s5595_s9 + $0x318] sm:$0xff]  ;;  %v838_v45 = vmul.f32 22.627417, %v710_v34  ;;  %v709_v54 = vld [vmem:[%s5595_s9 + $0x230] sm:$0xff] }
  0xbb   : > { %1328 = vmatmul.mubr.f32.gmra.mrb[12].mxu1 %v567_v1  ;;  %4761 = vmatprep.subr.bf16.mxu0 %v4760_v8  ;;  %v751_v1 = vld [vmem:[%s5595_s9 + $0x380] sm:$0xff]  ;;  %v851_v8 = vmul.f32 22.627417, %v723_v62  ;;  %v883_v14 = vmul.f32 22.627417, %v755_v2  ;;  %v742_v38 = vld [vmem:[%s5595_s9 + $0x338] sm:$0xff] }
  0xbc   : > { %4759 = vmatpush1.bf16.xpose.msra.mxu1 %v4758_v3  ;;  %1332 = vmatprep.mubr.f32.mxu1 %v572_v7  ;;  %v525_v3 = vld [vmem:[%s5587_s22 + $0x70] sm:$0xff]  ;;  %v847_v7 = vmul.f32 22.627417, %v719_v61  ;;  %v879_v13 = vmul.f32 22.627417, %v751_v1  ;;  %v570_v43 = vld [vmem:[%s5587_s22 + $0x1d8] sm:$0xff] }
  0xbd   : > { %1123 = vmatmul.mubr.f32.gmra.mrb[14].mxu0 %v539_v11  ;;  %4793 = vmatprep.subr.bf16.mxu1 %v4792_v12  ;;  %v557_v11 = vld [vmem:[%s5587_s22 + $0x170] sm:$0xff]  ;;  %v530_v12 = vld [vmem:[%s5587_s22 + $0x98] sm:$0xff]  ;;  %v866_v46 = vmul.f32 22.627417, %v738_v37 }
  0xbe   : > { %1192 = vmatprep.mubr.f32.mxu0 %v514_v20  ;;  %v529_v20 = vld [vmem:[%s5587_s22 + $0x90] sm:$0xff]  ;;  %v4770_v22 = vpack.c.bf16 %v851_v8, %v847_v7  ;;  %v542_v52 = vld [vmem:[%s5587_s22 + $0xf8] sm:$0xff]  ;;  %v608_v7 = vld [vmem:[%s5587_s22 + $0x308] sm:$0xff] }
  0xbf   : > { %1333 = vmatmul.mubr.f32.gmra.mrb[14].mxu1 %v571_v19  ;;  %v892_v19 = vmul.f32 22.627417, %v764_v10  ;;  %v574_v55 = vld [vmem:[%s5587_s22 + $0x1f8] sm:$0xff] }
  0xc0   : > { %1402 = vmatprep.mubr.f32.mxu1 %v546_v23  ;;  %v4802_v23 = vpack.c.bf16 %v883_v14, %v879_v13  ;;  %v714_v61 = vld [vmem:[%s5595_s9 + $0x258] sm:$0xff]  ;;  %v607_v13 = vld [vmem:[%s5587_s22 + $0x300] sm:$0xff] }
  0xc1   : > { %1193 = vmatmul.mubr.f32.vlgmr.msra.gmra.mrb[0].mxu0 %v513_v28  ;;  %v4772_v28 = vpack.c.bf16 %v860_v17, %v856_v16  ;;  %v718_v62 = vld [vmem:[%s5595_s9 + $0x278] sm:$0xff]  ;;  %v842_v8 = vmul.f32 22.627417, %v714_v61  ;;  %v580_v16 = vld [vmem:[%s5587_s22 + $0x228] sm:$0xff]  ;;  %v713_v17 = vld [vmem:[%s5595_s9 + $0x250] sm:$0xff] }
  0xc2   : > { %4763 = vmatpush1.bf16.xpose.msra.mxu0 %v4762_v30  ;;  %1197 = vmatprep.mubr.f32.mxu0 %v518_v32  ;;  %v763_v30 = vld [vmem:[%s5595_s9 + $0x3e0] sm:$0xff]  ;;  %v4804_v32 = vpack.c.bf16 %v892_v19, %v888_v18  ;;  %v746_v1 = vld [vmem:[%s5595_s9 + $0x358] sm:$0xff]  ;;  %v846_v9 = vmul.f32 22.627417, %v718_v62  ;;  %v717_v18 = vld [vmem:[%s5595_s9 + $0x270] sm:$0xff] }
  0xc3   : > { %1403 = vmatmul.mubr.f32.vlgmr.msra.gmra.mrb[0].mxu1 %v545_v29  ;;  %4765 = vmatprep.subr.bf16.mxu0 %v4764_v36  ;;  %v759_v29 = vld [vmem:[%s5595_s9 + $0x3c0] sm:$0xff]  ;;  %v859_v36 = vmul.f32 22.627417, %v731_v26  ;;  %v891_v42 = vmul.f32 22.627417, %v763_v30  ;;  %v750_v2 = vld [vmem:[%s5595_s9 + $0x378] sm:$0xff] }
  0xc4   : > { %4795 = vmatpush1.bf16.xpose.msra.mxu1 %v4794_v31  ;;  %1407 = vmatprep.mubr.f32.mxu1 %v550_v35  ;;  %v533_v31 = vld [vmem:[%s5587_s22 + $0xb0] sm:$0xff]  ;;  %v855_v35 = vmul.f32 22.627417, %v727_v25  ;;  %v887_v41 = vmul.f32 22.627417, %v759_v29  ;;  %v612_v19 = vld [vmem:[%s5587_s22 + $0x328] sm:$0xff] }
  0xc5   : > { %1198 = vmatmul.mubr.f32.gmra.mrb[2].mxu0 %v517_v39  ;;  %4797 = vmatprep.subr.bf16.mxu1 %v4796_v40  ;;  %v565_v39 = vld [vmem:[%s5587_s22 + $0x1b0] sm:$0xff]  ;;  %v538_v40 = vld [vmem:[%s5587_s22 + $0xd8] sm:$0xff]  ;;  %v874_v10 = vmul.f32 22.627417, %v746_v1 }
  0xc6   : > { %1202 = vmatprep.mubr.f32.mxu0 %v522_v48  ;;  %v537_v48 = vld [vmem:[%s5587_s22 + $0xd0] sm:$0xff]  ;;  %v4774_v50 = vpack.c.bf16 %v859_v36, %v855_v35  ;;  %v722_v25 = vld [vmem:[%s5595_s9 + $0x298] sm:$0xff]  ;;  %v616_v35 = vld [vmem:[%s5587_s22 + $0x348] sm:$0xff] }
  0xc7   : > { %1408 = vmatmul.mubr.f32.gmra.mrb[2].mxu1 %v549_v47  ;;  %v870_v47 = vmul.f32 22.627417, %v742_v38  ;;  %v726_v26 = vld [vmem:[%s5595_s9 + $0x2b8] sm:$0xff]  ;;  %v850_v36 = vmul.f32 22.627417, %v722_v25 }
  0xc8   : > { %1412 = vmatprep.mubr.f32.mxu1 %v554_v51  ;;  %v4806_v51 = vpack.c.bf16 %v891_v42, %v887_v41  ;;  %v754_v29 = vld [vmem:[%s5595_s9 + $0x398] sm:$0xff]  ;;  %v854_v37 = vmul.f32 22.627417, %v726_v26  ;;  %v615_v41 = vld [vmem:[%s5587_s22 + $0x340] sm:$0xff] }
  0xc9   : > { %1203 = vmatmul.mubr.f32.gmra.mrb[4].mxu0 %v521_v56  ;;  %v4776_v56 = vpack.c.bf16 %v838_v45, %v834_v44  ;;  %v758_v30 = vld [vmem:[%s5595_s9 + $0x3b8] sm:$0xff]  ;;  %v882_v38 = vmul.f32 22.627417, %v754_v29  ;;  %v588_v44 = vld [vmem:[%s5587_s22 + $0x268] sm:$0xff]  ;;  %v721_v45 = vld [vmem:[%s5595_s9 + $0x290] sm:$0xff] }
  0xca   : > { %4767 = vmatpush1.bf16.xpose.msra.mxu0 %v4766_v58  ;;  %1207 = vmatprep.mubr.f32.mxu0 %v526_v60  ;;  %v741_v58 = vld [vmem:[%s5595_s9 + $0x330] sm:$0xff]  ;;  %v4808_v60 = vpack.c.bf16 %v870_v47, %v866_v46  ;;  %v620_v47 = vld [vmem:[%s5587_s22 + $0x368] sm:$0xff]  ;;  %v631_v26 = vld [vmem:[%s5587_s22 + $0x3c0] sm:$0xff] }
  0xcb   : > { %1413 = vmatmul.mubr.f32.gmra.mrb[4].mxu1 %v553_v57  ;;  %4769 = vmatprep.subr.bf16.mxu0 %v4768_v0  ;;  %v737_v57 = vld [vmem:[%s5595_s9 + $0x310] sm:$0xff]  ;;  %v837_v0 = vmul.f32 22.627417, %v709_v54  ;;  %v869_v6 = vmul.f32 22.627417, %v741_v58  ;;  %v734_v54 = vld [vmem:[%s5595_s9 + $0x2f8] sm:$0xff] }
  0xcc   : > { %4799 = vmatpush1.bf16.xpose.msra.mxu1 %v4798_v59  ;;  %1417 = vmatprep.mubr.f32.mxu1 %v558_v63  ;;  %v541_v59 = vld [vmem:[%s5587_s22 + $0xf0] sm:$0xff]  ;;  %v833_v63 = vmul.f32 22.627417, %v705_v53  ;;  %v865_v5 = vmul.f32 22.627417, %v737_v57  ;;  %v730_v53 = vld [vmem:[%s5595_s9 + $0x2d8] sm:$0xff] }
  0xcd   : > { %1208 = vmatmul.mubr.f32.gmra.mrb[6].mxu0 %v525_v3  ;;  %4801 = vmatprep.subr.bf16.mxu1 %v4800_v4  ;;  %v573_v3 = vld [vmem:[%s5587_s22 + $0x1f0] sm:$0xff]  ;;  %v576_v4 = vld [vmem:[%s5587_s22 + $0x208] sm:$0xff]  ;;  %v762_v57 = vld [vmem:[%s5595_s9 + $0x3d8] sm:$0xff]  ;;  %v862_v1 = vmul.f32 22.627417, %v734_v54 }
  0xce   : > { %1212 = vmatprep.mubr.f32.mxu0 %v530_v12  ;;  %v575_v12 = vld [vmem:[%s5587_s22 + $0x200] sm:$0xff]  ;;  %v4778_v14 = vpack.c.bf16 %v837_v0, %v833_v63  ;;  %v725_v46 = vld [vmem:[%s5595_s9 + $0x2b0] sm:$0xff]  ;;  %v766_v58 = vld [vmem:[%s5595_s9 + $0x3f8] sm:$0xff]  ;;  %v858_v0 = vmul.f32 22.627417, %v730_v53 }
  0xcf   : > { %1418 = vmatmul.mubr.f32.gmra.mrb[6].mxu1 %v557_v11  ;;  %v878_v11 = vmul.f32 22.627417, %v750_v2  ;;  %v624_v63 = vld [vmem:[%s5587_s22 + $0x388] sm:$0xff]  ;;  %v890_v2 = vmul.f32 22.627417, %v762_v57  ;;  %v630_v53 = vld [vmem:[%s5587_s22 + $0x3b8] sm:$0xff] }
  0xd0   : > { %1422 = vmatprep.mubr.f32.mxu1 %v562_v15  ;;  %v4810_v15 = vpack.c.bf16 %v869_v6, %v865_v5  ;;  %v623_v6 = vld [vmem:[%s5587_s22 + $0x380] sm:$0xff]  ;;  %v636_v29 = vld [vmem:[%s5587_s22 + $0x3e8] sm:$0xff]  ;;  %v597_v54 = vld [vmem:[%s5587_s22 + $0x2b0] sm:$0xff] }
  0xd1   : > { %1213 = vmatmul.mubr.f32.gmra.mrb[8].mxu0 %v529_v20  ;;  %v4780_v20 = vpack.c.bf16 %v846_v9, %v842_v8  ;;  %v729_v8 = vld [vmem:[%s5595_s9 + $0x2d0] sm:$0xff]  ;;  %v634_v57 = vld [vmem:[%s5587_s22 + $0x3d8] sm:$0xff] }
  0xd2   : > { %4771 = vmatpush1.bf16.xpose.msra.mxu0 %v4770_v22  ;;  %1217 = vmatprep.mubr.f32.mxu0 %v534_v24  ;;  %v749_v22 = vld [vmem:[%s5595_s9 + $0x370] sm:$0xff]  ;;  %v4812_v24 = vpack.c.bf16 %v878_v11, %v874_v10  ;;  %v596_v10 = vld [vmem:[%s5587_s22 + $0x2a8] sm:$0xff]  ;;  %v4788_v11 = vpack.c.bf16 %v862_v1, %v858_v0  ;;  %v5344_v0 = vmov -inf  }
  0xd3   : > { %1423 = vmatmul.mubr.f32.gmra.mrb[8].mxu1 %v561_v21  ;;  %4773 = vmatprep.subr.bf16.mxu0 %v4772_v28  ;;  %v745_v21 = vld [vmem:[%s5595_s9 + $0x350] sm:$0xff]  ;;  %v845_v28 = vmul.f32 22.627417, %v717_v18  ;;  %v877_v34 = vmul.f32 22.627417, %v749_v22  ;;  %319 = vst.msk [vmem:[#allocation2] sm:$0xff] %vm318_vm0, %v5344_v0 }
  0xd4   : > { %4803 = vmatpush1.bf16.xpose.msra.mxu1 %v4802_v23  ;;  %1427 = vmatprep.mubr.f32.mxu1 %v566_v27  ;;  %v579_v23 = vld [vmem:[%s5587_s22 + $0x220] sm:$0xff]  ;;  %v841_v27 = vmul.f32 22.627417, %v713_v17  ;;  %v873_v33 = vmul.f32 22.627417, %v745_v21  ;;  %v733_v9 = vld [vmem:[%s5595_s9 + $0x2f0] sm:$0xff] }
  0xd5   : > { %1218 = vmatmul.mubr.f32.gmra.mrb[10].mxu0 %v533_v31  ;;  %4805 = vmatprep.subr.bf16.mxu1 %v4804_v32  ;;  %v611_v31 = vld [vmem:[%s5587_s22 + $0x320] sm:$0xff]  ;;  %v584_v32 = vld [vmem:[%s5587_s22 + $0x248] sm:$0xff]  ;;  %v857_v17 = vmul.f32 22.627417, %v729_v8  ;;  %v861_v18 = vmul.f32 22.627417, %v733_v9 }
  0xd6   : > { %1222 = vmatprep.mubr.f32.mxu0 %v538_v40  ;;  %v583_v40 = vld [vmem:[%s5587_s22 + $0x240] sm:$0xff]  ;;  %v4782_v42 = vpack.c.bf16 %v845_v28, %v841_v27  ;;  %v604_v28 = vld [vmem:[%s5587_s22 + $0x2e8] sm:$0xff]  ;;  %320 = vst.msk [vmem:[#allocation2 + $0x8] sm:$0xff] %vm318_vm0, %v5344_v0  ;;  %321 = vst.msk [vmem:[#allocation2 + $0x10] sm:$0xff] %vm318_vm0, %v5344_v0 }
  0xd7   : > { %1428 = vmatmul.mubr.f32.gmra.mrb[10].mxu1 %v565_v39  ;;  %v886_v39 = vmul.f32 22.627417, %v758_v30  ;;  %v4790_v25 = vpack.c.bf16 %v861_v18, %v857_v17  ;;  %v603_v30 = vld [vmem:[%s5587_s22 + $0x2e0] sm:$0xff]  ;;  %322 = vst.msk [vmem:[#allocation2 + $0x18] sm:$0xff] %vm318_vm0, %v5344_v0  ;;  %323 = vst.msk [vmem:[#allocation2 + $0x20] sm:$0xff] %vm318_vm0, %v5344_v0 }
  0xd8   : > { %1432 = vmatprep.mubr.f32.mxu1 %v570_v43  ;;  %v4814_v43 = vpack.c.bf16 %v877_v34, %v873_v33  ;;  %v610_v33 = vld [vmem:[%s5587_s22 + $0x318] sm:$0xff]  ;;  %v577_v34 = vld [vmem:[%s5587_s22 + $0x210] sm:$0xff]  ;;  %324 = vst.msk [vmem:[#allocation2 + $0x28] sm:$0xff] %vm318_vm0, %v5344_v0  ;;  %325 = vst.msk [vmem:[#allocation2 + $0x30] sm:$0xff] %vm318_vm0, %v5344_v0 }
  0xd9   : > { %1223 = vmatmul.mubr.f32.gmra.mrb[12].mxu0 %v537_v48  ;;  %v4784_v48 = vpack.c.bf16 %v854_v37, %v850_v36  ;;  %v582_v36 = vld [vmem:[%s5587_s22 + $0x238] sm:$0xff]  ;;  %326 = vst.msk [vmem:[#allocation2 + $0x38] sm:$0xff] %vm318_vm0, %v5344_v0  ;;  %327 = vst.msk [vmem:[#allocation2 + $0x40] sm:$0xff] %vm318_vm0, %v5344_v0 }
  0xda   : > { %4775 = vmatpush1.bf16.xpose.msra.mxu0 %v4774_v50  ;;  %1227 = vmatprep.mubr.f32.mxu0 %v542_v52  ;;  %v757_v50 = vld [vmem:[%s5595_s9 + $0x3b0] sm:$0xff]  ;;  %v4816_v52 = vpack.c.bf16 %v886_v39, %v882_v38  ;;  %v614_v37 = vld [vmem:[%s5587_s22 + $0x338] sm:$0xff]  ;;  %328 = vst.msk [vmem:[#allocation2 + $0x48] sm:$0xff] %vm318_vm0, %v5344_v0  ;;  %329 = vst.msk [vmem:[#allocation2 + $0x50] sm:$0xff] %vm318_vm0, %v5344_v0 }
  0xdb   : > { %1433 = vmatmul.mubr.f32.gmra.mrb[12].mxu1 %v569_v49  ;;  %4777 = vmatprep.subr.bf16.mxu0 %v4776_v56  ;;  %v753_v49 = vld [vmem:[%s5595_s9 + $0x390] sm:$0xff]  ;;  %v853_v56 = vmul.f32 22.627417, %v725_v46  ;;  %v885_v62 = vmul.f32 22.627417, %v757_v50  ;;  %330 = vst.msk [vmem:[#allocation2 + $0x58] sm:$0xff] %vm318_vm0, %v5344_v0 }
  0xdc   : > { %4807 = vmatpush1.bf16.xpose.msra.mxu1 %v4806_v51  ;;  %1437 = vmatprep.mubr.f32.mxu1 %v574_v55  ;;  %v587_v51 = vld [vmem:[%s5587_s22 + $0x260] sm:$0xff]  ;;  %v849_v55 = vmul.f32 22.627417, %v721_v45  ;;  %v881_v61 = vmul.f32 22.627417, %v753_v49  ;;  %v581_v38 = vld [vmem:[%s5587_s22 + $0x230] sm:$0xff] }
  0xdd   : > { %1228 = vmatmul.mubr.f32.gmra.mrb[14].mxu0 %v541_v59  ;;  %4809 = vmatprep.subr.bf16.mxu1 %v4808_v60  ;;  %v619_v59 = vld [vmem:[%s5587_s22 + $0x360] sm:$0xff]  ;;  %v592_v60 = vld [vmem:[%s5587_s22 + $0x288] sm:$0xff]  ;;  %v613_v39 = vld [vmem:[%s5587_s22 + $0x330] sm:$0xff]  ;;  %331 = vst.msk [vmem:[#allocation2 + $0x60] sm:$0xff] %vm318_vm0, %v5344_v0 }
  0xde   : > { %1507 = vmatprep.mubr.f32.mxu0 %v576_v4  ;;  %v591_v4 = vld [vmem:[%s5587_s22 + $0x280] sm:$0xff]  ;;  %v4786_v5 = vpack.c.bf16 %v853_v56, %v849_v55  ;;  %v622_v45 = vld [vmem:[%s5587_s22 + $0x378] sm:$0xff]  ;;  %v589_v46 = vld [vmem:[%s5587_s22 + $0x270] sm:$0xff]  ;;  %332 = vst.msk [vmem:[#allocation2 + $0x68] sm:$0xff] %vm318_vm0, %v5344_v0 }
  0xdf   : > { %1438 = vmatmul.mubr.f32.gmra.mrb[14].mxu1 %v573_v3  ;;  %v894_v3 = vmul.f32 22.627417, %v766_v58  ;;  %v626_v49 = vld [vmem:[%s5587_s22 + $0x398] sm:$0xff]  ;;  %v593_v50 = vld [vmem:[%s5587_s22 + $0x290] sm:$0xff]  ;;  %333 = vst.msk [vmem:[#allocation2 + $0x70] sm:$0xff] %vm318_vm0, %v5344_v0  ;;  %334 = vst.msk [vmem:[#allocation2 + $0x78] sm:$0xff] %vm318_vm0, %v5344_v0 }
  0xe0   : > { %1717 = vmatprep.mubr.f32.mxu1 %v608_v7  ;;  %v4818_v7 = vpack.c.bf16 %v885_v62, %v881_v61  ;;  %v629_v55 = vld [vmem:[%s5587_s22 + $0x3b0] sm:$0xff]  ;;  %v602_v56 = vld [vmem:[%s5587_s22 + $0x2d8] sm:$0xff]  ;;  %335 = vst.msk [vmem:[#allocation2 + $0x80] sm:$0xff] %vm318_vm0, %v5344_v0  ;;  %336 = vst.msk [vmem:[#allocation2 + $0x88] sm:$0xff] %vm318_vm0, %v5344_v0 }
  0xe1   : > { %1508 = vmatmul.mubr.f32.vlgmr.msra.gmra.mrb[16].mxu0 %v575_v12  ;;  %v761_v12 = vld [vmem:[%s5595_s9 + $0x3d0] sm:$0xff]  ;;  %v638_v61 = vld [vmem:[%s5587_s22 + $0x3f8] sm:$0xff]  ;;  %337 = vst.msk [vmem:[#allocation2 + $0x90] sm:$0xff] %vm318_vm0, %v5344_v0  ;;  %338 = vst.msk [vmem:[#allocation2 + $0x98] sm:$0xff] %vm318_vm0, %v5344_v0 }
  0xe2   : > { %4779 = vmatpush1.bf16.xpose.msra.mxu0 %v4778_v14  ;;  %1512 = vmatprep.mubr.f32.mxu0 %v580_v16  ;;  %v628_v14 = vld [vmem:[%s5587_s22 + $0x3a8] sm:$0xff]  ;;  %v595_v16 = vld [vmem:[%s5587_s22 + $0x2a0] sm:$0xff]  ;;  %v889_v21 = vmul.f32 22.627417, %v761_v12  ;;  %v601_v58 = vld [vmem:[%s5587_s22 + $0x2d0] sm:$0xff]  ;;  %339 = vst.msk [vmem:[#allocation2 + $0xa0] sm:$0xff] %vm318_vm0, %v5344_v0 }
  0xe3   : > { %1718 = vmatmul.mubr.f32.vlgmr.msra.gmra.mrb[16].mxu1 %v607_v13  ;;  %4781 = vmatprep.subr.bf16.mxu0 %v4780_v20  ;;  %v765_v13 = vld [vmem:[%s5595_s9 + $0x3f0] sm:$0xff]  ;;  %v600_v20 = vld [vmem:[%s5587_s22 + $0x2c8] sm:$0xff]  ;;  %340 = vst.msk [vmem:[#allocation2 + $0xa8] sm:$0xff] %vm318_vm0, %v5344_v0  ;;  %341 = vst.msk [vmem:[#allocation2 + $0xb0] sm:$0xff] %vm318_vm0, %v5344_v0 }
  0xe4   : > { %4811 = vmatpush1.bf16.xpose.msra.mxu1 %v4810_v15  ;;  %1722 = vmatprep.mubr.f32.mxu1 %v612_v19  ;;  %v4820_v15 = vpack.c.bf16 %v894_v3, %v890_v2  ;;  %v627_v19 = vld [vmem:[%s5587_s22 + $0x3a0] sm:$0xff]  ;;  %v893_v22 = vmul.f32 22.627417, %v765_v13  ;;  %v605_v62 = vld [vmem:[%s5587_s22 + $0x2f0] sm:$0xff]  ;;  %342 = vst.msk [vmem:[#allocation2 + $0xb8] sm:$0xff] %vm318_vm0, %v5344_v0  ;;  %343 = vst.msk [vmem:[#allocation2 + $0xc0] sm:$0xff] %vm318_vm0, %v5344_v0 }
  0xe5   : > { %1513 = vmatmul.mubr.f32.gmra.mrb[18].mxu0 %v579_v23  ;;  %4813 = vmatprep.subr.bf16.mxu1 %v4812_v24  ;;  %v632_v23 = vld [vmem:[%s5587_s22 + $0x3c8] sm:$0xff]  ;;  %v599_v24 = vld [vmem:[%s5587_s22 + $0x2c0] sm:$0xff]  ;;  %344 = vst.msk [vmem:[#allocation2 + $0xc8] sm:$0xff] %vm318_vm0, %v5344_v0  ;;  %345 = vst.msk [vmem:[#allocation2 + $0xd0] sm:$0xff] %vm318_vm0, %v5344_v0 }
  0xe6   : > { %1517 = vmatprep.mubr.f32.mxu0 %v584_v32  ;;  %v4822_v27 = vpack.c.bf16 %v893_v22, %v889_v21  ;;  %v578_v32 = vld [vmem:[%s5587_s22 + $0x218] sm:$0xff]  ;;  %346 = vst.msk [vmem:[#allocation2 + $0xd8] sm:$0xff] %vm318_vm0, %v5344_v0  ;;  %347 = vst.msk [vmem:[#allocation2 + $0xe0] sm:$0xff] %vm318_vm0, %v5344_v0 }
  0xe7   : > { %1723 = vmatmul.mubr.f32.gmra.mrb[18].mxu1 %v611_v31  ;;  %v635_v31 = vld [vmem:[%s5587_s22 + $0x3e0] sm:$0xff]  ;;  %348 = vst.msk [vmem:[#allocation2 + $0xe8] sm:$0xff] %vm318_vm0, %v5344_v0  ;;  %349 = vst.msk [vmem:[#allocation2 + $0xf0] sm:$0xff] %vm318_vm0, %v5344_v0 }
  0xe8   : > { %1727 = vmatprep.mubr.f32.mxu1 %v616_v35  ;;  %v609_v35 = vld [vmem:[%s5587_s22 + $0x310] sm:$0xff]  ;;  %350 = vst.msk [vmem:[#allocation2 + $0xf8] sm:$0xff] %vm318_vm0, %v5344_v0 }
  0xe9   : > { %1518 = vmatmul.mubr.f32.gmra.mrb[20].mxu0 %v583_v40  ;;  %v586_v40 = vld [vmem:[%s5587_s22 + $0x258] sm:$0xff] }
  0xea   : > { %4783 = vmatpush1.bf16.xpose.msra.mxu0 %v4782_v42  ;;  %1522 = vmatprep.mubr.f32.mxu0 %v588_v44  ;;  %v585_v42 = vld [vmem:[%s5587_s22 + $0x250] sm:$0xff]  ;;  %v590_v44 = vld [vmem:[%s5587_s22 + $0x278] sm:$0xff] }
  0xeb   : > { %1728 = vmatmul.mubr.f32.gmra.mrb[20].mxu1 %v615_v41  ;;  %4785 = vmatprep.subr.bf16.mxu0 %v4784_v48  ;;  %v618_v41 = vld [vmem:[%s5587_s22 + $0x358] sm:$0xff] }
  0xec   : > { %4815 = vmatpush1.bf16.xpose.msra.mxu1 %v4814_v43  ;;  %1732 = vmatprep.mubr.f32.mxu1 %v620_v47  ;;  %v617_v43 = vld [vmem:[%s5587_s22 + $0x350] sm:$0xff]  ;;  %v594_v48 = vld [vmem:[%s5587_s22 + $0x298] sm:$0xff] }
  0xed   : > { %1523 = vmatmul.mubr.f32.gmra.mrb[22].mxu0 %v587_v51  ;;  %4817 = vmatprep.subr.bf16.mxu1 %v4816_v52  ;;  %v621_v47 = vld [vmem:[%s5587_s22 + $0x370] sm:$0xff]  ;;  %v598_v52 = vld [vmem:[%s5587_s22 + $0x2b8] sm:$0xff] }
  0xee   : > { %1527 = vmatprep.mubr.f32.mxu0 %v592_v60  ;;  %v625_v51 = vld [vmem:[%s5587_s22 + $0x390] sm:$0xff]  ;;  %v606_v60 = vld [vmem:[%s5587_s22 + $0x2f8] sm:$0xff] }
  0xef   : > { %1733 = vmatmul.mubr.f32.gmra.mrb[22].mxu1 %v619_v59  ;;  %v633_v59 = vld [vmem:[%s5587_s22 + $0x3d0] sm:$0xff] }
  0xf0   : > { %1737 = vmatprep.mubr.f32.mxu1 %v624_v63  ;;  %v637_v63 = vld [vmem:[%s5587_s22 + $0x3f0] sm:$0xff] }
  0xf1   : > { %1528 = vmatmul.mubr.f32.gmra.mrb[24].mxu0 %v591_v4 }
  0xf2   : > { %4787 = vmatpush1.bf16.xpose.msra.mxu0 %v4786_v5  ;;  %1532 = vmatprep.mubr.f32.mxu0 %v596_v10 }
  0xf3   : > { %1738 = vmatmul.mubr.f32.gmra.mrb[24].mxu1 %v623_v6  ;;  %4789 = vmatprep.subr.bf16.mxu0 %v4788_v11 }
  0xf4   : > { %4819 = vmatpush1.bf16.xpose.msra.mxu1 %v4818_v7  ;;  %1742 = vmatprep.mubr.f32.mxu1 %v628_v14 }
  0xf5   : > { %1533 = vmatmul.mubr.f32.gmra.mrb[26].mxu0 %v595_v16  ;;  %4821 = vmatprep.subr.bf16.mxu1 %v4820_v15 }
  0xf6   : > { %1537 = vmatprep.mubr.f32.mxu0 %v600_v20 }
  0xf7   : > { %1743 = vmatmul.mubr.f32.gmra.mrb[26].mxu1 %v627_v19 }
  0xf8   : > { %1747 = vmatprep.mubr.f32.mxu1 %v632_v23 }
  0xf9   : > { %1538 = vmatmul.mubr.f32.gmra.mrb[28].mxu0 %v599_v24 }
  0xfa   : > { %4791 = vmatpush1.bf16.xpose.msra.mxu0 %v4790_v25  ;;  %1542 = vmatprep.mubr.f32.mxu0 %v604_v28 }
  0xfb   : > { %1748 = vmatmul.mubr.f32.gmra.mrb[28].mxu1 %v631_v26 }
  0xfc   : > { %4823 = vmatpush1.bf16.xpose.msra.mxu1 %v4822_v27  ;;  %1752 = vmatprep.mubr.f32.mxu1 %v636_v29 }
  0xfd   : > { %1543 = vmatmul.mubr.f32.gmra.mrb[30].mxu0 %v603_v30  ;;  %v7624_v30 = vmov 0  }
  0xfe   : > { %1612 = vmatprep.mubr.f32.mxu0 %v578_v32  ;;  %4968 = vset.pattern.permute.xlu1 %v7624_v30 }
  0xff   : > { %1753 = vmatmul.mubr.f32.gmra.mrb[30].mxu1 %v635_v31  ;;  %4967 = vset.pattern.permute.xlu0 %v7624_v30 }
 0x100   : > { %1822 = vmatprep.mubr.f32.mxu1 %v610_v33 }
 0x101   : > { %1613 = vmatmul.mubr.f32.vlgmr.msra.gmra.mrb[16].mxu0 %v577_v34 }
 0x102   : > { %1617 = vmatprep.mubr.f32.mxu0 %v582_v36 }
 0x103   : > { %1823 = vmatmul.mubr.f32.vlgmr.msra.gmra.mrb[16].mxu1 %v609_v35 }
 0x104   : > { %1827 = vmatprep.mubr.f32.mxu1 %v614_v37 }
 0x105   : > { %1618 = vmatmul.mubr.f32.gmra.mrb[18].mxu0 %v581_v38 }
 0x106   : > { %1622 = vmatprep.mubr.f32.mxu0 %v586_v40 }
 0x107   : > { %1828 = vmatmul.mubr.f32.gmra.mrb[18].mxu1 %v613_v39 }
 0x108   : > { %1832 = vmatprep.mubr.f32.mxu1 %v618_v41 }
 0x109   : > { %1623 = vmatmul.mubr.f32.gmra.mrb[20].mxu0 %v585_v42 }
 0x10a   : > { %1627 = vmatprep.mubr.f32.mxu0 %v590_v44 }
 0x10b   : > { %1833 = vmatmul.mubr.f32.gmra.mrb[20].mxu1 %v617_v43  ;;  %v5346_v43 = vmov 0.0  }
 0x10c   : > { %1837 = vmatprep.mubr.f32.mxu1 %v622_v45  ;;  %359 = vst.msk [vmem:[#allocation3 + $0x40] sm:$0xff] %vm318_vm0, %v5346_v43  ;;  %351 = vst.msk [vmem:[#allocation3] sm:$0xff] %vm318_vm0, %v5346_v43 }
 0x10d   : > { %1628 = vmatmul.mubr.f32.gmra.mrb[22].mxu0 %v589_v46  ;;  %352 = vst.msk [vmem:[#allocation3 + $0x8] sm:$0xff] %vm318_vm0, %v5346_v43  ;;  %353 = vst.msk [vmem:[#allocation3 + $0x10] sm:$0xff] %vm318_vm0, %v5346_v43 }
 0x10e   : > { %1632 = vmatprep.mubr.f32.mxu0 %v594_v48  ;;  %354 = vst.msk [vmem:[#allocation3 + $0x18] sm:$0xff] %vm318_vm0, %v5346_v43  ;;  %355 = vst.msk [vmem:[#allocation3 + $0x20] sm:$0xff] %vm318_vm0, %v5346_v43 }
 0x10f   : > { %1838 = vmatmul.mubr.f32.gmra.mrb[22].mxu1 %v621_v47  ;;  %356 = vst.msk [vmem:[#allocation3 + $0x28] sm:$0xff] %vm318_vm0, %v5346_v43  ;;  %357 = vst.msk [vmem:[#allocation3 + $0x30] sm:$0xff] %vm318_vm0, %v5346_v43 }
 0x110   : > { %1842 = vmatprep.mubr.f32.mxu1 %v626_v49  ;;  %358 = vst.msk [vmem:[#allocation3 + $0x38] sm:$0xff] %vm318_vm0, %v5346_v43  ;;  %360 = vst.msk [vmem:[#allocation3 + $0x48] sm:$0xff] %vm318_vm0, %v5346_v43 }
 0x111   : > { %1633 = vmatmul.mubr.f32.gmra.mrb[24].mxu0 %v593_v50  ;;  %361 = vst.msk [vmem:[#allocation3 + $0x50] sm:$0xff] %vm318_vm0, %v5346_v43  ;;  %362 = vst.msk [vmem:[#allocation3 + $0x58] sm:$0xff] %vm318_vm0, %v5346_v43 }
 0x112   : > { %1637 = vmatprep.mubr.f32.mxu0 %v598_v52  ;;  %363 = vst.msk [vmem:[#allocation3 + $0x60] sm:$0xff] %vm318_vm0, %v5346_v43  ;;  %364 = vst.msk [vmem:[#allocation3 + $0x68] sm:$0xff] %vm318_vm0, %v5346_v43 }
 0x113   : > { %1843 = vmatmul.mubr.f32.gmra.mrb[24].mxu1 %v625_v51  ;;  %365 = vst.msk [vmem:[#allocation3 + $0x70] sm:$0xff] %vm318_vm0, %v5346_v43  ;;  %366 = vst.msk [vmem:[#allocation3 + $0x78] sm:$0xff] %vm318_vm0, %v5346_v43 }
 0x114   : > { %1847 = vmatprep.mubr.f32.mxu1 %v630_v53  ;;  %367 = vst.msk [vmem:[#allocation3 + $0x80] sm:$0xff] %vm318_vm0, %v5346_v43  ;;  %368 = vst.msk [vmem:[#allocation3 + $0x88] sm:$0xff] %vm318_vm0, %v5346_v43 }
 0x115   : > { %1638 = vmatmul.mubr.f32.gmra.mrb[26].mxu0 %v597_v54  ;;  %369 = vst.msk [vmem:[#allocation3 + $0x90] sm:$0xff] %vm318_vm0, %v5346_v43  ;;  %370 = vst.msk [vmem:[#allocation3 + $0x98] sm:$0xff] %vm318_vm0, %v5346_v43 }
 0x116   : > { %1642 = vmatprep.mubr.f32.mxu0 %v602_v56  ;;  %371 = vst.msk [vmem:[#allocation3 + $0xa0] sm:$0xff] %vm318_vm0, %v5346_v43  ;;  %372 = vst.msk [vmem:[#allocation3 + $0xa8] sm:$0xff] %vm318_vm0, %v5346_v43 }
 0x117   : > { %1848 = vmatmul.mubr.f32.gmra.mrb[26].mxu1 %v629_v55  ;;  %373 = vst.msk [vmem:[#allocation3 + $0xb0] sm:$0xff] %vm318_vm0, %v5346_v43  ;;  %374 = vst.msk [vmem:[#allocation3 + $0xb8] sm:$0xff] %vm318_vm0, %v5346_v43 }
 0x118   : > { %1852 = vmatprep.mubr.f32.mxu1 %v634_v57  ;;  %375 = vst.msk [vmem:[#allocation3 + $0xc0] sm:$0xff] %vm318_vm0, %v5346_v43  ;;  %376 = vst.msk [vmem:[#allocation3 + $0xc8] sm:$0xff] %vm318_vm0, %v5346_v43 }
 0x119   : > { %1643 = vmatmul.mubr.f32.gmra.mrb[28].mxu0 %v601_v58  ;;  %377 = vst.msk [vmem:[#allocation3 + $0xd0] sm:$0xff] %vm318_vm0, %v5346_v43  ;;  %378 = vst.msk [vmem:[#allocation3 + $0xd8] sm:$0xff] %vm318_vm0, %v5346_v43 }
 0x11a   : > { %1647 = vmatprep.mubr.f32.mxu0 %v606_v60  ;;  %379 = vst.msk [vmem:[#allocation3 + $0xe0] sm:$0xff] %vm318_vm0, %v5346_v43  ;;  %380 = vst.msk [vmem:[#allocation3 + $0xe8] sm:$0xff] %vm318_vm0, %v5346_v43 }
 0x11b   : > { %1853 = vmatmul.mubr.f32.gmra.mrb[28].mxu1 %v633_v59  ;;  %381 = vst.msk [vmem:[#allocation3 + $0xf0] sm:$0xff] %vm318_vm0, %v5346_v43  ;;  %382 = vst.msk [vmem:[#allocation3 + $0xf8] sm:$0xff] %vm318_vm0, %v5346_v43 }
 0x11c   : > { %1857 = vmatprep.mubr.f32.mxu1 %v638_v61 }
 0x11d   : > { %1648 = vmatmul.mubr.f32.gmra.mrb[30].mxu0 %v605_v62 }
 0x11e   : > { %2692 = vmatprep.mubr.bf16.mxu0 %v7624_v30 }
 0x11f   : > { %1858 = vmatmul.mubr.f32.gmra.mrb[30].mxu1 %v637_v63 }
 0x120   : > { %2765 = vmatprep.mubr.bf16.mxu1 %v7624_v30 }
 0x194   : > { %v5889_v1 = vpop.f32.mrb[0].mxu0 }
 0x195   : > { %v1196_v3 = vpop.f32.mrb[1].mxu0  ;;  %v1896_v4 = vsel %vm1895_vm1, %v5889_v1, -inf }
 0x196   : > { %v5891_v2 = vpop.f32.mrb[0].mxu1  ;;  %1897 = vmax.xlane.f32.xlu0 %v1896_v4 }
 0x197   : > { %7694 = vst [vmem:[#allocation17_spill] sm:$0xff] %v5891_v2  ;;  %v1406_v5 = vpop.f32.mrb[1].mxu1  ;;  %v1920_v9 = vsel %vm1895_vm1, %v5891_v2, -inf  ;;  %v6321_v2 = vld [vmem:[#allocation2 + $0xa8] sm:$0xff] }
 0x198   : > { %v5895_v6 = vpop.f32.mrb[2].mxu0  ;;  %7724 = vst [vmem:[#allocation47_spill] sm:$0xff] %v6321_v2 }
 0x199   : > { %v1201_v8 = vpop.f32.mrb[3].mxu0  ;;  %v1899_v15 = vsel %vm1895_vm1, %v5895_v6, -inf }
 0x19a   : > { %v5897_v7 = vpop.f32.mrb[2].mxu1  ;;  %1921 = vmax.xlane.f32.xlu0 %v1920_v9 }
 0x19b   : > { %7695 = vst [vmem:[#allocation18_spill] sm:$0xff] %v5897_v7  ;;  %v1411_v10 = vpop.f32.mrb[3].mxu1  ;;  %v1923_v11 = vsel %vm1895_vm1, %v5897_v7, -inf  ;;  %v6334_v7 = vld [vmem:[#allocation2 + $0xe8] sm:$0xff] }
 0x19c   : > { %1924 = vmax.xlane.f32.xlu1 %v1923_v11  ;;  %v5903_v12 = vpop.f32.mrb[4].mxu0  ;;  %7726 = vst [vmem:[#allocation49_spill] sm:$0xff] %v6334_v7 }
 0x19d   : > { %7696 = vst [vmem:[#allocation19_spill] sm:$0xff] %v5903_v12  ;;  %v1206_v14 = vpop.f32.mrb[5].mxu0  ;;  %v1902_v16 = vsel %vm1895_vm1, %v5903_v12, -inf }
 0x19e   : > { %v5905_v13 = vpop.f32.mrb[4].mxu1  ;;  %1900 = vmax.xlane.f32.xlu0 %v1899_v15 }
 0x19f   : > { %7697 = vst [vmem:[#allocation20_spill] sm:$0xff] %v5905_v13  ;;  %v1416_v17 = vpop.f32.mrb[5].mxu1  ;;  %v1926_v21 = vsel %vm1895_vm1, %v5905_v13, -inf }
 0x1a0   : > { %1903 = vmax.xlane.f32.xlu1 %v1902_v16  ;;  %v5911_v18 = vpop.f32.mrb[6].mxu0 }
 0x1a1   : > { %7698 = vst [vmem:[#allocation21_spill] sm:$0xff] %v5911_v18  ;;  %v1211_v20 = vpop.f32.mrb[7].mxu0  ;;  %v1905_v22 = vsel %vm1895_vm1, %v5911_v18, -inf  ;;  %v6349_v18 = vld [vmem:[#allocation2 + $0xf0] sm:$0xff] }
 0x1a2   : > { %v5913_v19 = vpop.f32.mrb[6].mxu1  ;;  %1927 = vmax.xlane.f32.xlu0 %v1926_v21  ;;  %7729 = vst [vmem:[#allocation52_spill] sm:$0xff] %v6349_v18 }
 0x1a3   : > { %7699 = vst [vmem:[#allocation22_spill] sm:$0xff] %v5913_v19  ;;  %v1421_v23 = vpop.f32.mrb[7].mxu1  ;;  %v1929_v29 = vsel %vm1895_vm1, %v5913_v19, -inf }
 0x1a4   : > { %1906 = vmax.xlane.f32.xlu1 %v1905_v22  ;;  %v5919_v24 = vpop.f32.mrb[8].mxu0 }
 0x1a5   : > { %7700 = vst [vmem:[#allocation23_spill] sm:$0xff] %v5919_v24  ;;  %v1216_v26 = vpop.f32.mrb[9].mxu0  ;;  %v1908_v27 = vsel %vm1895_vm1, %v5919_v24, -inf }
 0x1a6   : > { %v5921_v25 = vpop.f32.mrb[8].mxu1  ;;  %1909 = vmax.xlane.f32.xlu0 %v1908_v27 }
 0x1a7   : > { %7701 = vst [vmem:[#allocation24_spill] sm:$0xff] %v5921_v25  ;;  %v1426_v28 = vpop.f32.mrb[9].mxu1  ;;  %v1932_v34 = vsel %vm1895_vm1, %v5921_v25, -inf  ;;  %v6304_v25 = vld [vmem:[#allocation2 + $0xd8] sm:$0xff] }
 0x1a8   : > { %1930 = vmax.xlane.f32.xlu1 %v1929_v29  ;;  %v5929_v31 = vpop.f32.mrb[10].mxu0 }
 0x1a9   : > { %7702 = vst [vmem:[#allocation25_spill] sm:$0xff] %v5929_v31  ;;  %v1221_v33 = vpop.f32.mrb[11].mxu0  ;;  %v1911_v35 = vsel %vm1895_vm1, %v5929_v31, -inf }
 0x1aa   : > { %v5933_v32 = vpop.f32.mrb[10].mxu1  ;;  %1933 = vmax.xlane.f32.xlu0 %v1932_v34 }
 0x1ab   : > { %7703 = vst [vmem:[#allocation26_spill] sm:$0xff] %v5933_v32  ;;  %v1431_v36 = vpop.f32.mrb[11].mxu1  ;;  %v1935_v42 = vsel %vm1895_vm1, %v5933_v32, -inf  ;;  %v6319_v32 = vld [vmem:[#allocation2 + $0xe0] sm:$0xff] }
 0x1ac   : > { %1912 = vmax.xlane.f32.xlu1 %v1911_v35  ;;  %v5939_v37 = vpop.f32.mrb[12].mxu0 }
 0x1ad   : > { %7704 = vst [vmem:[#allocation27_spill] sm:$0xff] %v5939_v37  ;;  %v1226_v39 = vpop.f32.mrb[13].mxu0  ;;  %v1914_v40 = vsel %vm1895_vm1, %v5939_v37, -inf  ;;  %v6336_v37 = vld [vmem:[#allocation2 + $0xb0] sm:$0xff] }
 0x1ae   : > { %v5941_v38 = vpop.f32.mrb[12].mxu1  ;;  %1915 = vmax.xlane.f32.xlu0 %v1914_v40  ;;  %7727 = vst [vmem:[#allocation50_spill] sm:$0xff] %v6336_v37 }
 0x1af   : > { %7705 = vst [vmem:[#allocation28_spill] sm:$0xff] %v5941_v38  ;;  %v1436_v41 = vpop.f32.mrb[13].mxu1  ;;  %v1938_v47 = vsel %vm1895_vm1, %v5941_v38, -inf }
 0x1b0   : > { %1936 = vmax.xlane.f32.xlu1 %v1935_v42  ;;  %v5979_v44 = vpop.f32.mrb[14].mxu0 }
 0x1b1   : > { %7706 = vst [vmem:[#allocation29_spill] sm:$0xff] %v5979_v44  ;;  %v1231_v46 = vpop.f32.mrb[15].mxu0  ;;  %v1917_v48 = vsel %vm1895_vm1, %v5979_v44, -inf }
 0x1b2   : > { %v5981_v45 = vpop.f32.mrb[14].mxu1  ;;  %1939 = vmax.xlane.f32.xlu0 %v1938_v47 }
 0x1b3   : > { %7707 = vst [vmem:[#allocation30_spill] sm:$0xff] %v5981_v45  ;;  %v1441_v49 = vpop.f32.mrb[15].mxu1  ;;  %v1941_v50 = vsel %vm1895_vm1, %v5981_v45, -inf  ;;  %v6306_v45 = vld [vmem:[#allocation2 + $0xa0] sm:$0xff] }
 0x1b4   : > { %1918 = vmax.xlane.f32.xlu1 %v1917_v48 }
 0x1b8   : > { %1942 = vmax.xlane.f32.xlu1 %v1941_v50 }
 0x1d4   : > { %v5989_v51 = vpop.f32.mrb[16].mxu0 }
 0x1d5   : > { %7708 = vst [vmem:[#allocation31_spill] sm:$0xff] %v5989_v51  ;;  %v1616_v53 = vpop.f32.mrb[17].mxu0  ;;  %v1944_v54 = vsel %vm1895_vm1, %v5989_v51, -inf }
 0x1d6   : > { %v5991_v52 = vpop.f32.mrb[16].mxu1  ;;  %1945 = vmax.xlane.f32.xlu0 %v1944_v54  ;;  %v6053_v54 = vld [vmem:[#allocation2] sm:$0xff] }
 0x1d7   : > { %7709 = vst [vmem:[#allocation32_spill] sm:$0xff] %v5991_v52  ;;  %v1826_v55 = vpop.f32.mrb[17].mxu1  ;;  %v1968_v59 = vsel %vm1895_vm1, %v5991_v52, -inf }
 0x1d8   : > { %v5995_v56 = vpop.f32.mrb[18].mxu0 }
 0x1d9   : > { %7710 = vst [vmem:[#allocation33_spill] sm:$0xff] %v5995_v56  ;;  %v1621_v58 = vpop.f32.mrb[19].mxu0  ;;  %v1947_v60 = vsel %vm1895_vm1, %v5995_v56, -inf  ;;  %v6289_v56 = vld [vmem:[#allocation2 + $0x98] sm:$0xff] }
 0x1da   : > { %v5997_v57 = vpop.f32.mrb[18].mxu1  ;;  %1969 = vmax.xlane.f32.xlu0 %v1968_v59  ;;  %1948 = vmax.xlane.f32.xlu1 %v1947_v60  ;;  %v6058_v59 = vld [vmem:[#allocation2 + $0x40] sm:$0xff] }
 0x1db   : > { %7711 = vst [vmem:[#allocation34_spill] sm:$0xff] %v5997_v57  ;;  %v1831_v61 = vpop.f32.mrb[19].mxu1  ;;  %v1971_v3 = vsel %vm1895_vm1, %v5997_v57, -inf  ;;  %v925_v57 = vld [vmem:[%s6097_s18 + $0xf0] sm:$0xff] }
 0x1dc   : > { %v6003_v62 = vpop.f32.mrb[20].mxu0  ;;  %v6065_v61 = vld [vmem:[#allocation2 + $0x48] sm:$0xff] }
 0x1dd   : > { %7712 = vst [vmem:[#allocation35_spill] sm:$0xff] %v6003_v62  ;;  %v1626_v0 = vpop.f32.mrb[21].mxu0  ;;  %v1950_v4 = vsel %vm1895_vm1, %v6003_v62, -inf  ;;  %v6287_v62 = vld [vmem:[#allocation2 + $0xd0] sm:$0xff] }
 0x1de   : > { %v6005_v63 = vpop.f32.mrb[20].mxu1  ;;  %1972 = vmax.xlane.f32.xlu1 %v1971_v3  ;;  %1951 = vmax.xlane.f32.xlu0 %v1950_v4 }
 0x1df   : > { %7713 = vst [vmem:[#allocation36_spill] sm:$0xff] %v6005_v63  ;;  %v1836_v5 = vpop.f32.mrb[21].mxu1  ;;  %v1974_v11 = vsel %vm1895_vm1, %v6005_v63, -inf }
 0x1e0   : > { %v6011_v8 = vpop.f32.mrb[22].mxu0 }
 0x1e1   : > { %7714 = vst [vmem:[#allocation37_spill] sm:$0xff] %v6011_v8  ;;  %v1631_v10 = vpop.f32.mrb[23].mxu0  ;;  %v1953_v14 = vsel %vm1895_vm1, %v6011_v8, -inf }
 0x1e2   : > { %v6013_v9 = vpop.f32.mrb[22].mxu1  ;;  %1975 = vmax.xlane.f32.xlu0 %v1974_v11  ;;  %1954 = vmax.xlane.f32.xlu1 %v1953_v14  ;;  %v6073_v10 = vld [vmem:[#allocation2 + $0x8] sm:$0xff]  ;;  %v6079_v14 = vld [vmem:[#allocation2 + $0x10] sm:$0xff] }
 0x1e3   : > { %7715 = vst [vmem:[#allocation38_spill] sm:$0xff] %v6013_v9  ;;  %v1841_v15 = vpop.f32.mrb[23].mxu1  ;;  %v1977_v21 = vsel %vm1895_vm1, %v6013_v9, -inf  ;;  %v905_v11 = vld [vmem:[%s6097_s18 + $0x50] sm:$0xff] }
 0x1e4   : > { %v6019_v16 = vpop.f32.mrb[24].mxu0 }
 0x1e5   : > { %7716 = vst [vmem:[#allocation39_spill] sm:$0xff] %v6019_v16  ;;  %v1636_v20 = vpop.f32.mrb[25].mxu0  ;;  %v1956_v22 = vsel %vm1895_vm1, %v6019_v16, -inf }
 0x1e6   : > { %v6021_v17 = vpop.f32.mrb[24].mxu1  ;;  %1978 = vmax.xlane.f32.xlu1 %v1977_v21  ;;  %1957 = vmax.xlane.f32.xlu0 %v1956_v22 }
 0x1e7   : > { %7717 = vst [vmem:[#allocation40_spill] sm:$0xff] %v6021_v17  ;;  %v1846_v23 = vpop.f32.mrb[25].mxu1  ;;  %v1980_v29 = vsel %vm1895_vm1, %v6021_v17, -inf }
 0x1e8   : > { %v6027_v26 = vpop.f32.mrb[26].mxu0  ;;  %v6089_v23 = vld [vmem:[#allocation2 + $0x50] sm:$0xff] }
 0x1e9   : > { %7718 = vst [vmem:[#allocation41_spill] sm:$0xff] %v6027_v26  ;;  %v1641_v28 = vpop.f32.mrb[27].mxu0  ;;  %v1959_v33 = vsel %vm1895_vm1, %v6027_v26, -inf  ;;  %v6259_v26 = vld [vmem:[#allocation2 + $0x88] sm:$0xff] }
 0x1ea   : > { %v6029_v27 = vpop.f32.mrb[26].mxu1  ;;  %1981 = vmax.xlane.f32.xlu0 %v1980_v29  ;;  %1960 = vmax.xlane.f32.xlu1 %v1959_v33  ;;  %v6091_v28 = vld [vmem:[#allocation2 + $0x18] sm:$0xff]  ;;  %v896_v33 = vld [vmem:[%s6097_s18 + $0x8] sm:$0xff] }
 0x1eb   : > { %7719 = vst [vmem:[#allocation42_spill] sm:$0xff] %v6029_v27  ;;  %v1851_v34 = vpop.f32.mrb[27].mxu1  ;;  %v1983_v40 = vsel %vm1895_vm1, %v6029_v27, -inf  ;;  %v6174_v27 = vld [vmem:[#allocation2 + $0x68] sm:$0xff] }
 0x1ec   : > { %v6035_v35 = vpop.f32.mrb[28].mxu0  ;;  %v900_v34 = vld [vmem:[%s6097_s18 + $0x28] sm:$0xff] }
 0x1ed   : > { %7720 = vst [vmem:[#allocation43_spill] sm:$0xff] %v6035_v35  ;;  %v1646_v39 = vpop.f32.mrb[29].mxu0  ;;  %v1962_v41 = vsel %vm1895_vm1, %v6035_v35, -inf  ;;  %v6257_v35 = vld [vmem:[#allocation2 + $0xc0] sm:$0xff] }
 0x1ee   : > { %v6037_v36 = vpop.f32.mrb[28].mxu1  ;;  %1984 = vmax.xlane.f32.xlu1 %v1983_v40  ;;  %1963 = vmax.xlane.f32.xlu0 %v1962_v41  ;;  %v898_v39 = vld [vmem:[%s6097_s18 + $0x18] sm:$0xff]  ;;  %v2585_v41 = vpack.c.bf16 %v900_v34, %v896_v33  ;;  %v6121_v34 = vld [vmem:[#allocation2 + $0x20] sm:$0xff] }
 0x1ef   : > { %7721 = vst [vmem:[#allocation44_spill] sm:$0xff] %v6037_v36  ;;  %v1856_v42 = vpop.f32.mrb[29].mxu1  ;;  %v1986_v48 = vsel %vm1895_vm1, %v6037_v36, -inf  ;;  %v6119_v33 = vld [vmem:[#allocation2 + $0x58] sm:$0xff] }
 0x1f0   : > { %v6043_v43 = vpop.f32.mrb[30].mxu0  ;;  %v902_v42 = vld [vmem:[%s6097_s18 + $0x38] sm:$0xff]  ;;  %2660 = vmatprep.subr.bf16.mxu0 %v2585_v41 }
 0x1f1   : > { %7722 = vst [vmem:[#allocation45_spill] sm:$0xff] %v6043_v43  ;;  %v1651_v47 = vpop.f32.mrb[31].mxu0  ;;  %v1965_v49 = vsel %vm1895_vm1, %v6043_v43, -inf }
 0x1f2   : > { %v6045_v46 = vpop.f32.mrb[30].mxu1  ;;  %1987 = vmax.xlane.f32.xlu0 %v1986_v48  ;;  %1966 = vmax.xlane.f32.xlu1 %v1965_v49  ;;  %v895_v47 = vld [vmem:[%s6097_s18] sm:$0xff]  ;;  %v909_v49 = vld [vmem:[%s6097_s18 + $0x70] sm:$0xff] }
 0x1f3   : > { %7723 = vst [vmem:[#allocation46_spill] sm:$0xff] %v6045_v46  ;;  %v1861_v50 = vpop.f32.mrb[31].mxu1  ;;  %v1989_v53 = vsel %vm1895_vm1, %v6045_v46, -inf  ;;  %v899_v48 = vld [vmem:[%s6097_s18 + $0x20] sm:$0xff]  ;;  %v913_v46 = vld [vmem:[%s6097_s18 + $0x90] sm:$0xff] }
 0x1f6   : > { %1990 = vmax.xlane.f32.xlu1 %v1989_v53  ;;  %v2587_v53 = vpack.c.bf16 %v902_v42, %v898_v39  ;;  %v904_v39 = vld [vmem:[%s6097_s18 + $0x48] sm:$0xff] }
 0x1f7   : > { %v908_v42 = vld [vmem:[%s6097_s18 + $0x68] sm:$0xff] }
 0x1f8   : > { %2733 = vmatprep.subr.bf16.mxu1 %v2587_v53  ;;  %v2589_v41 = vpack.c.bf16 %v908_v42, %v904_v39  ;;  %v6146_v39 = vld [vmem:[#allocation2 + $0x60] sm:$0xff]  ;;  %v6148_v42 = vld [vmem:[#allocation2 + $0x28] sm:$0xff]  ;;  %v2590_v53 = vpack.c.bf16 %v909_v49, %v905_v11  ;;  %v918_v49 = vld [vmem:[%s6097_s18 + $0xb8] sm:$0xff] }
 0x223   : > { %v1898_v55 = vpop.xlane.xlu0 %1897 }
 0x224   : > { %v6056_v58 = vmax.f32 %v6053_v54, %v1898_v55  ;;  %v2584_v55 = vpack.c.bf16 %v899_v48, %v895_v47  ;;  %v906_v47 = vld [vmem:[%s6097_s18 + $0x58] sm:$0xff] }
 0x226   : > { %3825 = vst.msk [vmem:[#allocation2] sm:$0xff] %vm318_vm0, %v6056_v58  ;;  %2122 = vperm.xlu0 %4967, %v6056_v58   ;;  %2661 = vmatpush1.bf16.msra.mxu0 %v2584_v55 }
 0x227   : > { %v1922_v0 = vpop.xlane.xlu0 %1921  ;;  %2662 = vmatprep.subr.bf16.mxu0 %v2589_v41  ;;  %v915_v41 = vld [vmem:[%s6097_s18 + $0xa0] sm:$0xff] }
 0x228   : > { %v6068_v4 = vmax.f32 %v6058_v59, %v1922_v0  ;;  %v897_v0 = vld [vmem:[%s6097_s18 + $0x10] sm:$0xff] }
 0x229   : > { %v1925_v3 = vpop.xlane.xlu1 %1924 }
 0x22a   : > { %v6071_v5 = vmax.f32 %v6065_v61, %v1925_v3  ;;  %3833 = vst.msk [vmem:[#allocation2 + $0x40] sm:$0xff] %vm318_vm0, %v6068_v4  ;;  %v901_v3 = vld [vmem:[%s6097_s18 + $0x30] sm:$0xff] }
 0x22b   : > { %v1901_v20 = vpop.xlane.xlu0 %1900  ;;  %v2586_v30 = vpack.c.bf16 %v901_v3, %v897_v0  ;;  %v903_v0 = vld [vmem:[%s6097_s18 + $0x40] sm:$0xff] }
 0x22c   : > { %3834 = vst.msk [vmem:[#allocation2 + $0x48] sm:$0xff] %vm318_vm0, %v6071_v5  ;;  %2167 = vperm.xlu0 %4967, %v6071_v5   ;;  %v6087_v21 = vmax.f32 %v6073_v10, %v1901_v20  ;;  %v907_v3 = vld [vmem:[%s6097_s18 + $0x60] sm:$0xff] }
 0x22d   : > { %v1904_v22 = vpop.xlane.xlu1 %1903  ;;  %2734 = vmatpush1.bf16.msra.mxu1 %v2586_v30  ;;  %v2588_v48 = vpack.c.bf16 %v907_v3, %v903_v0  ;;  %v914_v0 = vld [vmem:[%s6097_s18 + $0x98] sm:$0xff] }
 0x22e   : > { %v6094_v29 = vmax.f32 %v6079_v14, %v1904_v22  ;;  %3826 = vst.msk [vmem:[#allocation2 + $0x8] sm:$0xff] %vm318_vm0, %v6087_v21  ;;  %2127 = vperm.xlu1 %4968, %v6087_v21  }
 0x22f   : > { %v1928_v50 = vpop.xlane.xlu0 %1927  ;;  %2663 = vmatpush1.bf16.msra.mxu0 %v2588_v48  ;;  %v6176_v48 = vld [vmem:[#allocation2 + $0x30] sm:$0xff] }
 0x230   : > { %3827 = vst.msk [vmem:[#allocation2 + $0x10] sm:$0xff] %vm318_vm0, %v6094_v29  ;;  %v6117_v20 = vmax.f32 %v6089_v23, %v1928_v50  ;;  %v910_v50 = vld [vmem:[%s6097_s18 + $0x78] sm:$0xff] }
 0x231   : > { %v1907_v22 = vpop.xlane.xlu1 %1906 }
 0x232   : > { %v6124_v15 = vmax.f32 %v6091_v28, %v1907_v22  ;;  %3835 = vst.msk [vmem:[#allocation2 + $0x50] sm:$0xff] %vm318_vm0, %v6117_v20  ;;  %2132 = vperm.xlu1 %4968, %v6094_v29   ;;  %v2591_v22 = vpack.c.bf16 %v910_v50, %v906_v47  ;;  %v912_v47 = vld [vmem:[%s6097_s18 + $0x88] sm:$0xff] }
 0x233   : > { %v1910_v55 = vpop.xlane.xlu0 %1909  ;;  %v916_v50 = vld [vmem:[%s6097_s18 + $0xa8] sm:$0xff] }
 0x234   : > { %3828 = vst.msk [vmem:[#allocation2 + $0x18] sm:$0xff] %vm318_vm0, %v6124_v15  ;;  %v6144_v30 = vmax.f32 %v6121_v34, %v1910_v55  ;;  %2735 = vmatprep.subr.bf16.mxu1 %v2591_v22  ;;  %v2593_v11 = vpack.c.bf16 %v916_v50, %v912_v47  ;;  %v2595_v22 = vpack.c.bf16 %v918_v49, %v914_v0  ;;  %v920_v0 = vld [vmem:[%s6097_s18 + $0xc8] sm:$0xff] }
 0x235   : > { %v1931_v60 = vpop.xlane.xlu1 %1930  ;;  %2736 = vmatpush1.bf16.msra.mxu1 %v2590_v53  ;;  %v917_v53 = vld [vmem:[%s6097_s18 + $0xb0] sm:$0xff]  ;;  %v924_v49 = vld [vmem:[%s6097_s18 + $0xe8] sm:$0xff] }
 0x236   : > { %v6151_v40 = vmax.f32 %v6119_v33, %v1931_v60  ;;  %3829 = vst.msk [vmem:[#allocation2 + $0x20] sm:$0xff] %vm318_vm0, %v6144_v30  ;;  %2137 = vperm.xlu1 %4968, %v6124_v15   ;;  %v911_v60 = vld [vmem:[%s6097_s18 + $0x80] sm:$0xff]  ;;  %2664 = vmatprep.subr.bf16.mxu0 %v2593_v11  ;;  %v2594_v36 = vpack.c.bf16 %v917_v53, %v913_v46  ;;  %v926_v11 = vld [vmem:[%s6097_s18 + $0xf8] sm:$0xff] }
 0x237   : > { %v1934_v55 = vpop.xlane.xlu0 %1933  ;;  %v2592_v3 = vpack.c.bf16 %v915_v41, %v911_v60  ;;  %2737 = vmatprep.subr.bf16.mxu1 %v2595_v22  ;;  %v922_v60 = vld [vmem:[%s6097_s18 + $0xd8] sm:$0xff]  ;;  %v2597_v46 = vpack.c.bf16 %v924_v49, %v920_v0  ;;  %v923_v53 = vld [vmem:[%s6097_s18 + $0xe0] sm:$0xff]  ;;  %v921_v41 = vld [vmem:[%s6097_s18 + $0xd0] sm:$0xff] }
 0x238   : > { %3836 = vst.msk [vmem:[#allocation2 + $0x58] sm:$0xff] %vm318_vm0, %v6151_v40  ;;  %2177 = vperm.xlu0 %4967, %v6151_v40   ;;  %v6172_v47 = vmax.f32 %v6146_v39, %v1934_v55  ;;  %v919_v55 = vld [vmem:[%s6097_s18 + $0xc0] sm:$0xff]  ;;  %v6204_v49 = vld [vmem:[#allocation2 + $0x70] sm:$0xff] }
 0x239   : > { %v1913_v50 = vpop.xlane.xlu1 %1912  ;;  %2665 = vmatpush1.bf16.msra.mxu0 %v2592_v3  ;;  %2738 = vmatpush1.bf16.msra.mxu1 %v2594_v36  ;;  %v2596_v17 = vpack.c.bf16 %v923_v53, %v919_v55  ;;  %v2598_v36 = vpack.c.bf16 %v925_v57, %v921_v41  ;;  %v6229_v55 = vld [vmem:[#allocation2 + $0x78] sm:$0xff] }
 0x23a   : > { %v6179_v9 = vmax.f32 %v6148_v42, %v1913_v50  ;;  %3837 = vst.msk [vmem:[#allocation2 + $0x60] sm:$0xff] %vm318_vm0, %v6172_v47  ;;  %2142 = vperm.xlu1 %4968, %v6144_v30   ;;  %v2599_v50 = vpack.c.bf16 %v926_v11, %v922_v60  ;;  %2666 = vmatprep.subr.bf16.mxu0 %v2597_v46  ;;  %v6211_v60 = vld [vmem:[#allocation2 + $0x38] sm:$0xff] }
 0x23b   : > { %v1916_v22 = vpop.xlane.xlu0 %1915  ;;  %v930_v11 = vld [vmem:[%s6097_s18 + $0x118] sm:$0xff] }
 0x23c   : > { %3830 = vst.msk [vmem:[#allocation2 + $0x28] sm:$0xff] %vm318_vm0, %v6179_v9  ;;  %v6199_v43 = vmax.f32 %v6176_v48, %v1916_v22  ;;  %2739 = vmatprep.subr.bf16.mxu1 %v2599_v50 }
 0x23d   : > { %v1937_v63 = vpop.xlane.xlu1 %1936  ;;  %2667 = vmatpush1.bf16.msra.mxu0 %v2596_v17  ;;  %2740 = vmatpush1.bf16.msra.mxu1 %v2598_v36  ;;  %v6252_v36 = vld [vmem:[#allocation2 + $0x80] sm:$0xff] }
 0x23e   : > { %v6202_v0 = vmax.f32 %v6174_v27, %v1937_v63  ;;  %3831 = vst.msk [vmem:[#allocation2 + $0x30] sm:$0xff] %vm318_vm0, %v6199_v43  ;;  %2147 = vperm.xlu1 %4968, %v6179_v9  }
 0x23f   : > { %v1940_v63 = vpop.xlane.xlu0 %1939 }
 0x240   : > { %3838 = vst.msk [vmem:[#allocation2 + $0x68] sm:$0xff] %vm318_vm0, %v6202_v0  ;;  %2187 = vperm.xlu0 %4967, %v6202_v0   ;;  %v6219_v17 = vmax.f32 %v6204_v49, %v1940_v63  ;;  %v928_v63 = vld [vmem:[%s6097_s18 + $0x108] sm:$0xff] }
 0x241   : > { %v1919_v41 = vpop.xlane.xlu1 %1918 }
 0x242   : > { %v6222_v46 = vmax.f32 %v6211_v60, %v1919_v41  ;;  %3839 = vst.msk [vmem:[#allocation2 + $0x70] sm:$0xff] %vm318_vm0, %v6219_v17  ;;  %2152 = vperm.xlu1 %4968, %v6199_v43   ;;  %v932_v41 = vld [vmem:[%s6097_s18 + $0x128] sm:$0xff] }
 0x243   : > { %v2601_v57 = vpack.c.bf16 %v932_v41, %v928_v63  ;;  %v6270_v41 = vld [vmem:[#allocation2 + $0xc8] sm:$0xff] }
 0x244   : > { %3832 = vst.msk [vmem:[#allocation2 + $0x38] sm:$0xff] %vm318_vm0, %v6222_v46 }
 0x245   : > { %v1943_v22 = vpop.xlane.xlu1 %1942  ;;  %2818 = vmatprep.subr.bf16.mxu0 %v2601_v57 }
 0x246   : > { %v6236_v50 = vmax.f32 %v6229_v55, %v1943_v22  ;;  %2157 = vperm.xlu1 %4968, %v6222_v46   ;;  %v934_v22 = vld [vmem:[%s6097_s18 + $0x138] sm:$0xff] }
 0x247   : > { %v2603_v53 = vpack.c.bf16 %v934_v22, %v930_v11 }
 0x248   : > { %3840 = vst.msk [vmem:[#allocation2 + $0x78] sm:$0xff] %vm318_vm0, %v6236_v50  ;;  %2197 = vperm.xlu0 %4967, %v6236_v50  }
 0x249   : > { %2891 = vmatprep.subr.bf16.mxu1 %v2603_v53 }
 0x24a   : > { %2162 = vperm.xlu1 %4968, %v6068_v4  }
 0x24e   : > { %2172 = vperm.xlu1 %4968, %v6117_v20  }
 0x252   : > { %2182 = vperm.xlu1 %4968, %v6172_v47  }
 0x256   : > { %2192 = vperm.xlu1 %4968, %v6219_v17  }
 0x263   : > { %v1946_v3 = vpop.xlane.xlu0 %1945 }
 0x264   : > { %v6255_v52 = vmax.f32 %v6252_v36, %v1946_v3  ;;  %v6272_v3 = vld [vmem:[#allocation2 + $0x90] sm:$0xff] }
 0x266   : > { %3841 = vst.msk [vmem:[#allocation2 + $0x80] sm:$0xff] %vm318_vm0, %v6255_v52  ;;  %2202 = vperm.xlu1 %4968, %v6255_v52  }
 0x267   : > { %v1970_v57 = vpop.xlane.xlu0 %1969  ;;  %v1949_v11 = vpop.xlane.xlu1 %1948 }
 0x268   : > { %v6265_v53 = vmax.f32 %v6257_v35, %v1970_v57  ;;  %v6268_v63 = vmax.f32 %v6259_v26, %v1949_v11 }
 0x26a   : > { %3849 = vst.msk [vmem:[#allocation2 + $0xc0] sm:$0xff] %vm318_vm0, %v6265_v53  ;;  %3842 = vst.msk [vmem:[#allocation2 + $0x88] sm:$0xff] %vm318_vm0, %v6268_v63  ;;  %2207 = vperm.xlu0 %4967, %v6268_v63  }
 0x26b   : > { %v1973_v57 = vpop.xlane.xlu1 %1972  ;;  %v1952_v16 = vpop.xlane.xlu0 %1951 }
 0x26c   : > { %v6282_v11 = vmax.f32 %v6270_v41, %v1973_v57  ;;  %v6285_v8 = vmax.f32 %v6272_v3, %v1952_v16 }
 0x26e   : > { %3850 = vst.msk [vmem:[#allocation2 + $0xc8] sm:$0xff] %vm318_vm0, %v6282_v11  ;;  %3843 = vst.msk [vmem:[#allocation2 + $0x90] sm:$0xff] %vm318_vm0, %v6285_v8  ;;  %2212 = vperm.xlu1 %4968, %v6285_v8  }
 0x26f   : > { %v1976_v57 = vpop.xlane.xlu0 %1975  ;;  %v1955_v51 = vpop.xlane.xlu1 %1954 }
 0x270   : > { %v6299_v16 = vmax.f32 %v6287_v62, %v1976_v57  ;;  %v6302_v38 = vmax.f32 %v6289_v56, %v1955_v51 }
 0x272   : > { %3851 = vst.msk [vmem:[#allocation2 + $0xd0] sm:$0xff] %vm318_vm0, %v6299_v16  ;;  %3844 = vst.msk [vmem:[#allocation2 + $0x98] sm:$0xff] %vm318_vm0, %v6302_v38  ;;  %2217 = vperm.xlu0 %4967, %v6302_v38  }
 0x273   : > { %v1979_v22 = vpop.xlane.xlu1 %1978  ;;  %v1958_v13 = vpop.xlane.xlu0 %1957 }
 0x274   : > { %v6314_v57 = vmax.f32 %v6304_v25, %v1979_v22  ;;  %v6317_v51 = vmax.f32 %v6306_v45, %v1958_v13 }
 0x276   : > { %3852 = vst.msk [vmem:[#allocation2 + $0xd8] sm:$0xff] %vm318_vm0, %v6314_v57  ;;  %3845 = vst.msk [vmem:[#allocation2 + $0xa0] sm:$0xff] %vm318_vm0, %v6317_v51  ;;  %2222 = vperm.xlu1 %4968, %v6317_v51  }
 0x277   : > { %v1982_v19 = vpop.xlane.xlu0 %1981  ;;  %v1961_v44 = vpop.xlane.xlu1 %1960 }
 0x278   : > { %v6329_v22 = vmax.f32 %v6319_v32, %v1982_v19  ;;  %v6332_v13 = vmax.f32 %v6321_v2, %v1961_v44  ;;  %v6351_v2 = vld [vmem:[#allocation2 + $0xb8] sm:$0xff] }
 0x279   : > { %7730 = vst [vmem:[#allocation53_spill] sm:$0xff] %v6351_v2 }
 0x27a   : > { %7725 = vst [vmem:[#allocation48_spill] sm:$0xff] %v6332_v13  ;;  %3853 = vst.msk [vmem:[#allocation2 + $0xe0] sm:$0xff] %vm318_vm0, %v6329_v22  ;;  %2227 = vperm.xlu0 %4967, %v6332_v13  }
 0x27b   : > { %3846 = vst.msk [vmem:[#allocation2 + $0xa8] sm:$0xff] %vm318_vm0, %v6332_v13  ;;  %v1985_v31 = vpop.xlane.xlu1 %1984  ;;  %v1964_v24 = vpop.xlane.xlu0 %1963 }
 0x27c   : > { %v6344_v19 = vmax.f32 %v6334_v7, %v1985_v31  ;;  %v6347_v44 = vmax.f32 %v6336_v37, %v1964_v24  ;;  %v6364_v37 = vld [vmem:[#allocation2 + $0xf8] sm:$0xff] }
 0x27e   : > { %7728 = vst [vmem:[#allocation51_spill] sm:$0xff] %v6347_v44  ;;  %3854 = vst.msk [vmem:[#allocation2 + $0xe8] sm:$0xff] %vm318_vm0, %v6344_v19  ;;  %2232 = vperm.xlu1 %4968, %v6347_v44  }
 0x27f   : > { %3847 = vst.msk [vmem:[#allocation2 + $0xb0] sm:$0xff] %vm318_vm0, %v6347_v44  ;;  %v1988_v13 = vpop.xlane.xlu0 %1987  ;;  %v1967_v12 = vpop.xlane.xlu1 %1966  ;;  %v7731_v44 = vsub.f32 %v6073_v10, %v6087_v21  ;;  %v7733_v10 = vsub.f32 %v6079_v14, %v6094_v29  ;;  %v7738_v29 = vsub.f32 %v6058_v59, %v6068_v4  ;;  %v7741_v59 = vsub.f32 %v6089_v23, %v6117_v20 }
 0x280   : > { %v6359_v31 = vmax.f32 %v6349_v18, %v1988_v13  ;;  %v6362_v24 = vmax.f32 %v6351_v2, %v1967_v12  ;;  %v7732_v2 = vsub.f32 %v6053_v54, %v6056_v58  ;;  %v7736_v58 = vsub.f32 %v6148_v42, %v6179_v9 }
 0x281   : > { %v2058_v13 = vmul.f32 1.442695, %v7731_v44  ;;  %v2060_v21 = vmul.f32 1.442695, %v7733_v10  ;;  %v7739_v9 = vsub.f32 %v6211_v60, %v6222_v46  ;;  %v2076_v4 = vmul.f32 1.442695, %v7741_v59 }
 0x282   : > { %3855 = vst.msk [vmem:[#allocation2 + $0xf0] sm:$0xff] %vm318_vm0, %v6359_v31  ;;  %3848 = vst.msk [vmem:[#allocation2 + $0xb8] sm:$0xff] %vm318_vm0, %v6362_v24  ;;  %2242 = vperm.xlu1 %4968, %v6265_v53   ;;  %2237 = vperm.xlu0 %4967, %v6362_v24   ;;  %v2056_v7 = vmul.f32 1.442695, %v7732_v2  ;;  %v7735_v2 = vsub.f32 %v6121_v34, %v6144_v30  ;;  %v2066_v14 = vmul.f32 1.442695, %v7736_v58 }
 0x283   : > { %v1991_v18 = vpop.xlane.xlu1 %1990  ;;  %4969 = vpow2.f32 %v2058_v13  ;;  %v2072_v34 = vmul.f32 1.442695, %v7738_v29  ;;  %v2070_v30 = vmul.f32 1.442695, %v7739_v9  ;;  %v7742_v10 = vsub.f32 %v6119_v33, %v6151_v40 }
 0x284   : > { %v6376_v12 = vmax.f32 %v6364_v37, %v1991_v18  ;;  %4971 = vpow2.f32 %v2056_v7  ;;  %v7734_v18 = vsub.f32 %v6091_v28, %v6124_v15  ;;  %v2064_v54 = vmul.f32 1.442695, %v7735_v2 }
 0x285   : > { %4973 = vpow2.f32 %v2060_v21  ;;  %v7737_v7 = vsub.f32 %v6176_v48, %v6199_v43  ;;  %v7740_v48 = vsub.f32 %v6065_v61, %v6071_v5  ;;  %v2078_v61 = vmul.f32 1.442695, %v7742_v10 }
 0x286   : > { %3856 = vst.msk [vmem:[#allocation2 + $0xf8] sm:$0xff] %vm318_vm0, %v6376_v12  ;;  %2252 = vperm.xlu1 %4968, %v6299_v16   ;;  %2247 = vperm.xlu0 %4967, %v6282_v11   ;;  %v2062_v44 = vmul.f32 1.442695, %v7734_v18  ;;  %v7743_v5 = vsub.f32 %v6146_v39, %v6172_v47  ;;  %v7744_v18 = vsub.f32 %v6174_v27, %v6202_v0 }
 0x287   : > { %v2068_v15 = vmul.f32 1.442695, %v7737_v7  ;;  %v2074_v13 = vmul.f32 1.442695, %v7740_v48  ;;  %v7745_v40 = vsub.f32 %v6204_v49, %v6219_v17  ;;  %v2040_v39 = vsub.f32 %v6252_v36, %v6255_v52 }
 0x288   : > { %4975 = vpow2.f32 %v2062_v44  ;;  %v2080_v23 = vmul.f32 1.442695, %v7743_v5  ;;  %v2082_v44 = vmul.f32 1.442695, %v7744_v18  ;;  %v7746_v27 = vsub.f32 %v6229_v55, %v6236_v50  ;;  %v7753_v18 = vld [vmem:[#allocation49_spill] sm:$0xff] }
 0x289   : > { %4977 = vpow2.f32 %v2064_v54  ;;  %v2084_v33 = vmul.f32 1.442695, %v7745_v40  ;;  %v2041_v54 = vsub.f32 %v6259_v26, %v6268_v63  ;;  %v2088_v49 = vmul.f32 1.442695, %v2040_v39  ;;  %v7754_v40 = vld [vmem:[#allocation21_spill] sm:$0xff] }
 0x28a   : > { %2262 = vperm.xlu1 %4968, %v6329_v22   ;;  %2257 = vperm.xlu0 %4967, %v6314_v57   ;;  %4979 = vpow2.f32 %v2066_v14  ;;  %v2086_v0 = vmul.f32 1.442695, %v7746_v27  ;;  %v2042_v52 = vsub.f32 %v6272_v3, %v6285_v8  ;;  %v2043_v50 = vsub.f32 %v6289_v56, %v6302_v38  ;;  %v7755_v27 = vld [vmem:[#allocation51_spill] sm:$0xff] }
 0x28b   : > { %4981 = vpow2.f32 %v2068_v15  ;;  %v2090_v58 = vmul.f32 1.442695, %v2041_v54  ;;  %v7747_v3 = vsub.f32 %v6257_v35, %v6265_v53  ;;  %v2050_v15 = vsub.f32 %v6287_v62, %v6299_v16 }
 0x28c   : > { %4983 = vpow2.f32 %v2072_v34  ;;  %v2092_v26 = vmul.f32 1.442695, %v2042_v52  ;;  %v2094_v38 = vmul.f32 1.442695, %v2043_v50  ;;  %v7748_v29 = vsub.f32 %v6270_v41, %v6282_v11  ;;  %v7757_v52 = vld [vmem:[#allocation52_spill] sm:$0xff]  ;;  %v927_v50 = vld [vmem:[%s6097_s18 + $0x100] sm:$0xff] }
 0x28d   : > { %v6404_v28 = vpop.eup %4969  ;;  %4985 = vpow2.f32 %v2070_v30  ;;  %v2104_v7 = vmul.f32 1.442695, %v7747_v3  ;;  %v2051_v9 = vsub.f32 %v6304_v25, %v6314_v57  ;;  %v2108_v62 = vmul.f32 1.442695, %v2050_v15  ;;  %v7749_v57 = vld [vmem:[#allocation19_spill] sm:$0xff] }
 0x28e   : > { %2272 = vperm.xlu1 %4968, %v6359_v31   ;;  %2267 = vperm.xlu0 %4967, %v6344_v19   ;;  %v6414_v42 = vpop.eup %4971  ;;  %4987 = vpow2.f32 %v2074_v13  ;;  %v2044_v41 = vsub.f32 %v6306_v45, %v6317_v51  ;;  %v2052_v16 = vsub.f32 %v6319_v32, %v6329_v22  ;;  %v7750_v51 = vld [vmem:[#allocation48_spill] sm:$0xff] }
 0x28f   : > { %v6416_v43 = vpop.eup %4973  ;;  %4989 = vpow2.f32 %v2076_v4  ;;  %v2110_v25 = vmul.f32 1.442695, %v2051_v9  ;;  %v7751_v4 = vld [vmem:[#allocation47_spill] sm:$0xff] }
 0x290   : > { %4991 = vpow2.f32 %v2078_v61  ;;  %v2096_v45 = vmul.f32 1.442695, %v2044_v41  ;;  %v2045_v10 = vsub.f32 %v7751_v4, %v7750_v51  ;;  %v2112_v32 = vmul.f32 1.442695, %v2052_v16 }
 0x291   : > { %4993 = vpow2.f32 %v2080_v23 }
 0x292   : > { %3415 = vperm.xlu1 %4968, %v6404_v28   ;;  %2277 = vperm.xlu0 %4967, %v6376_v12   ;;  %v6426_v60 = vpop.eup %4975  ;;  %4995 = vpow2.f32 %v2082_v44  ;;  %v2053_v44 = vsub.f32 %v7753_v18, %v6344_v19  ;;  %v2098_v39 = vmul.f32 1.442695, %v2045_v10  ;;  %v2054_v19 = vsub.f32 %v7757_v52, %v6359_v31  ;;  %v931_v31 = vld [vmem:[%s6097_s18 + $0x120] sm:$0xff]  ;;  %v937_v18 = vld [vmem:[%s6097_s18 + $0x150] sm:$0xff] }
 0x293   : > { %v6428_v46 = vpop.eup %4977  ;;  %4997 = vpow2.f32 %v2084_v33  ;;  %v2600_v51 = vpack.c.bf16 %v931_v31, %v927_v50  ;;  %v7762_v10 = vld [vmem:[#allocation25_spill] sm:$0xff]  ;;  %v946_v31 = vld [vmem:[%s6097_s18 + $0x198] sm:$0xff] }
 0x294   : > { %v6438_v20 = vpop.eup %4979  ;;  %4999 = vpow2.f32 %v2086_v0  ;;  %v7756_v0 = vld [vmem:[#allocation50_spill] sm:$0xff]  ;;  %v2114_v3 = vmul.f32 1.442695, %v2053_v44  ;;  %v2116_v16 = vmul.f32 1.442695, %v2054_v19  ;;  %v941_v44 = vld [vmem:[%s6097_s18 + $0x170] sm:$0xff] }
 0x295   : > { %v6440_v21 = vpop.eup %4981  ;;  %5001 = vpow2.f32 %v2088_v49  ;;  %v2046_v54 = vsub.f32 %v7756_v0, %v7755_v27  ;;  %v2606_v19 = vpack.c.bf16 %v941_v44, %v937_v18  ;;  %v7770_v44 = vld [vmem:[#allocation29_spill] sm:$0xff] }
 0x296   : > { %3420 = vperm.xlu1 %4968, %v6416_v43   ;;  %3410 = vperm.xlu0 %4967, %v6414_v42   ;;  %v6452_v47 = vpop.eup %4983  ;;  %5003 = vpow2.f32 %v2090_v58 }
 0x297   : > { %v6454_v2 = vpop.eup %4985  ;;  %5005 = vpow2.f32 %v2092_v26 }
 0x298   : > { %v6465_v17 = vpop.eup %4987  ;;  %5007 = vpow2.f32 %v2104_v7  ;;  %v7759_v7 = vld [vmem:[#allocation23_spill] sm:$0xff] }
 0x299   : > { %v6467_v36 = vpop.eup %4989  ;;  %5009 = vpow2.f32 %v2094_v38  ;;  %v929_v38 = vld [vmem:[%s6097_s18 + $0x110] sm:$0xff] }
 0x29a   : > { %3430 = vperm.xlu1 %4968, %v6428_v46   ;;  %3425 = vperm.xlu0 %4967, %v6426_v60   ;;  %v6473_v63 = vpop.eup %4991 }
 0x29b   : > { %v6475_v14 = vpop.eup %4993 }
 0x29c   : > { %v6485_v56 = vpop.eup %4995 }
 0x29d   : > { %v6490_v34 = vpop.eup %4997 }
 0x29e   : > { %3440 = vperm.xlu1 %4968, %v6440_v21   ;;  %3435 = vperm.xlu0 %4967, %v6438_v20   ;;  %v6499_v11 = vpop.eup %4999 }
 0x29f   : > { %v6503_v13 = vpop.eup %5001 }
 0x2a0   : > { %v6510_v61 = vpop.eup %5003 }
 0x2a1   : > { %v6512_v22 = vpop.eup %5005 }
 0x2a2   : > { %3450 = vperm.xlu1 %4968, %v6452_v47   ;;  %3445 = vperm.xlu0 %4967, %v6454_v2   ;;  %7752 = vst [vmem:[#allocation19_spill] sm:$0xff] %v6512_v22  ;;  %v6521_v49 = vpop.eup %5007 }
 0x2a5   : > { %v2123_v55 = vpop.permute.xlu0 %2122 }
 0x2a6   : > { %3460 = vperm.xlu1 %4968, %v6467_v36   ;;  %3455 = vperm.xlu0 %4967, %v6465_v17   ;;  %v2280_v8 = vsub.f32 %v5889_v1, %v2123_v55  ;;  %v2106_v1 = vmul.f32 1.442695, %v7748_v29  ;;  %v6525_v55 = vpop.eup %5009  ;;  %v933_v29 = vld [vmem:[%s6097_s18 + $0x130] sm:$0xff] }
 0x2a7   : > { %7758 = vst [vmem:[#allocation48_spill] sm:$0xff] %v6525_v55  ;;  %v2602_v4 = vpack.c.bf16 %v933_v29, %v929_v38  ;;  %v950_v38 = vld [vmem:[%s6097_s18 + $0x1b8] sm:$0xff] }
 0x2a8   : > { %v2312_v35 = vmul.f32 1.442695, %v2280_v8  ;;  %5011 = vpow2.f32 %v2106_v1 }
 0x2aa   : > { %3470 = vperm.xlu1 %4968, %v6475_v14   ;;  %3465 = vperm.xlu0 %4967, %v6473_v63   ;;  %5013 = vpow2.f32 %v2312_v35  ;;  %v2100_v35 = vmul.f32 1.442695, %v2046_v54  ;;  %v7764_v54 = vmov 0  }
 0x2ad   : > { %v2128_v53 = vpop.permute.xlu1 %2127 }
 0x2ae   : > { %v2281_v30 = vsub.f32 %v5895_v6, %v2128_v53  ;;  %3480 = vperm.xlu1 %4968, %v6490_v34   ;;  %3475 = vperm.xlu0 %4967, %v6485_v56   ;;  %v7760_v53 = vld [vmem:[#allocation53_spill] sm:$0xff] }
 0x2af   : > { %v2047_v9 = vsub.f32 %v7760_v53, %v6362_v24  ;;  %v935_v24 = vld [vmem:[%s6097_s18 + $0x140] sm:$0xff] }
 0x2b0   : > { %v2314_v48 = vmul.f32 1.442695, %v2281_v30  ;;  %v936_v30 = vld [vmem:[%s6097_s18 + $0x148] sm:$0xff]  ;;  %v943_v53 = vld [vmem:[%s6097_s18 + $0x180] sm:$0xff] }
 0x2b1   : > { %v2133_v6 = vpop.permute.xlu1 %2132 }
 0x2b2   : > { %5015 = vpow2.f32 %v2314_v48  ;;  %v2282_v59 = vsub.f32 %v7749_v57, %v2133_v6  ;;  %3490 = vperm.xlu1 %4968, %v6503_v13   ;;  %3485 = vperm.xlu0 %4967, %v6499_v11   ;;  %v6528_v8 = vpop.eup %5011  ;;  %v938_v48 = vld [vmem:[%s6097_s18 + $0x158] sm:$0xff] }
 0x2b3   : > { %5017 = vpow2.f32 %v2108_v62  ;;  %v940_v62 = vld [vmem:[%s6097_s18 + $0x168] sm:$0xff]  ;;  %v942_v6 = vld [vmem:[%s6097_s18 + $0x178] sm:$0xff] }
 0x2b4   : > { %v2316_v5 = vmul.f32 1.442695, %v2282_v59  ;;  %5019 = vpow2.f32 %v2110_v25  ;;  %v6536_v1 = vpop.eup %5013 }
 0x2b5   : > { %v2138_v23 = vpop.permute.xlu1 %2137  ;;  %5021 = vpow2.f32 %v2096_v45 }
 0x2b6   : > { %v2283_v33 = vsub.f32 %v7754_v40, %v2138_v23  ;;  %3500 = vperm.xlu1 %4968, %v6512_v22   ;;  %3495 = vperm.xlu0 %4967, %v6510_v61   ;;  %5023 = vpow2.f32 %v2112_v32  ;;  %v939_v23 = vld [vmem:[%s6097_s18 + $0x160] sm:$0xff]  ;;  %v2102_v40 = vmul.f32 1.442695, %v2047_v9  ;;  %v994_v22 = vld [vmem:[%s6097_s18 + $0x318] sm:$0xff] }
 0x2b7   : > { %5025 = vpow2.f32 %v2316_v5  ;;  %v2605_v5 = vpack.c.bf16 %v940_v62, %v936_v30  ;;  %v947_v9 = vld [vmem:[%s6097_s18 + $0x1a0] sm:$0xff] }
 0x2b8   : > { %v2318_v58 = vmul.f32 1.442695, %v2283_v33  ;;  %v2055_v33 = vsub.f32 %v6364_v37, %v6376_v12  ;;  %v2604_v12 = vpack.c.bf16 %v939_v23, %v935_v24  ;;  %v958_v23 = vld [vmem:[%s6097_s18 + $0x1f8] sm:$0xff] }
 0x2b9   : > { %v2143_v26 = vpop.permute.xlu1 %2142 }
 0x2ba   : > { %5027 = vpow2.f32 %v2318_v58  ;;  %v2284_v15 = vsub.f32 %v7759_v7, %v2143_v26  ;;  %3530 = vperm.xlu1 %4968, %v6521_v49   ;;  %3505 = vperm.xlu0 %4967, %v6525_v55   ;;  %v944_v58 = vld [vmem:[%s6097_s18 + $0x188] sm:$0xff]  ;;  %v7767_v7 = vld [vmem:[#allocation27_spill] sm:$0xff] }
 0x2bb   : > { %5029 = vpow2.f32 %v2098_v39  ;;  %v2607_v39 = vpack.c.bf16 %v942_v6, %v938_v48  ;;  %v948_v26 = vld [vmem:[%s6097_s18 + $0x1a8] sm:$0xff]  ;;  %v949_v48 = vld [vmem:[%s6097_s18 + $0x1b0] sm:$0xff] }
 0x2bc   : > { %v6542_v41 = vpop.eup %5015  ;;  %v2320_v59 = vmul.f32 1.442695, %v2284_v15  ;;  %5031 = vpow2.f32 %v2114_v3  ;;  %v2168_v3 = vpop.permute.xlu0 %2167  ;;  %v2609_v62 = vpack.c.bf16 %v948_v26, %v944_v58  ;;  %v952_v6 = vld [vmem:[%s6097_s18 + $0x1c8] sm:$0xff]  ;;  %v951_v58 = vld [vmem:[%s6097_s18 + $0x1c0] sm:$0xff]  ;;  %v989_v55 = vld [vmem:[%s6097_s18 + $0x2f0] sm:$0xff] }
 0x2bd   : > { %v6546_v25 = vpop.eup %5017  ;;  %v2568_v57 = vpack.c.bf16 %v6542_v41, %v6536_v1  ;;  %v2148_v45 = vpop.permute.xlu1 %2147  ;;  %5033 = vpow2.f32 %v2100_v35  ;;  %v2118_v35 = vmul.f32 1.442695, %v2055_v33  ;;  %v2608_v33 = vpack.c.bf16 %v947_v9, %v943_v53  ;;  %v957_v53 = vld [vmem:[%s6097_s18 + $0x1f0] sm:$0xff] }
 0x2be   : > { %7761 = vst [vmem:[#allocation47_spill] sm:$0xff] %v6546_v25  ;;  %v2285_v32 = vsub.f32 %v7762_v10, %v2148_v45  ;;  %3540 = vperm.xlu1 %4968, %v6546_v25   ;;  %3535 = vperm.xlu0 %4967, %v6528_v8   ;;  %v6561_v27 = vpop.eup %5019  ;;  %5035 = vpow2.f32 %v2116_v16  ;;  %v945_v16 = vld [vmem:[%s6097_s18 + $0x190] sm:$0xff]  ;;  %v2611_v10 = vpack.c.bf16 %v950_v38, %v946_v31  ;;  %v955_v38 = vld [vmem:[%s6097_s18 + $0x1e0] sm:$0xff] }
 0x2bf   : > { %4650 = vmatmul.mubr.msk.bf16.vlgmr.msra.gmra.mrb[32].mxu0 %vm1895_vm1, %v2568_v57  ;;  %4654 = vmatmul.mubr.msk.bf16.vlgmr.msra.gmra.mrb[32].mxu1 %vm1895_vm1, %v2568_v57  ;;  %7763 = vst [vmem:[#allocation49_spill] sm:$0xff] %v6561_v27  ;;  %v6565_v52 = vpop.eup %5021  ;;  %5037 = vpow2.f32 %v2320_v59  ;;  %v7769_v59 = vld [vmem:[#allocation18_spill] sm:$0xff]  ;;  %v985_v25 = vld [vmem:[%s6097_s18 + $0x2d0] sm:$0xff] }
 0x2c0   : > { %v2322_v0 = vmul.f32 1.442695, %v2285_v32  ;;  %2702 = vmatprep.mubr.bf16.mxu0 %v7764_v54  ;;  %2775 = vmatprep.mubr.bf16.mxu1 %v7764_v54  ;;  %7765 = vst [vmem:[#allocation21_spill] sm:$0xff] %v6565_v52  ;;  %v6569_v50 = vpop.eup %5023  ;;  %v2289_v45 = vsub.f32 %v7769_v59, %v2168_v3  ;;  %v956_v32 = vld [vmem:[%s6097_s18 + $0x1e8] sm:$0xff]  ;;  %v2178_v18 = vpop.permute.xlu0 %2177 }
 0x2c1   : > { %v2153_v37 = vpop.permute.xlu1 %2152  ;;  %2819 = vmatpush1.bf16.msra.mxu0 %v2600_v51  ;;  %2892 = vmatpush1.bf16.msra.mxu1 %v2602_v4  ;;  %7766 = vst [vmem:[#allocation51_spill] sm:$0xff] %v6569_v50  ;;  %v6576_v29 = vpop.eup %5025 }
 0x2c2   : > { %5039 = vpow2.f32 %v2322_v0  ;;  %v2286_v15 = vsub.f32 %v7767_v7, %v2153_v37  ;;  %3510 = vperm.xlu1 %4968, %v6565_v52   ;;  %3545 = vperm.xlu0 %4967, %v6561_v27   ;;  %v2330_v3 = vmul.f32 1.442695, %v2289_v45  ;;  %v7773_v7 = vld [vmem:[#allocation22_spill] sm:$0xff]  ;;  %v986_v27 = vld [vmem:[%s6097_s18 + $0x2d8] sm:$0xff] }
 0x2c3   : > { %5041 = vpow2.f32 %v2102_v40  ;;  %2820 = vmatprep.subr.bf16.mxu0 %v2605_v5  ;;  %2893 = vmatprep.subr.bf16.mxu1 %v2607_v39  ;;  %v954_v5 = vld [vmem:[%s6097_s18 + $0x1d8] sm:$0xff]  ;;  %v2610_v39 = vpack.c.bf16 %v949_v48, %v945_v16  ;;  %v7775_v48 = vld [vmem:[#allocation17_spill] sm:$0xff]  ;;  %v964_v45 = vld [vmem:[%s6097_s18 + $0x228] sm:$0xff] }
 0x2c4   : > { %v6580_v30 = vpop.eup %5027  ;;  %v2324_v51 = vmul.f32 1.442695, %v2286_v15  ;;  %5043 = vpow2.f32 %v2118_v35  ;;  %v2291_v15 = vsub.f32 %v7773_v7, %v2178_v18  ;;  %v953_v35 = vld [vmem:[%s6097_s18 + $0x1d0] sm:$0xff]  ;;  %v2188_v16 = vpop.permute.xlu0 %2187  ;;  %v7778_v7 = vld [vmem:[#allocation20_spill] sm:$0xff]  ;;  %v988_v52 = vld [vmem:[%s6097_s18 + $0x2e8] sm:$0xff] }
 0x2c5   : > { %v6585_v57 = vpop.eup %5029  ;;  %v2158_v4 = vpop.permute.xlu1 %2157  ;;  %v2569_v24 = vpack.c.bf16 %v6580_v30, %v6576_v29  ;;  %2821 = vmatpush1.bf16.msra.mxu0 %v2604_v12  ;;  %2894 = vmatpush1.bf16.msra.mxu1 %v2606_v19  ;;  %v2613_v12 = vpack.c.bf16 %v956_v32, %v952_v6  ;;  %v2615_v19 = vpack.c.bf16 %v958_v23, %v954_v5  ;;  %v962_v32 = vld [vmem:[%s6097_s18 + $0x218] sm:$0xff] }
 0x2c6   : > { %7768 = vst [vmem:[#allocation50_spill] sm:$0xff] %v6585_v57  ;;  %v2287_v40 = vsub.f32 %v7770_v44, %v2158_v4  ;;  %3550 = vperm.xlu1 %4968, %v6569_v50   ;;  %3515 = vperm.xlu0 %4967, %v6585_v57   ;;  %v6598_v0 = vpop.eup %5031  ;;  %5045 = vpow2.f32 %v2324_v51  ;;  %v966_v5 = vld [vmem:[%s6097_s18 + $0x238] sm:$0xff]  ;;  %v2334_v18 = vmul.f32 1.442695, %v2291_v15  ;;  %v7777_v44 = vld [vmem:[#allocation26_spill] sm:$0xff] }
 0x2c7   : > { %4651 = vmatmul.mubr.msk.bf16.gmra.mrb[36].mxu0 %vm1895_vm1, %v2569_v24  ;;  %4655 = vmatmul.mubr.msk.bf16.gmra.mrb[36].mxu1 %vm1895_vm1, %v2569_v24  ;;  %7771 = vst [vmem:[#allocation52_spill] sm:$0xff] %v6598_v0  ;;  %v6603_v26 = vpop.eup %5033  ;;  %v2612_v24 = vpack.c.bf16 %v955_v38, %v951_v58  ;;  %v7780_v38 = vld [vmem:[#allocation30_spill] sm:$0xff] }
 0x2c8   : > { %v2326_v37 = vmul.f32 1.442695, %v2287_v40  ;;  %2712 = vmatprep.mubr.bf16.mxu0 %v7764_v54  ;;  %2785 = vmatprep.mubr.bf16.mxu1 %v7764_v54  ;;  %7772 = vst [vmem:[#allocation23_spill] sm:$0xff] %v6603_v26  ;;  %v6609_v9 = vpop.eup %5035  ;;  %v2293_v40 = vsub.f32 %v7777_v44, %v2188_v16  ;;  %v7781_v16 = vld [vmem:[#allocation24_spill] sm:$0xff]  ;;  %v984_v50 = vld [vmem:[%s6097_s18 + $0x2c8] sm:$0xff] }
 0x2c9   : > { %v2163_v31 = vpop.permute.xlu1 %2162  ;;  %2822 = vmatprep.subr.bf16.mxu0 %v2609_v62  ;;  %2895 = vmatprep.subr.bf16.mxu1 %v2611_v10  ;;  %7774 = vst [vmem:[#allocation53_spill] sm:$0xff] %v6609_v9  ;;  %v6614_v59 = vpop.eup %5037  ;;  %v960_v62 = vld [vmem:[%s6097_s18 + $0x208] sm:$0xff]  ;;  %v2614_v10 = vpack.c.bf16 %v957_v53, %v953_v35 }
 0x2ca   : > { %5047 = vpow2.f32 %v2326_v37  ;;  %v2288_v6 = vsub.f32 %v7775_v48, %v2163_v31  ;;  %3520 = vperm.xlu1 %4968, %v6603_v26   ;;  %3555 = vperm.xlu0 %4967, %v6598_v0   ;;  %v2338_v15 = vmul.f32 1.442695, %v2293_v40  ;;  %v977_v26 = vld [vmem:[%s6097_s18 + $0x290] sm:$0xff] }
 0x2cb   : > { %2823 = vmatpush1.bf16.msra.mxu0 %v2608_v33  ;;  %2896 = vmatpush1.bf16.msra.mxu1 %v2610_v39  ;;  %5049 = vpow2.f32 %v2330_v3  ;;  %v2198_v39 = vpop.permute.xlu0 %2197  ;;  %v981_v0 = vld [vmem:[%s6097_s18 + $0x2b0] sm:$0xff] }
 0x2cc   : > { %v6618_v51 = vpop.eup %5039  ;;  %v2328_v4 = vmul.f32 1.442695, %v2288_v6  ;;  %2824 = vmatprep.subr.bf16.mxu0 %v2613_v12  ;;  %2897 = vmatprep.subr.bf16.mxu1 %v2615_v19  ;;  %v2617_v12 = vpack.c.bf16 %v964_v45, %v960_v62  ;;  %v2619_v19 = vpack.c.bf16 %v966_v5, %v962_v32  ;;  %v2295_v35 = vsub.f32 %v7780_v38, %v2198_v39  ;;  %v963_v39 = vld [vmem:[%s6097_s18 + $0x220] sm:$0xff]  ;;  %v974_v38 = vld [vmem:[%s6097_s18 + $0x278] sm:$0xff] }
 0x2cd   : > { %v6622_v23 = vpop.eup %5041  ;;  %v2173_v37 = vpop.permute.xlu1 %2172  ;;  %v2570_v33 = vpack.c.bf16 %v6618_v51, %v6614_v59 }
 0x2ce   : > { %7776 = vst [vmem:[#allocation25_spill] sm:$0xff] %v6622_v23  ;;  %5051 = vpow2.f32 %v2328_v4  ;;  %v2290_v31 = vsub.f32 %v7778_v7, %v2173_v37  ;;  %3560 = vperm.xlu1 %4968, %v6609_v9   ;;  %3525 = vperm.xlu0 %4967, %v6622_v23   ;;  %v6634_v3 = vpop.eup %5043  ;;  %v2342_v4 = vmul.f32 1.442695, %v2295_v35  ;;  %v961_v7 = vld [vmem:[%s6097_s18 + $0x210] sm:$0xff]  ;;  %v980_v9 = vld [vmem:[%s6097_s18 + $0x2a8] sm:$0xff]  ;;  %v978_v23 = vld [vmem:[%s6097_s18 + $0x298] sm:$0xff] }
 0x2cf   : > { %4652 = vmatmul.mubr.msk.bf16.gmra.mrb[40].mxu0 %vm1895_vm1, %v2570_v33  ;;  %4656 = vmatmul.mubr.msk.bf16.gmra.mrb[40].mxu1 %vm1895_vm1, %v2570_v33  ;;  %7779 = vst [vmem:[#allocation27_spill] sm:$0xff] %v6634_v3  ;;  %5053 = vpow2.f32 %v2334_v18  ;;  %v959_v33 = vld [vmem:[%s6097_s18 + $0x200] sm:$0xff] }
 0x2d0   : > { %v2332_v58 = vmul.f32 1.442695, %v2290_v31  ;;  %2722 = vmatprep.mubr.bf16.mxu0 %v7764_v54  ;;  %2795 = vmatprep.mubr.bf16.mxu1 %v7764_v54  ;;  %v6639_v6 = vpop.eup %5045  ;;  %v965_v31 = vld [vmem:[%s6097_s18 + $0x230] sm:$0xff] }
 0x2d1   : > { %v2183_v53 = vpop.permute.xlu1 %2182  ;;  %2825 = vmatpush1.bf16.msra.mxu0 %v2612_v24  ;;  %2898 = vmatpush1.bf16.msra.mxu1 %v2614_v10  ;;  %v7782_v10 = vld [vmem:[#allocation28_spill] sm:$0xff] }
 0x2d2   : > { %5055 = vpow2.f32 %v2332_v58  ;;  %v2292_v48 = vsub.f32 %v7781_v16, %v2183_v53  ;;  %3565 = vperm.xlu0 %4967, %v6634_v3   ;;  %2976 = vmatprep.subr.bf16.mxu0 %v2617_v12  ;;  %v968_v12 = vld [vmem:[%s6097_s18 + $0x248] sm:$0xff]  ;;  %v2616_v16 = vpack.c.bf16 %v963_v39, %v959_v33  ;;  %v982_v33 = vld [vmem:[%s6097_s18 + $0x2b8] sm:$0xff] }
 0x2d3   : > { %3049 = vmatprep.subr.bf16.mxu1 %v2619_v19  ;;  %5057 = vpow2.f32 %v2338_v15  ;;  %v972_v58 = vld [vmem:[%s6097_s18 + $0x268] sm:$0xff]  ;;  %v970_v15 = vld [vmem:[%s6097_s18 + $0x258] sm:$0xff] }
 0x2d4   : > { %v6641_v62 = vpop.eup %5047  ;;  %v2336_v45 = vmul.f32 1.442695, %v2292_v48  ;;  %v2618_v48 = vpack.c.bf16 %v965_v31, %v961_v7 }
 0x2d5   : > { %v2193_v32 = vpop.permute.xlu1 %2192  ;;  %v2571_v24 = vpack.c.bf16 %v6641_v62, %v6639_v6  ;;  %v6646_v18 = vpop.eup %5049 }
 0x2d6   : > { %5059 = vpow2.f32 %v2336_v45  ;;  %v2294_v5 = vsub.f32 %v7782_v10, %v2193_v32  ;;  %v967_v45 = vld [vmem:[%s6097_s18 + $0x240] sm:$0xff]  ;;  %v2621_v32 = vpack.c.bf16 %v972_v58, %v968_v12  ;;  %v969_v10 = vld [vmem:[%s6097_s18 + $0x250] sm:$0xff] }
 0x2d7   : > { %4653 = vmatmul.mubr.msk.bf16.gmra.mrb[44].mxu0 %vm1895_vm1, %v2571_v24  ;;  %4657 = vmatmul.mubr.msk.bf16.gmra.mrb[44].mxu1 %vm1895_vm1, %v2571_v24  ;;  %5061 = vpow2.f32 %v2342_v4  ;;  %v971_v4 = vld [vmem:[%s6097_s18 + $0x260] sm:$0xff]  ;;  %v2623_v24 = vpack.c.bf16 %v974_v38, %v970_v15  ;;  %v2627_v38 = vpack.c.bf16 %v982_v33, %v978_v23 }
 0x2d8   : > { %v6650_v44 = vpop.eup %5051  ;;  %v2340_v40 = vmul.f32 1.442695, %v2294_v5  ;;  %2850 = vmatprep.mubr.bf16.mxu0 %v7764_v54  ;;  %2923 = vmatprep.mubr.bf16.mxu1 %v7764_v54  ;;  %v973_v5 = vld [vmem:[%s6097_s18 + $0x270] sm:$0xff]  ;;  %v975_v12 = vld [vmem:[%s6097_s18 + $0x280] sm:$0xff] }
 0x2d9   : > { %v2572_v37 = vpack.c.bf16 %v6646_v18, %v6650_v44  ;;  %v6661_v19 = vpop.eup %5053  ;;  %v2622_v31 = vpack.c.bf16 %v973_v5, %v969_v10  ;;  %v979_v58 = vld [vmem:[%s6097_s18 + $0x2a0] sm:$0xff]  ;;  %v7783_v10 = vld [vmem:[#allocation31_spill] sm:$0xff] }
 0x2da   : > { %5063 = vpow2.f32 %v2340_v40  ;;  %v976_v40 = vld [vmem:[%s6097_s18 + $0x288] sm:$0xff]  ;;  %v2624_v23 = vpack.c.bf16 %v979_v58, %v975_v12  ;;  %v998_v12 = vld [vmem:[%s6097_s18 + $0x338] sm:$0xff] }
 0x2db   : > { %v2625_v15 = vpack.c.bf16 %v980_v9, %v976_v40  ;;  %v2629_v40 = vpack.c.bf16 %v988_v52, %v984_v50  ;;  %v7784_v50 = vld [vmem:[#allocation33_spill] sm:$0xff] }
 0x2dc   : > { %v6666_v35 = vpop.eup %5055 }
 0x2dd   : > { %v2573_v53 = vpack.c.bf16 %v6661_v19, %v6666_v35  ;;  %v6675_v3 = vpop.eup %5057 }
 0x2df   : > { %4658 = vmatmul.mubr.msk.bf16.vlgmr.msra.gmra.mrb[48].mxu0 %vm1895_vm1, %v2572_v37  ;;  %4662 = vmatmul.mubr.msk.bf16.vlgmr.msra.gmra.mrb[48].mxu1 %vm1895_vm1, %v2572_v37  ;;  %v2620_v37 = vpack.c.bf16 %v971_v4, %v967_v45  ;;  %v2626_v4 = vpack.c.bf16 %v981_v0, %v977_v26 }
 0x2e0   : > { %v6682_v39 = vpop.eup %5059  ;;  %2860 = vmatprep.mubr.bf16.mxu0 %v7764_v54  ;;  %2933 = vmatprep.mubr.bf16.mxu1 %v7764_v54 }
 0x2e1   : > { %v6688_v7 = vpack.c.bf16 %v6675_v3, %v6682_v39  ;;  %2977 = vmatpush1.bf16.msra.mxu0 %v2616_v16  ;;  %3050 = vmatpush1.bf16.msra.mxu1 %v2618_v48  ;;  %v6695_v57 = vpop.eup %5061  ;;  %v990_v16 = vld [vmem:[%s6097_s18 + $0x2f8] sm:$0xff] }
 0x2e2   : > { %2978 = vmatprep.subr.bf16.mxu0 %v2621_v32  ;;  %3051 = vmatprep.subr.bf16.mxu1 %v2623_v24  ;;  %v983_v32 = vld [vmem:[%s6097_s18 + $0x2c0] sm:$0xff]  ;;  %v2631_v33 = vpack.c.bf16 %v990_v16, %v986_v27  ;;  %v2630_v27 = vpack.c.bf16 %v989_v55, %v985_v25  ;;  %v2464_v55 = vsel %vm1895_vm1, %v6650_v44, 0.0  ;;  %v2467_v44 = vsel %vm1895_vm1, %v6646_v18, 0.0 }
 0x2e3   : > { %v987_v24 = vld [vmem:[%s6097_s18 + $0x2e0] sm:$0xff]  ;;  %v2446_v18 = vsel %vm1895_vm1, %v6576_v29, 0.0 }
 0x2e4   : > { %v6700_v48 = vpop.eup %5063  ;;  %v2628_v52 = vpack.c.bf16 %v987_v24, %v983_v32  ;;  %v991_v29 = vld [vmem:[%s6097_s18 + $0x300] sm:$0xff] }
 0x2e5   : > { %v2203_v45 = vpop.permute.xlu1 %2202  ;;  %2979 = vmatpush1.bf16.msra.mxu0 %v2620_v37  ;;  %3052 = vmatpush1.bf16.msra.mxu1 %v2622_v31  ;;  %v2575_v9 = vpack.c.bf16 %v6695_v57, %v6700_v48  ;;  %v992_v37 = vld [vmem:[%s6097_s18 + $0x308] sm:$0xff] }
 0x2e6   : > { %v2296_v5 = vsub.f32 %v7783_v10, %v2203_v45  ;;  %2980 = vmatprep.subr.bf16.mxu0 %v2625_v15  ;;  %3053 = vmatprep.subr.bf16.mxu1 %v2627_v38  ;;  %v996_v31 = vld [vmem:[%s6097_s18 + $0x328] sm:$0xff]  ;;  %v2635_v38 = vpack.c.bf16 %v998_v12, %v994_v22  ;;  %v7785_v45 = vld [vmem:[#allocation35_spill] sm:$0xff] }
 0x2e7   : > { %4659 = vmatmul.mubr.msk.bf16.gmra.mrb[52].mxu0 %vm1895_vm1, %v2573_v53  ;;  %4663 = vmatmul.mubr.msk.bf16.gmra.mrb[52].mxu1 %vm1895_vm1, %v2573_v53  ;;  %v2633_v15 = vpack.c.bf16 %v996_v31, %v992_v37 }
 0x2e8   : > { %2870 = vmatprep.mubr.bf16.mxu0 %v7764_v54  ;;  %2943 = vmatprep.mubr.bf16.mxu1 %v7764_v54  ;;  %v2344_v0 = vmul.f32 1.442695, %v2296_v5 }
 0x2e9   : > { %v2208_v26 = vpop.permute.xlu0 %2207  ;;  %2981 = vmatpush1.bf16.msra.mxu0 %v2624_v23  ;;  %3054 = vmatpush1.bf16.msra.mxu1 %v2626_v4  ;;  %v2440_v23 = vsel %vm1895_vm1, %v6536_v1, 0.0  ;;  %v7786_v4 = vld [vmem:[#allocation37_spill] sm:$0xff] }
 0x2ea   : > { %v2297_v58 = vsub.f32 %v7784_v50, %v2208_v26  ;;  %2982 = vmatprep.subr.bf16.mxu0 %v2629_v40  ;;  %3055 = vmatprep.subr.bf16.mxu1 %v2631_v33  ;;  %5065 = vpow2.f32 %v2344_v0  ;;  %v7787_v40 = vld [vmem:[#allocation39_spill] sm:$0xff]  ;;  %v7788_v0 = vld [vmem:[#allocation41_spill] sm:$0xff] }
 0x2eb   : > { %v997_v50 = vld [vmem:[%s6097_s18 + $0x330] sm:$0xff] }
 0x2ec   : > { %v2346_v53 = vmul.f32 1.442695, %v2297_v58  ;;  %v1000_v58 = vld [vmem:[%s6097_s18 + $0x348] sm:$0xff] }
 0x2ed   : > { %v2213_v16 = vpop.permute.xlu1 %2212  ;;  %2983 = vmatpush1.bf16.msra.mxu0 %v2628_v52  ;;  %3056 = vmatpush1.bf16.msra.mxu1 %v2630_v27  ;;  %v995_v52 = vld [vmem:[%s6097_s18 + $0x320] sm:$0xff]  ;;  %v993_v27 = vld [vmem:[%s6097_s18 + $0x310] sm:$0xff] }
 0x2ee   : > { %5067 = vpow2.f32 %v2346_v53  ;;  %v2298_v10 = vsub.f32 %v7785_v45, %v2213_v16  ;;  %3134 = vmatprep.subr.bf16.mxu0 %v2633_v15  ;;  %3207 = vmatprep.subr.bf16.mxu1 %v2635_v38  ;;  %v2470_v38 = vsel %vm1895_vm1, %v6666_v35, 0.0  ;;  %v1004_v53 = vld [vmem:[%s6097_s18 + $0x368] sm:$0xff]  ;;  %v1002_v16 = vld [vmem:[%s6097_s18 + $0x358] sm:$0xff] }
 0x2ef   : > { %4660 = vmatmul.mubr.msk.bf16.gmra.mrb[56].mxu0 %vm1895_vm1, %v6688_v7  ;;  %4664 = vmatmul.mubr.msk.bf16.gmra.mrb[56].mxu1 %vm1895_vm1, %v6688_v7  ;;  %v2443_v7 = vsel %vm1895_vm1, %v6542_v41, 0.0  ;;  %v1006_v45 = vld [vmem:[%s6097_s18 + $0x378] sm:$0xff] }
 0x2f0   : > { %2880 = vmatprep.mubr.bf16.mxu0 %v7764_v54  ;;  %2953 = vmatprep.mubr.bf16.mxu1 %v7764_v54  ;;  %v2348_v22 = vmul.f32 1.442695, %v2298_v10  ;;  %v2473_v10 = vsel %vm1895_vm1, %v6661_v19, 0.0  ;;  %v1005_v19 = vld [vmem:[%s6097_s18 + $0x370] sm:$0xff] }
 0x2f1   : > { %v2218_v25 = vpop.permute.xlu0 %2217  ;;  %2465 = vadd.xlane.f32.xlu0 %v2464_v55  ;;  %v2632_v55 = vpack.c.bf16 %v995_v52, %v991_v29  ;;  %v7791_v52 = vld [vmem:[#allocation45_spill] sm:$0xff] }
 0x2f2   : > { %v2299_v32 = vsub.f32 %v7786_v4, %v2218_v25  ;;  %2441 = vadd.xlane.f32.xlu1 %v2440_v23  ;;  %5069 = vpow2.f32 %v2348_v22  ;;  %v7789_v22 = vld [vmem:[#allocation43_spill] sm:$0xff]  ;;  %v2634_v23 = vpack.c.bf16 %v997_v50, %v993_v27  ;;  %v999_v4 = vld [vmem:[%s6097_s18 + $0x340] sm:$0xff] }
 0x2f4   : > { %v2350_v24 = vmul.f32 1.442695, %v2299_v32  ;;  %v6735_v1 = vpop.eup %5065  ;;  %v1003_v32 = vld [vmem:[%s6097_s18 + $0x360] sm:$0xff] }
 0x2f5   : > { %v2223_v5 = vpop.permute.xlu1 %2222  ;;  %2444 = vadd.xlane.f32.xlu0 %v2443_v7  ;;  %v2639_v7 = vpack.c.bf16 %v1006_v45, %v1002_v16  ;;  %v1013_v16 = vld [vmem:[%s6097_s18 + $0x3b0] sm:$0xff] }
 0x2f6   : > { %5071 = vpow2.f32 %v2350_v24  ;;  %v2300_v33 = vsub.f32 %v7787_v40, %v2223_v5  ;;  %2468 = vadd.xlane.f32.xlu1 %v2467_v44  ;;  %v2637_v24 = vpack.c.bf16 %v1004_v53, %v1000_v58  ;;  %v1001_v5 = vld [vmem:[%s6097_s18 + $0x350] sm:$0xff]  ;;  %v2452_v40 = vsel %vm1895_vm1, %v6614_v59, 0.0  ;;  %v1010_v58 = vld [vmem:[%s6097_s18 + $0x398] sm:$0xff] }
 0x2f7   : > { %4661 = vmatmul.mubr.msk.bf16.gmra.mrb[60].mxu0 %vm1895_vm1, %v2575_v9  ;;  %4665 = vmatmul.mubr.msk.bf16.gmra.mrb[60].mxu1 %vm1895_vm1, %v2575_v9  ;;  %v2449_v9 = vsel %vm1895_vm1, %v6580_v30, 0.0  ;;  %v2636_v59 = vpack.c.bf16 %v1003_v32, %v999_v4  ;;  %v2638_v50 = vpack.c.bf16 %v1005_v19, %v1001_v5  ;;  %v1009_v53 = vld [vmem:[%s6097_s18 + $0x390] sm:$0xff]  ;;  %v1020_v32 = vld [vmem:[%s6097_s18 + $0x3e8] sm:$0xff]  ;;  %v7792_v5 = vld [vmem:[#allocation36_spill] sm:$0xff] }
 0x2f8   : > { %v6739_v41 = vpop.eup %5067  ;;  %3008 = vmatprep.mubr.bf16.mxu0 %v7764_v54  ;;  %3081 = vmatprep.mubr.bf16.mxu1 %v7764_v54  ;;  %v2352_v31 = vmul.f32 1.442695, %v2300_v33 }
 0x2f9   : > { %v2576_v37 = vpack.c.bf16 %v6739_v41, %v6735_v1  ;;  %v2228_v12 = vpop.permute.xlu0 %2227  ;;  %2447 = vadd.xlane.f32.xlu0 %v2446_v18 }
 0x2fa   : > { %v2301_v26 = vsub.f32 %v7788_v0, %v2228_v12  ;;  %2450 = vadd.xlane.f32.xlu1 %v2449_v9  ;;  %5073 = vpow2.f32 %v2352_v31  ;;  %v2455_v31 = vsel %vm1895_vm1, %v6618_v51, 0.0  ;;  %v1008_v9 = vld [vmem:[%s6097_s18 + $0x388] sm:$0xff]  ;;  %v1014_v51 = vld [vmem:[%s6097_s18 + $0x3b8] sm:$0xff] }
 0x2fb   : > { %v1012_v0 = vld [vmem:[%s6097_s18 + $0x3a8] sm:$0xff] }
 0x2fc   : > { %v2354_v15 = vmul.f32 1.442695, %v2301_v26  ;;  %v6765_v35 = vpop.eup %5069  ;;  %v7790_v26 = vld [vmem:[#allocation32_spill] sm:$0xff]  ;;  %v2641_v4 = vpack.c.bf16 %v1012_v0, %v1008_v9  ;;  %v2458_v9 = vsel %vm1895_vm1, %v6639_v6, 0.0  ;;  %v1015_v6 = vld [vmem:[%s6097_s18 + $0x3c0] sm:$0xff] }
 0x2fd   : > { %v2233_v30 = vpop.permute.xlu1 %2232  ;;  %2471 = vadd.xlane.f32.xlu0 %v2470_v38  ;;  %v1011_v38 = vld [vmem:[%s6097_s18 + $0x3a0] sm:$0xff] }
 0x2fe   : > { %5075 = vpow2.f32 %v2354_v15  ;;  %v2302_v25 = vsub.f32 %v7789_v22, %v2233_v30  ;;  %2474 = vadd.xlane.f32.xlu1 %v2473_v10  ;;  %v1007_v15 = vld [vmem:[%s6097_s18 + $0x380] sm:$0xff]  ;;  %v2476_v10 = vsel %vm1895_vm1, %v6682_v39, 0.0  ;;  %v2643_v39 = vpack.c.bf16 %v1014_v51, %v1010_v58  ;;  %v7794_v58 = vld [vmem:[#allocation40_spill] sm:$0xff] }
 0x2ff   : > { %4666 = vmatmul.mubr.msk.bf16.vlgmr.msra.gmra.mrb[64].mxu0 %vm1895_vm1, %v2576_v37  ;;  %4670 = vmatmul.mubr.msk.bf16.vlgmr.msra.gmra.mrb[64].mxu1 %vm1895_vm1, %v2576_v37 }
 0x300   : > { %v6771_v44 = vpop.eup %5071  ;;  %3018 = vmatprep.mubr.bf16.mxu0 %v7764_v54  ;;  %3091 = vmatprep.mubr.bf16.mxu1 %v7764_v54  ;;  %v2356_v33 = vmul.f32 1.442695, %v2302_v25 }
 0x301   : > { %v2243_v18 = vpop.permute.xlu1 %2242  ;;  %v2238_v37 = vpop.permute.xlu0 %2237  ;;  %2453 = vadd.xlane.f32.xlu0 %v2452_v40  ;;  %v2577_v12 = vpack.c.bf16 %v6771_v44, %v6765_v35  ;;  %3135 = vmatpush1.bf16.msra.mxu0 %v2632_v55  ;;  %v1016_v55 = vld [vmem:[%s6097_s18 + $0x3c8] sm:$0xff] }
 0x302   : > { %v2304_v29 = vsub.f32 %v7790_v26, %v2243_v18  ;;  %v2303_v27 = vsub.f32 %v7791_v52, %v2238_v37  ;;  %2456 = vadd.xlane.f32.xlu1 %v2455_v31  ;;  %3208 = vmatpush1.bf16.msra.mxu1 %v2634_v23  ;;  %5077 = vpow2.f32 %v2356_v33  ;;  %v2479_v23 = vsel %vm1895_vm1, %v6675_v3, 0.0  ;;  %v7793_v40 = vld [vmem:[#allocation34_spill] sm:$0xff] }
 0x303   : > { %3136 = vmatprep.subr.bf16.mxu0 %v2637_v24  ;;  %3209 = vmatprep.subr.bf16.mxu1 %v2639_v7  ;;  %v1018_v24 = vld [vmem:[%s6097_s18 + $0x3d8] sm:$0xff]  ;;  %v2640_v3 = vpack.c.bf16 %v1011_v38, %v1007_v15  ;;  %v2642_v37 = vpack.c.bf16 %v1013_v16, %v1009_v53  ;;  %v2645_v0 = vpack.c.bf16 %v1020_v32, %v1016_v55  ;;  %v2461_v52 = vsel %vm1895_vm1, %v6641_v62, 0.0  ;;  %v7795_v15 = vld [vmem:[#allocation38_spill] sm:$0xff]  ;;  %v1019_v53 = vld [vmem:[%s6097_s18 + $0x3e0] sm:$0xff] }
 0x304   : > { %v2360_v45 = vmul.f32 1.442695, %v2304_v29  ;;  %v2358_v30 = vmul.f32 1.442695, %v2303_v27  ;;  %v1022_v7 = vld [vmem:[%s6097_s18 + $0x3f8] sm:$0xff]  ;;  %v6801_v33 = vpop.eup %5073  ;;  %v1017_v16 = vld [vmem:[%s6097_s18 + $0x3d0] sm:$0xff] }
 0x305   : > { %v2253_v22 = vpop.permute.xlu1 %2252  ;;  %v2248_v25 = vpop.permute.xlu0 %2247  ;;  %2477 = vadd.xlane.f32.xlu0 %v2476_v10  ;;  %3137 = vmatpush1.bf16.msra.mxu0 %v2636_v59  ;;  %v2647_v26 = vpack.c.bf16 %v1022_v7, %v1018_v24  ;;  %v2482_v62 = vsel %vm1895_vm1, %v6700_v48, 0.0  ;;  %v7796_v32 = vld [vmem:[#allocation44_spill] sm:$0xff]  ;;  %v7797_v7 = vld [vmem:[#allocation42_spill] sm:$0xff] }
 0x306   : > { %5079 = vpow2.f32 %v2360_v45  ;;  %v2306_v19 = vsub.f32 %v7792_v5, %v2253_v22  ;;  %v2305_v18 = vsub.f32 %v7793_v40, %v2248_v25  ;;  %2480 = vadd.xlane.f32.xlu1 %v2479_v23  ;;  %3210 = vmatpush1.bf16.msra.mxu1 %v2638_v50  ;;  %v1021_v45 = vld [vmem:[%s6097_s18 + $0x3f0] sm:$0xff]  ;;  %v2485_v22 = vsel %vm1895_vm1, %v6695_v57, 0.0 }
 0x307   : > { %5081 = vpow2.f32 %v2358_v30  ;;  %4667 = vmatmul.mubr.msk.bf16.gmra.mrb[68].mxu0 %vm1895_vm1, %v2577_v12  ;;  %4671 = vmatmul.mubr.msk.bf16.gmra.mrb[68].mxu1 %vm1895_vm1, %v2577_v12  ;;  %v2644_v25 = vpack.c.bf16 %v1019_v53, %v1015_v6  ;;  %v2646_v23 = vpack.c.bf16 %v1021_v45, %v1017_v16  ;;  %v2488_v57 = vsel %vm1895_vm1, %v6735_v1, 0.0 }
 0x308   : > { %v6805_v31 = vpop.eup %5075  ;;  %v2362_v59 = vmul.f32 1.442695, %v2305_v18  ;;  %3028 = vmatprep.mubr.bf16.mxu0 %v7764_v54  ;;  %3101 = vmatprep.mubr.bf16.mxu1 %v7764_v54  ;;  %v2364_v50 = vmul.f32 1.442695, %v2306_v19 }
 0x309   : > { %v2263_v29 = vpop.permute.xlu1 %2262  ;;  %v2258_v12 = vpop.permute.xlu0 %2257  ;;  %2459 = vadd.xlane.f32.xlu0 %v2458_v9  ;;  %v2578_v27 = vpack.c.bf16 %v6805_v31, %v6801_v33  ;;  %3138 = vmatprep.subr.bf16.mxu0 %v2641_v4 }
 0x30a   : > { %v2308_v51 = vsub.f32 %v7794_v58, %v2263_v29  ;;  %v2307_v38 = vsub.f32 %v7795_v15, %v2258_v12  ;;  %2462 = vadd.xlane.f32.xlu1 %v2461_v52  ;;  %3211 = vmatprep.subr.bf16.mxu1 %v2643_v39  ;;  %5083 = vpow2.f32 %v2362_v59  ;;  %v7798_v59 = vld [vmem:[#allocation46_spill] sm:$0xff] }
 0x30b   : > { %3139 = vmatpush1.bf16.msra.mxu0 %v2640_v3  ;;  %3212 = vmatpush1.bf16.msra.mxu1 %v2642_v37  ;;  %5085 = vpow2.f32 %v2364_v50  ;;  %v2491_v37 = vsel %vm1895_vm1, %v6739_v41, 0.0  ;;  %v2497_v50 = vsel %vm1895_vm1, %v6771_v44, 0.0  ;;  %v2500_v44 = vsel %vm1895_vm1, %v6801_v33, 0.0 }
 0x30c   : > { %v2366_v30 = vmul.f32 1.442695, %v2307_v38  ;;  %3140 = vmatprep.subr.bf16.mxu0 %v2645_v0  ;;  %3213 = vmatprep.subr.bf16.mxu1 %v2647_v26  ;;  %v2368_v4 = vmul.f32 1.442695, %v2308_v51  ;;  %v6827_v19 = vpop.eup %5077 }
 0x30d   : > { %v2273_v10 = vpop.permute.xlu1 %2272  ;;  %v2268_v55 = vpop.permute.xlu0 %2267  ;;  %2483 = vadd.xlane.f32.xlu0 %v2482_v62 }
 0x30e   : > { %v2310_v24 = vsub.f32 %v7796_v32, %v2273_v10  ;;  %v2309_v5 = vsub.f32 %v7797_v7, %v2268_v55  ;;  %2486 = vadd.xlane.f32.xlu1 %v2485_v22  ;;  %5087 = vpow2.f32 %v2366_v30  ;;  %v2503_v55 = vsel %vm1895_vm1, %v6805_v31, 0.0 }
 0x30f   : > { %4668 = vmatmul.mubr.msk.bf16.gmra.mrb[72].mxu0 %vm1895_vm1, %v2578_v27  ;;  %4672 = vmatmul.mubr.msk.bf16.gmra.mrb[72].mxu1 %vm1895_vm1, %v2578_v27  ;;  %5089 = vpow2.f32 %v2368_v4  ;;  %v2494_v27 = vsel %vm1895_vm1, %v6765_v35, 0.0  ;;  %v2506_v4 = vsel %vm1895_vm1, %v6827_v19, 0.0 }
 0x310   : > { %v5080_v48 = vpop.eup %5079  ;;  %v2370_v40 = vmul.f32 1.442695, %v2309_v5  ;;  %3038 = vmatprep.mubr.bf16.mxu0 %v7764_v54  ;;  %3111 = vmatprep.mubr.bf16.mxu1 %v7764_v54  ;;  %v2372_v39 = vmul.f32 1.442695, %v2310_v24 }
 0x311   : > { %v6835_v18 = vpop.eup %5081  ;;  %v2278_v3 = vpop.permute.xlu0 %2277  ;;  %2489 = vadd.xlane.f32.xlu0 %v2488_v57  ;;  %3141 = vmatpush1.bf16.msra.mxu0 %v2644_v25  ;;  %v2512_v26 = vsel %vm1895_vm1, %v5080_v48, 0.0 }
 0x312   : > { %v2311_v9 = vsub.f32 %v7798_v59, %v2278_v3  ;;  %2492 = vadd.xlane.f32.xlu1 %v2491_v37  ;;  %v2579_v1 = vpack.c.bf16 %v6835_v18, %v6827_v19  ;;  %3214 = vmatpush1.bf16.msra.mxu1 %v2646_v23  ;;  %5091 = vpow2.f32 %v2370_v40  ;;  %v6861_v62 = vpop.permute.xlu1 %3415  ;;  %v2509_v31 = vsel %vm1895_vm1, %v6835_v18, 0.0 }
 0x313   : > { %5093 = vpow2.f32 %v2372_v39 }
 0x314   : > { %v2374_v0 = vmul.f32 1.442695, %v2311_v9  ;;  %v5084_v29 = vpop.eup %5083 }
 0x315   : > { %2513 = vadd.xlane.f32.xlu0 %v2512_v26  ;;  %v2580_v12 = vpack.c.bf16 %v5084_v29, %v5080_v48  ;;  %v2515_v41 = vsel %vm1895_vm1, %v5084_v29, 0.0  ;;  %v5086_v52 = vpop.eup %5085  ;;  %v6855_v30 = vpop.permute.xlu0 %3410 }
 0x316   : > { %5095 = vpow2.f32 %v2374_v0  ;;  %2516 = vadd.xlane.f32.xlu1 %v2515_v41  ;;  %v2518_v15 = vsel %vm1895_vm1, %v5086_v52, 0.0  ;;  %v6870_v33 = vpop.permute.xlu1 %3420 }
 0x317   : > { %4669 = vmatmul.mubr.msk.bf16.gmra.mrb[76].mxu0 %vm1895_vm1, %v2579_v1  ;;  %4673 = vmatmul.mubr.msk.bf16.gmra.mrb[76].mxu1 %vm1895_vm1, %v2579_v1 }
 0x318   : > { %3166 = vmatprep.mubr.bf16.mxu0 %v7764_v54  ;;  %v5088_v6 = vpop.eup %5087  ;;  %3239 = vmatprep.mubr.bf16.mxu1 %v7764_v54 }
 0x319   : > { %2495 = vadd.xlane.f32.xlu0 %v2494_v27  ;;  %v2581_v58 = vpack.c.bf16 %v5088_v6, %v5086_v52  ;;  %v5090_v51 = vpop.eup %5089  ;;  %v2521_v53 = vsel %vm1895_vm1, %v5088_v6, 0.0  ;;  %v6867_v25 = vpop.permute.xlu0 %3425 }
 0x31a   : > { %2498 = vadd.xlane.f32.xlu1 %v2497_v50  ;;  %v2524_v22 = vsel %vm1895_vm1, %v5090_v51, 0.0  ;;  %v6883_v7 = vpop.permute.xlu1 %3430 }
 0x31c   : > { %v5092_v38 = vpop.eup %5091 }
 0x31d   : > { %2519 = vadd.xlane.f32.xlu0 %v2518_v15  ;;  %v2582_v16 = vpack.c.bf16 %v5092_v38, %v5090_v51  ;;  %v5094_v35 = vpop.eup %5093  ;;  %v2527_v23 = vsel %vm1895_vm1, %v5092_v38, 0.0  ;;  %v6880_v32 = vpop.permute.xlu0 %3435 }
 0x31e   : > { %2522 = vadd.xlane.f32.xlu1 %v2521_v53  ;;  %v2530_v24 = vsel %vm1895_vm1, %v5094_v35, 0.0  ;;  %v6892_v48 = vpop.permute.xlu1 %3440  ;;  %v2384_v53 = vld [vmem:[#allocation3 + $0x40] sm:$0xff] }
 0x31f   : > { %4674 = vmatmul.mubr.msk.bf16.vlgmr.msra.gmra.mrb[80].mxu0 %vm1895_vm1, %v2580_v12  ;;  %4678 = vmatmul.mubr.msk.bf16.vlgmr.msra.gmra.mrb[80].mxu1 %vm1895_vm1, %v2580_v12 }
 0x320   : > { %v5096_v45 = vpop.eup %5095  ;;  %3176 = vmatprep.mubr.bf16.mxu0 %v7764_v54  ;;  %3249 = vmatprep.mubr.bf16.mxu1 %v7764_v54 }
 0x321   : > { %2501 = vadd.xlane.f32.xlu0 %v2500_v44  ;;  %v2583_v10 = vpack.c.bf16 %v5096_v45, %v5094_v35  ;;  %v2533_v5 = vsel %vm1895_vm1, %v5096_v45, 0.0  ;;  %v6890_v19 = vpop.permute.xlu0 %3445  ;;  %v2376_v35 = vld [vmem:[#allocation3] sm:$0xff]  ;;  %v2416_v45 = vmul.f32 %v6452_v47, %v2384_v53 }
 0x322   : > { %2504 = vadd.xlane.f32.xlu1 %v2503_v55  ;;  %v6898_v57 = vpop.permute.xlu1 %3450  ;;  %v2377_v55 = vld [vmem:[#allocation3 + $0x8] sm:$0xff] }
 0x325   : > { %2525 = vadd.xlane.f32.xlu0 %v2524_v22  ;;  %v6895_v40 = vpop.permute.xlu0 %3455 }
 0x326   : > { %2528 = vadd.xlane.f32.xlu1 %v2527_v23  ;;  %v6902_v39 = vpop.permute.xlu1 %3460 }
 0x327   : > { %4675 = vmatmul.mubr.msk.bf16.gmra.mrb[84].mxu0 %vm1895_vm1, %v2581_v58  ;;  %4679 = vmatmul.mubr.msk.bf16.gmra.mrb[84].mxu1 %vm1895_vm1, %v2581_v58 }
 0x328   : > { %3186 = vmatprep.mubr.bf16.mxu0 %v7764_v54  ;;  %3259 = vmatprep.mubr.bf16.mxu1 %v7764_v54 }
 0x329   : > { %2507 = vadd.xlane.f32.xlu0 %v2506_v4  ;;  %v6900_v18 = vpop.permute.xlu0 %3465  ;;  %v2385_v4 = vld [vmem:[#allocation3 + $0x48] sm:$0xff] }
 0x32a   : > { %2510 = vadd.xlane.f32.xlu1 %v2509_v31  ;;  %v6906_v37 = vpop.permute.xlu1 %3470 }
 0x32d   : > { %2531 = vadd.xlane.f32.xlu0 %v2530_v24  ;;  %v6904_v3 = vpop.permute.xlu0 %3475  ;;  %v2409_v24 = vmul.f32 %v6404_v28, %v2377_v55 }
 0x32e   : > { %2534 = vadd.xlane.f32.xlu1 %v2533_v5  ;;  %v6910_v59 = vpop.permute.xlu1 %3480 }
 0x32f   : > { %4676 = vmatmul.mubr.msk.bf16.gmra.mrb[88].mxu0 %vm1895_vm1, %v2582_v16  ;;  %4680 = vmatmul.mubr.msk.bf16.gmra.mrb[88].mxu1 %vm1895_vm1, %v2582_v16 }
 0x330   : > { %3196 = vmatprep.mubr.bf16.mxu0 %v7764_v54  ;;  %3269 = vmatprep.mubr.bf16.mxu1 %v7764_v54 }
 0x331   : > { %v6908_v54 = vpop.permute.xlu0 %3485 }
 0x332   : > { %v6914_v1 = vpop.permute.xlu1 %3490 }
 0x335   : > { %v6912_v9 = vpop.permute.xlu0 %3495 }
 0x336   : > { %v6918_v26 = vpop.permute.xlu1 %3500 }
 0x337   : > { %4677 = vmatmul.mubr.msk.bf16.gmra.mrb[92].mxu0 %vm1895_vm1, %v2583_v10  ;;  %4681 = vmatmul.mubr.msk.bf16.gmra.mrb[92].mxu1 %vm1895_vm1, %v2583_v10  ;;  %v2408_v10 = vmul.f32 %v6414_v42, %v2376_v35 }
 0x339   : > { %v6916_v0 = vpop.permute.xlu0 %3505 }
 0x33a   : > { %v6922_v12 = vpop.permute.xlu1 %3530 }
 0x33d   : > { %v6920_v29 = vpop.permute.xlu0 %3535 }
 0x33e   : > { %v6926_v52 = vpop.permute.xlu1 %3540 }
 0x341   : > { %v6924_v41 = vpop.permute.xlu0 %3545 }
 0x342   : > { %v6930_v6 = vpop.permute.xlu1 %3510 }
 0x345   : > { %v6928_v27 = vpop.permute.xlu0 %3515 }
 0x346   : > { %v6934_v58 = vpop.permute.xlu1 %3550 }
 0x349   : > { %v6932_v50 = vpop.permute.xlu0 %3555 }
 0x34a   : > { %7799 = vst [vmem:[#allocation18_spill] sm:$0xff] %v6932_v50  ;;  %v6938_v15 = vpop.permute.xlu1 %3520  ;;  %v2379_v50 = vld [vmem:[#allocation3 + $0x18] sm:$0xff] }
 0x34d   : > { %v6936_v51 = vpop.permute.xlu0 %3525 }
 0x34e   : > { %v6942_v16 = vpop.permute.xlu1 %3560 }
 0x34f   : > { %7801 = vst [vmem:[#allocation22_spill] sm:$0xff] %v6942_v16  ;;  %v2378_v16 = vld [vmem:[#allocation3 + $0x10] sm:$0xff] }
 0x350   : > { %v2410_v35 = vmul.f32 %v6416_v43, %v2378_v16 }
 0x351   : > { %v6940_v38 = vpop.permute.xlu0 %3565 }
 0x352   : > { %7800 = vst [vmem:[#allocation29_spill] sm:$0xff] %v6940_v38  ;;  %v2417_v38 = vmul.f32 %v6465_v17, %v2385_v4  ;;  %v2387_v17 = vld [vmem:[#allocation3 + $0x58] sm:$0xff] }
 0x353   : > { %v2419_v16 = vmul.f32 %v6473_v63, %v2387_v17 }
 0x37e   : > { %v2466_v44 = vpop.xlane.xlu0 %2465 }
 0x37f   : > { %v2544_v22 = vadd.f32 %v2466_v44, %v2416_v45  ;;  %v2442_v23 = vpop.xlane.xlu1 %2441  ;;  %v2411_v45 = vmul.f32 %v6426_v60, %v2379_v50  ;;  %v2386_v44 = vld [vmem:[#allocation3 + $0x50] sm:$0xff]  ;;  %v2381_v60 = vld [vmem:[#allocation3 + $0x28] sm:$0xff] }
 0x380   : > { %v2536_v31 = vadd.f32 %v2442_v23, %v2408_v10 }
 0x381   : > { %3865 = vst.msk [vmem:[#allocation3 + $0x40] sm:$0xff] %vm318_vm0, %v2544_v22 }
 0x382   : > { %3857 = vst.msk [vmem:[#allocation3] sm:$0xff] %vm318_vm0, %v2536_v31  ;;  %5097 = vrcp.f32 %v2536_v31  ;;  %v2445_v5 = vpop.xlane.xlu0 %2444 }
 0x383   : > { %v2537_v47 = vadd.f32 %v2445_v5, %v2409_v24  ;;  %v2469_v53 = vpop.xlane.xlu1 %2468 }
 0x384   : > { %v2545_v42 = vadd.f32 %v2469_v53, %v2417_v38  ;;  %v2418_v38 = vmul.f32 %v6467_v36, %v2386_v44  ;;  %v2389_v44 = vld [vmem:[#allocation3 + $0x68] sm:$0xff] }
 0x385   : > { %3858 = vst.msk [vmem:[#allocation3 + $0x8] sm:$0xff] %vm318_vm0, %v2537_v47  ;;  %5099 = vrcp.f32 %v2537_v47  ;;  %v2413_v47 = vmul.f32 %v6438_v20, %v2381_v60 }
 0x386   : > { %5101 = vrcp.f32 %v2544_v22  ;;  %3866 = vst.msk [vmem:[#allocation3 + $0x48] sm:$0xff] %vm318_vm0, %v2545_v42  ;;  %v2448_v28 = vpop.xlane.xlu0 %2447  ;;  %v2380_v22 = vld [vmem:[#allocation3 + $0x20] sm:$0xff] }
 0x387   : > { %v2538_v10 = vadd.f32 %v2448_v28, %v2410_v35  ;;  %v2451_v55 = vpop.xlane.xlu1 %2450  ;;  %5103 = vrcp.f32 %v2545_v42  ;;  %v2412_v5 = vmul.f32 %v6428_v46, %v2380_v22  ;;  %v2388_v35 = vld [vmem:[#allocation3 + $0x60] sm:$0xff]  ;;  %v3568_v46 = vmul.f32 0.0, %v6855_v30 }
 0x388   : > { %v2539_v23 = vadd.f32 %v2451_v55, %v2411_v45  ;;  %v2420_v17 = vmul.f32 %v6475_v14, %v2388_v35 }
 0x389   : > { %3859 = vst.msk [vmem:[#allocation3 + $0x10] sm:$0xff] %vm318_vm0, %v2538_v10  ;;  %5105 = vrcp.f32 %v2538_v10 }
 0x38a   : > { %3860 = vst.msk [vmem:[#allocation3 + $0x18] sm:$0xff] %vm318_vm0, %v2539_v23  ;;  %v2472_v43 = vpop.xlane.xlu0 %2471  ;;  %5107 = vrcp.f32 %v2539_v23 }
 0x38b   : > { %v2546_v4 = vadd.f32 %v2472_v43, %v2418_v38  ;;  %v2475_v31 = vpop.xlane.xlu1 %2474 }
 0x38c   : > { %v5098_v50 = vpop.eup %5097  ;;  %v2547_v24 = vadd.f32 %v2475_v31, %v2419_v16  ;;  %v2382_v31 = vld [vmem:[#allocation3 + $0x30] sm:$0xff] }
 0x38d   : > { %3867 = vst.msk [vmem:[#allocation3 + $0x50] sm:$0xff] %vm318_vm0, %v2546_v4  ;;  %5109 = vrcp.f32 %v2546_v4  ;;  %4058 = vperm.xlu1 %4968, %v5098_v50   ;;  %v2421_v4 = vmul.f32 %v6485_v56, %v2389_v44 }
 0x38e   : > { %3868 = vst.msk [vmem:[#allocation3 + $0x58] sm:$0xff] %vm318_vm0, %v2547_v24  ;;  %v2454_v36 = vpop.xlane.xlu0 %2453  ;;  %5111 = vrcp.f32 %v2547_v24 }
 0x38f   : > { %v5100_v53 = vpop.eup %5099  ;;  %v2540_v63 = vadd.f32 %v2454_v36, %v2412_v5  ;;  %v2457_v42 = vpop.xlane.xlu1 %2456  ;;  %v3572_v5 = vmul.f32 0.0, %v6861_v62  ;;  %v2383_v36 = vld [vmem:[#allocation3 + $0x38] sm:$0xff]  ;;  %v2414_v62 = vmul.f32 %v6440_v21, %v2382_v31  ;;  %v3576_v21 = vmul.f32 0.0, %v6870_v33  ;;  %v2392_v33 = vld [vmem:[#allocation3 + $0x80] sm:$0xff] }
 0x390   : > { %v5102_v28 = vpop.eup %5101  ;;  %v2541_v45 = vadd.f32 %v2457_v42, %v2413_v47  ;;  %4063 = vperm.xlu0 %4967, %v5100_v53  }
 0x391   : > { %3861 = vst.msk [vmem:[#allocation3 + $0x20] sm:$0xff] %vm318_vm0, %v2540_v63  ;;  %5113 = vrcp.f32 %v2540_v63  ;;  %4098 = vperm.xlu1 %4968, %v5102_v28   ;;  %v5104_v10 = vpop.eup %5103 }
 0x392   : > { %3862 = vst.msk [vmem:[#allocation3 + $0x28] sm:$0xff] %vm318_vm0, %v2541_v45  ;;  %v2694_v55 = vpop.f32.mrb[32].mxu0  ;;  %v2767_v20 = vpop.f32.mrb[32].mxu1  ;;  %5115 = vrcp.f32 %v2541_v45 }
 0x393   : > { %v5106_v23 = vpop.eup %5105  ;;  %v6966_v38 = vadd.f32 %v3568_v46, %v2694_v55  ;;  %v6968_v43 = vadd.f32 %v3568_v46, %v2767_v20  ;;  %v2478_v16 = vpop.xlane.xlu0 %2477  ;;  %v2415_v20 = vmul.f32 %v6454_v2, %v2383_v36 }
 0x394   : > { %v2696_v22 = vpop.f32.mrb[33].mxu0  ;;  %v2548_v60 = vadd.f32 %v2478_v16, %v2420_v17  ;;  %v2769_v30 = vpop.f32.mrb[33].mxu1  ;;  %4103 = vperm.xlu0 %4967, %v5104_v10   ;;  %v2390_v17 = vld [vmem:[#allocation3 + $0x70] sm:$0xff] }
 0x395   : > { %v6971_v50 = vadd.f32 %v3568_v46, %v2696_v22  ;;  %v2481_v24 = vpop.xlane.xlu1 %2480  ;;  %v6974_v14 = vadd.f32 %v3568_v46, %v2769_v30  ;;  %v2698_v53 = vpop.f32.mrb[34].mxu0  ;;  %4068 = vperm.xlu1 %4968, %v5106_v23   ;;  %v2391_v22 = vld [vmem:[#allocation3 + $0x78] sm:$0xff] }
 0x396   : > { %v2549_v47 = vadd.f32 %v2481_v24, %v2421_v4  ;;  %v2771_v63 = vpop.f32.mrb[34].mxu1  ;;  %v5108_v42 = vpop.eup %5107  ;;  %3869 = vst.msk [vmem:[#allocation3 + $0x60] sm:$0xff] %vm318_vm0, %v2548_v60  ;;  %5117 = vrcp.f32 %v2548_v60  ;;  %v6977_v56 = vadd.f32 %v3572_v5, %v2698_v53  ;;  %v2422_v24 = vmul.f32 %v6490_v34, %v2390_v17  ;;  %v2393_v34 = vld [vmem:[#allocation3 + $0x88] sm:$0xff] }
 0x397   : > { %v6979_v35 = vadd.f32 %v3572_v5, %v2771_v63  ;;  %v2700_v28 = vpop.f32.mrb[35].mxu0  ;;  %v2773_v44 = vpop.f32.mrb[35].mxu1  ;;  %v2423_v63 = vmul.f32 %v6499_v11, %v2391_v22 }
 0x398   : > { %v5110_v10 = vpop.eup %5109  ;;  %3870 = vst.msk [vmem:[#allocation3 + $0x68] sm:$0xff] %vm318_vm0, %v2549_v47  ;;  %v6983_v45 = vadd.f32 %v3572_v5, %v2700_v28  ;;  %v6985_v46 = vadd.f32 %v3572_v5, %v2773_v44  ;;  %v2460_v55 = vpop.xlane.xlu0 %2459  ;;  %4073 = vperm.xlu0 %4967, %v5108_v42   ;;  %5119 = vrcp.f32 %v2549_v47 }
 0x399   : > { %v2542_v23 = vadd.f32 %v2460_v55, %v2414_v62  ;;  %v2463_v16 = vpop.xlane.xlu1 %2462  ;;  %4108 = vperm.xlu1 %4968, %v5110_v10   ;;  %v5112_v31 = vpop.eup %5111  ;;  %v3580_v10 = vmul.f32 0.0, %v6867_v25  ;;  %v2424_v25 = vmul.f32 %v6503_v13, %v2392_v33  ;;  %v3584_v13 = vmul.f32 0.0, %v6883_v7 }
 0x39a   : > { %v2543_v4 = vadd.f32 %v2463_v16, %v2415_v20  ;;  %v2704_v60 = vpop.f32.mrb[36].mxu0  ;;  %v2777_v30 = vpop.f32.mrb[36].mxu1 }
 0x39b   : > { %3863 = vst.msk [vmem:[#allocation3 + $0x30] sm:$0xff] %vm318_vm0, %v2542_v23  ;;  %5121 = vrcp.f32 %v2542_v23  ;;  %v5114_v5 = vpop.eup %5113  ;;  %v6992_v2 = vadd.f32 %v3576_v21, %v2704_v60  ;;  %v6994_v36 = vadd.f32 %v3576_v21, %v2777_v30  ;;  %v2706_v53 = vpop.f32.mrb[37].mxu0 }
 0x39c   : > { %3864 = vst.msk [vmem:[#allocation3 + $0x38] sm:$0xff] %vm318_vm0, %v2543_v4  ;;  %v2484_v47 = vpop.xlane.xlu0 %2483  ;;  %v6997_v28 = vadd.f32 %v3576_v21, %v2706_v53  ;;  %v2779_v44 = vpop.f32.mrb[37].mxu1  ;;  %4113 = vperm.xlu0 %4967, %v5112_v31   ;;  %5123 = vrcp.f32 %v2543_v4 }
 0x39d   : > { %v2550_v42 = vadd.f32 %v2484_v47, %v2422_v24  ;;  %v2487_v62 = vpop.xlane.xlu1 %2486  ;;  %v7000_v55 = vadd.f32 %v3576_v21, %v2779_v44  ;;  %v2708_v17 = vpop.f32.mrb[38].mxu0  ;;  %4078 = vperm.xlu1 %4968, %v5114_v5   ;;  %v2425_v24 = vmul.f32 %v6510_v61, %v2393_v34  ;;  %v2400_v5 = vld [vmem:[#allocation3 + $0xc0] sm:$0xff] }
 0x39e   : > { %v2551_v20 = vadd.f32 %v2487_v62, %v2423_v63  ;;  %v2781_v23 = vpop.f32.mrb[38].mxu1  ;;  %v7003_v11 = vadd.f32 %v3580_v10, %v2708_v17  ;;  %v2710_v22 = vpop.f32.mrb[39].mxu0 }
 0x39f   : > { %3871 = vst.msk [vmem:[#allocation3 + $0x70] sm:$0xff] %vm318_vm0, %v2550_v42  ;;  %5125 = vrcp.f32 %v2550_v42  ;;  %v7005_v16 = vadd.f32 %v3580_v10, %v2781_v23  ;;  %v2783_v60 = vpop.f32.mrb[39].mxu1  ;;  %v5116_v31 = vpop.eup %5115  ;;  %v7009_v4 = vadd.f32 %v3580_v10, %v2710_v22  ;;  %v2401_v42 = vld [vmem:[#allocation3 + $0xc8] sm:$0xff] }
 0x3a0   : > { %3872 = vst.msk [vmem:[#allocation3 + $0x78] sm:$0xff] %vm318_vm0, %v2551_v20  ;;  %v7011_v21 = vadd.f32 %v3580_v10, %v2783_v60  ;;  %v2490_v30 = vpop.xlane.xlu0 %2489  ;;  %v5118_v47 = vpop.eup %5117  ;;  %4083 = vperm.xlu0 %4967, %v5116_v31   ;;  %5127 = vrcp.f32 %v2551_v20  ;;  %v2432_v10 = vmul.f32 %v6521_v49, %v2400_v5  ;;  %v2433_v22 = vmul.f32 %v6528_v8, %v2401_v42  ;;  %v2394_v60 = vld [vmem:[#allocation3 + $0x90] sm:$0xff]  ;;  %v2395_v5 = vld [vmem:[#allocation3 + $0x98] sm:$0xff] }
 0x3a1   : > { %v2552_v53 = vadd.f32 %v2490_v30, %v2424_v25  ;;  %v2493_v63 = vpop.xlane.xlu1 %2492  ;;  %4118 = vperm.xlu1 %4968, %v5118_v47   ;;  %v3588_v49 = vmul.f32 0.0, %v6880_v32 }
 0x3a2   : > { %v2553_v44 = vadd.f32 %v2493_v63, %v2425_v24  ;;  %v2714_v33 = vpop.f32.mrb[40].mxu0  ;;  %v2787_v62 = vpop.f32.mrb[40].mxu1 }
 0x3a3   : > { %3873 = vst.msk [vmem:[#allocation3 + $0x80] sm:$0xff] %vm318_vm0, %v2552_v53  ;;  %5129 = vrcp.f32 %v2552_v53  ;;  %v5120_v17 = vpop.eup %5119  ;;  %v7018_v61 = vadd.f32 %v3584_v13, %v2714_v33  ;;  %v7020_v34 = vadd.f32 %v3584_v13, %v2787_v62  ;;  %v2716_v20 = vpop.f32.mrb[41].mxu0 }
 0x3a4   : > { %3874 = vst.msk [vmem:[#allocation3 + $0x88] sm:$0xff] %vm318_vm0, %v2553_v44  ;;  %v2514_v23 = vpop.xlane.xlu0 %2513  ;;  %v7023_v31 = vadd.f32 %v3584_v13, %v2716_v20  ;;  %v2789_v30 = vpop.f32.mrb[41].mxu1  ;;  %4123 = vperm.xlu0 %4967, %v5120_v17   ;;  %5131 = vrcp.f32 %v2553_v44 }
 0x3a5   : > { %7802 = vst [vmem:[#allocation17_spill] sm:$0xff] %v7018_v61  ;;  %7803 = vst [vmem:[#allocation26_spill] sm:$0xff] %v7020_v34  ;;  %v5122_v7 = vpop.eup %5121  ;;  %v2560_v25 = vadd.f32 %v2514_v23, %v2432_v10  ;;  %v2517_v24 = vpop.xlane.xlu1 %2516  ;;  %v7026_v47 = vadd.f32 %v3584_v13, %v2789_v30  ;;  %v7808_v23 = vld [vmem:[#allocation19_spill] sm:$0xff] }
 0x3a6   : > { %7804 = vst [vmem:[#allocation20_spill] sm:$0xff] %v7023_v31  ;;  %v2561_v53 = vadd.f32 %v2517_v24, %v2433_v22  ;;  %v2718_v63 = vpop.f32.mrb[42].mxu0  ;;  %v2791_v33 = vpop.f32.mrb[42].mxu1  ;;  %4088 = vperm.xlu1 %4968, %v5122_v7   ;;  %v2426_v32 = vmul.f32 %v7808_v23, %v2394_v60  ;;  %v7811_v22 = vld [vmem:[#allocation48_spill] sm:$0xff]  ;;  %v2402_v30 = vld [vmem:[#allocation3 + $0xd0] sm:$0xff]  ;;  %v3592_v60 = vmul.f32 0.0, %v6892_v48 }
 0x3a7   : > { %7805 = vst [vmem:[#allocation30_spill] sm:$0xff] %v7026_v47  ;;  %3881 = vst.msk [vmem:[#allocation3 + $0xc0] sm:$0xff] %vm318_vm0, %v2560_v25  ;;  %5133 = vrcp.f32 %v2560_v25  ;;  %v7029_v8 = vadd.f32 %v3588_v49, %v2718_v63  ;;  %v7031_v42 = vadd.f32 %v3588_v49, %v2791_v33  ;;  %v2720_v62 = vpop.f32.mrb[43].mxu0  ;;  %v2793_v10 = vpop.f32.mrb[43].mxu1  ;;  %v2427_v7 = vmul.f32 %v7811_v22, %v2395_v5  ;;  %v2403_v33 = vld [vmem:[#allocation3 + $0xd8] sm:$0xff] }
 0x3a8   : > { %v5124_v17 = vpop.eup %5123  ;;  %3882 = vst.msk [vmem:[#allocation3 + $0xc8] sm:$0xff] %vm318_vm0, %v2561_v53  ;;  %v7035_v44 = vadd.f32 %v3588_v49, %v2720_v62  ;;  %v7037_v13 = vadd.f32 %v3588_v49, %v2793_v10  ;;  %v2496_v20 = vpop.xlane.xlu0 %2495  ;;  %5135 = vrcp.f32 %v2561_v53  ;;  %v7812_v10 = vld [vmem:[#allocation47_spill] sm:$0xff]  ;;  %v3612_v31 = vmul.f32 0.0, %v6900_v18 }
 0x3a9   : > { %7806 = vst [vmem:[#allocation24_spill] sm:$0xff] %v7029_v8  ;;  %7807 = vst [vmem:[#allocation28_spill] sm:$0xff] %v7031_v42  ;;  %v5126_v25 = vpop.eup %5125  ;;  %v2554_v24 = vadd.f32 %v2496_v20, %v2426_v32  ;;  %v2499_v63 = vpop.xlane.xlu1 %2498  ;;  %4093 = vperm.xlu0 %4967, %v5124_v17   ;;  %v2434_v23 = vmul.f32 %v7812_v10, %v2402_v30  ;;  %v7815_v20 = vld [vmem:[#allocation49_spill] sm:$0xff]  ;;  %v3596_v30 = vmul.f32 0.0, %v6890_v19  ;;  %v2397_v10 = vld [vmem:[#allocation3 + $0xa8] sm:$0xff] }
 0x3aa   : > { %7809 = vst [vmem:[#allocation31_spill] sm:$0xff] %v7035_v44  ;;  %7810 = vst [vmem:[#allocation33_spill] sm:$0xff] %v7037_v13  ;;  %v2555_v42 = vadd.f32 %v2499_v63, %v2427_v7  ;;  %4128 = vperm.xlu1 %4968, %v5126_v25   ;;  %v2724_v62 = vpop.f32.mrb[44].mxu0  ;;  %v2797_v49 = vpop.f32.mrb[44].mxu1  ;;  %v2435_v22 = vmul.f32 %v7815_v20, %v2403_v33  ;;  %v2396_v7 = vld [vmem:[#allocation3 + $0xa0] sm:$0xff] }
 0x3ab   : > { %3875 = vst.msk [vmem:[#allocation3 + $0x90] sm:$0xff] %vm318_vm0, %v2554_v24  ;;  %5137 = vrcp.f32 %v2554_v24  ;;  %v5128_v13 = vpop.eup %5127  ;;  %v7044_v5 = vadd.f32 %v3592_v60, %v2724_v62  ;;  %v7046_v32 = vadd.f32 %v3592_v60, %v2797_v49  ;;  %v2726_v53 = vpop.f32.mrb[45].mxu0  ;;  %v7820_v20 = vld [vmem:[#allocation21_spill] sm:$0xff] }
 0x3ac   : > { %3876 = vst.msk [vmem:[#allocation3 + $0x98] sm:$0xff] %vm318_vm0, %v2555_v42  ;;  %v2520_v17 = vpop.xlane.xlu0 %2519  ;;  %v7049_v63 = vadd.f32 %v3592_v60, %v2726_v53  ;;  %v2799_v24 = vpop.f32.mrb[45].mxu1  ;;  %5139 = vrcp.f32 %v2555_v42  ;;  %v2428_v19 = vmul.f32 %v7820_v20, %v2396_v7  ;;  %v3600_v7 = vmul.f32 0.0, %v6898_v57 }
 0x3ad   : > { %7813 = vst [vmem:[#allocation35_spill] sm:$0xff] %v7044_v5  ;;  %7814 = vst [vmem:[#allocation37_spill] sm:$0xff] %v7046_v32  ;;  %v5130_v48 = vpop.eup %5129  ;;  %v2562_v25 = vadd.f32 %v2520_v17, %v2434_v23  ;;  %v2523_v44 = vpop.xlane.xlu1 %2522  ;;  %4133 = vperm.xlu0 %4967, %v5128_v13   ;;  %v7052_v62 = vadd.f32 %v3592_v60, %v2799_v24  ;;  %v2404_v24 = vld [vmem:[#allocation3 + $0xe0] sm:$0xff] }
 0x3ae   : > { %7816 = vst [vmem:[#allocation39_spill] sm:$0xff] %v7049_v63  ;;  %v2563_v49 = vadd.f32 %v2523_v44, %v2435_v22  ;;  %v2728_v32 = vpop.f32.mrb[46].mxu0  ;;  %v2801_v5 = vpop.f32.mrb[46].mxu1  ;;  %4138 = vperm.xlu1 %4968, %v5130_v48   ;;  %v7823_v22 = vld [vmem:[#allocation50_spill] sm:$0xff] }
 0x3af   : > { %7817 = vst [vmem:[#allocation41_spill] sm:$0xff] %v7052_v62  ;;  %3883 = vst.msk [vmem:[#allocation3 + $0xd0] sm:$0xff] %vm318_vm0, %v2562_v25  ;;  %5141 = vrcp.f32 %v2562_v25  ;;  %v7055_v33 = vadd.f32 %v3596_v30, %v2728_v32  ;;  %v7057_v23 = vadd.f32 %v3596_v30, %v2801_v5  ;;  %v2730_v17 = vpop.f32.mrb[47].mxu0  ;;  %v2803_v53 = vpop.f32.mrb[47].mxu1  ;;  %v2429_v48 = vmul.f32 %v7823_v22, %v2397_v10  ;;  %v2405_v5 = vld [vmem:[#allocation3 + $0xe8] sm:$0xff]  ;;  %v2398_v22 = vld [vmem:[#allocation3 + $0xb0] sm:$0xff] }
 0x3b0   : > { %v5132_v13 = vpop.eup %5131  ;;  %3884 = vst.msk [vmem:[#allocation3 + $0xd8] sm:$0xff] %vm318_vm0, %v2563_v49  ;;  %v7061_v42 = vadd.f32 %v3596_v30, %v2730_v17  ;;  %v7063_v44 = vadd.f32 %v3596_v30, %v2803_v53  ;;  %v2502_v60 = vpop.xlane.xlu0 %2501  ;;  %5143 = vrcp.f32 %v2563_v49  ;;  %v7824_v53 = vld [vmem:[#allocation51_spill] sm:$0xff] }
 0x3b1   : > { %7818 = vst [vmem:[#allocation43_spill] sm:$0xff] %v7055_v33  ;;  %7819 = vst [vmem:[#allocation32_spill] sm:$0xff] %v7057_v23  ;;  %v5134_v25 = vpop.eup %5133  ;;  %v2556_v32 = vadd.f32 %v2502_v60, %v2428_v19  ;;  %v2505_v33 = vpop.xlane.xlu1 %2504  ;;  %4143 = vperm.xlu0 %4967, %v5132_v13   ;;  %v2436_v20 = vmul.f32 %v7824_v53, %v2404_v24  ;;  %v3604_v24 = vmul.f32 0.0, %v6895_v40  ;;  %v2399_v53 = vld [vmem:[#allocation3 + $0xb8] sm:$0xff] }
 0x3b2   : > { %7821 = vst [vmem:[#allocation45_spill] sm:$0xff] %v7061_v42  ;;  %7822 = vst [vmem:[#allocation36_spill] sm:$0xff] %v7063_v44  ;;  %v2557_v23 = vadd.f32 %v2505_v33, %v2429_v48  ;;  %4178 = vperm.xlu1 %4968, %v5134_v25   ;;  %v2852_v17 = vpop.f32.mrb[48].mxu0  ;;  %v2925_v30 = vpop.f32.mrb[48].mxu1  ;;  %v7825_v33 = vld [vmem:[#allocation52_spill] sm:$0xff] }
 0x3b3   : > { %3877 = vst.msk [vmem:[#allocation3 + $0xa0] sm:$0xff] %vm318_vm0, %v2556_v32  ;;  %5145 = vrcp.f32 %v2556_v32  ;;  %v5136_v44 = vpop.eup %5135  ;;  %v7070_v10 = vadd.f32 %v3600_v7, %v2852_v17  ;;  %v7072_v19 = vadd.f32 %v3600_v7, %v2925_v30  ;;  %v2854_v49 = vpop.f32.mrb[49].mxu0  ;;  %v2437_v60 = vmul.f32 %v7825_v33, %v2405_v5  ;;  %v7826_v33 = vld [vmem:[#allocation23_spill] sm:$0xff] }
 0x3b4   : > { %3878 = vst.msk [vmem:[#allocation3 + $0xa8] sm:$0xff] %vm318_vm0, %v2557_v23  ;;  %v2526_v13 = vpop.xlane.xlu0 %2525  ;;  %v7075_v25 = vadd.f32 %v3600_v7, %v2854_v49  ;;  %v2927_v32 = vpop.f32.mrb[49].mxu1  ;;  %5147 = vrcp.f32 %v2557_v23  ;;  %v2430_v40 = vmul.f32 %v7826_v33, %v2398_v22  ;;  %v3608_v22 = vmul.f32 0.0, %v6902_v39 }
 0x3b5   : > { %v5138_v57 = vpop.eup %5137  ;;  %v2564_v48 = vadd.f32 %v2526_v13, %v2436_v20  ;;  %v2529_v42 = vpop.xlane.xlu1 %2528  ;;  %4183 = vperm.xlu0 %4967, %v5136_v44   ;;  %v7078_v17 = vadd.f32 %v3600_v7, %v2927_v32  ;;  %v2406_v32 = vld [vmem:[#allocation3 + $0xf0] sm:$0xff] }
 0x3b6   : > { %v2565_v30 = vadd.f32 %v2529_v42, %v2437_v60  ;;  %v2856_v62 = vpop.f32.mrb[50].mxu0  ;;  %v2929_v63 = vpop.f32.mrb[50].mxu1  ;;  %4148 = vperm.xlu1 %4968, %v5138_v57   ;;  %v7827_v60 = vld [vmem:[#allocation25_spill] sm:$0xff] }
 0x3b7   : > { %3885 = vst.msk [vmem:[#allocation3 + $0xe0] sm:$0xff] %vm318_vm0, %v2564_v48  ;;  %5149 = vrcp.f32 %v2564_v48  ;;  %v7081_v5 = vadd.f32 %v3604_v24, %v2856_v62  ;;  %v7083_v20 = vadd.f32 %v3604_v24, %v2929_v63  ;;  %v2858_v13 = vpop.f32.mrb[51].mxu0  ;;  %v2931_v49 = vpop.f32.mrb[51].mxu1  ;;  %v2431_v57 = vmul.f32 %v7827_v60, %v2399_v53  ;;  %v2407_v63 = vld [vmem:[#allocation3 + $0xf8] sm:$0xff] }
 0x3b8   : > { %v5140_v44 = vpop.eup %5139  ;;  %3886 = vst.msk [vmem:[#allocation3 + $0xe8] sm:$0xff] %vm318_vm0, %v2565_v30  ;;  %v7087_v23 = vadd.f32 %v3604_v24, %v2858_v13  ;;  %v7089_v42 = vadd.f32 %v3604_v24, %v2931_v49  ;;  %v2508_v7 = vpop.xlane.xlu0 %2507  ;;  %5151 = vrcp.f32 %v2565_v30  ;;  %v7828_v49 = vld [vmem:[#allocation53_spill] sm:$0xff] }
 0x3b9   : > { %v5142_v48 = vpop.eup %5141  ;;  %v2558_v62 = vadd.f32 %v2508_v7, %v2430_v40  ;;  %v2511_v8 = vpop.xlane.xlu1 %2510  ;;  %4153 = vperm.xlu0 %4967, %v5140_v44   ;;  %v2438_v33 = vmul.f32 %v7828_v49, %v2406_v32 }
 0x3ba   : > { %v2559_v47 = vadd.f32 %v2511_v8, %v2431_v57  ;;  %4188 = vperm.xlu1 %4968, %v5142_v48   ;;  %v2862_v13 = vpop.f32.mrb[52].mxu0  ;;  %v2935_v24 = vpop.f32.mrb[52].mxu1  ;;  %v7829_v8 = vld [vmem:[#allocation27_spill] sm:$0xff] }
 0x3bb   : > { %3879 = vst.msk [vmem:[#allocation3 + $0xb0] sm:$0xff] %vm318_vm0, %v2558_v62  ;;  %5153 = vrcp.f32 %v2558_v62  ;;  %v5144_v34 = vpop.eup %5143  ;;  %v7096_v53 = vadd.f32 %v3608_v22, %v2862_v13  ;;  %v7098_v40 = vadd.f32 %v3608_v22, %v2935_v24  ;;  %v2864_v30 = vpop.f32.mrb[53].mxu0  ;;  %v2439_v7 = vmul.f32 %v7829_v8, %v2407_v63 }
 0x3bc   : > { %3880 = vst.msk [vmem:[#allocation3 + $0xb8] sm:$0xff] %vm318_vm0, %v2559_v47  ;;  %v2532_v44 = vpop.xlane.xlu0 %2531  ;;  %v7101_v57 = vadd.f32 %v3608_v22, %v2864_v30  ;;  %v2937_v48 = vpop.f32.mrb[53].mxu1  ;;  %5155 = vrcp.f32 %v2559_v47 }
 0x3bd   : > { %v5146_v60 = vpop.eup %5145  ;;  %v2566_v39 = vadd.f32 %v2532_v44, %v2438_v33  ;;  %v2535_v62 = vpop.xlane.xlu1 %2534  ;;  %4193 = vperm.xlu0 %4967, %v5144_v34   ;;  %v7104_v32 = vadd.f32 %v3608_v22, %v2937_v48  ;;  %v3616_v22 = vmul.f32 0.0, %v6906_v37 }
 0x3be   : > { %v2567_v13 = vadd.f32 %v2535_v62, %v2439_v7  ;;  %v2866_v49 = vpop.f32.mrb[54].mxu0  ;;  %v2939_v24 = vpop.f32.mrb[54].mxu1  ;;  %4158 = vperm.xlu1 %4968, %v5146_v60  }
 0x3bf   : > { %3887 = vst.msk [vmem:[#allocation3 + $0xf0] sm:$0xff] %vm318_vm0, %v2566_v39  ;;  %5157 = vrcp.f32 %v2566_v39  ;;  %v7107_v63 = vadd.f32 %v3612_v31, %v2866_v49  ;;  %v7109_v33 = vadd.f32 %v3612_v31, %v2939_v24  ;;  %v2868_v44 = vpop.f32.mrb[55].mxu0  ;;  %v2941_v30 = vpop.f32.mrb[55].mxu1 }
 0x3c0   : > { %v5148_v8 = vpop.eup %5147  ;;  %3888 = vst.msk [vmem:[#allocation3 + $0xf8] sm:$0xff] %vm318_vm0, %v2567_v13  ;;  %v7112_v18 = vadd.f32 %v3612_v31, %v2868_v44  ;;  %v7114_v34 = vadd.f32 %v3612_v31, %v2941_v30  ;;  %5159 = vrcp.f32 %v2567_v13  ;;  %v3620_v44 = vmul.f32 0.0, %v6904_v3 }
 0x3c1   : > { %v5150_v47 = vpop.eup %5149  ;;  %4163 = vperm.xlu0 %4967, %v5148_v8  }
 0x3c2   : > { %7830 = vst [vmem:[#allocation34_spill] sm:$0xff] %v7114_v34  ;;  %4198 = vperm.xlu1 %4968, %v5150_v47   ;;  %v2872_v7 = vpop.f32.mrb[56].mxu0  ;;  %v2945_v60 = vpop.f32.mrb[56].mxu1 }
 0x3c3   : > { %v5152_v39 = vpop.eup %5151  ;;  %v7117_v48 = vadd.f32 %v3616_v22, %v2872_v7  ;;  %v7119_v62 = vadd.f32 %v3616_v22, %v2945_v60  ;;  %v2874_v49 = vpop.f32.mrb[57].mxu0 }
 0x3c4   : > { %v2947_v24 = vpop.f32.mrb[57].mxu1  ;;  %v7122_v31 = vadd.f32 %v3616_v22, %v2874_v49  ;;  %v2876_v13 = vpop.f32.mrb[58].mxu0 }
 0x3c5   : > { %7831 = vst [vmem:[#allocation40_spill] sm:$0xff] %v7117_v48  ;;  %7832 = vst [vmem:[#allocation38_spill] sm:$0xff] %v7119_v62  ;;  %v5154_v61 = vpop.eup %5153  ;;  %v7124_v30 = vadd.f32 %v3616_v22, %v2947_v24  ;;  %v2949_v8 = vpop.f32.mrb[58].mxu1  ;;  %4203 = vperm.xlu0 %4967, %v5152_v39   ;;  %v7126_v37 = vadd.f32 %v3620_v44, %v2876_v13  ;;  %v3624_v22 = vmul.f32 0.0, %v6910_v59 }
 0x3c6   : > { %v7128_v47 = vadd.f32 %v3620_v44, %v2949_v8  ;;  %v2878_v7 = vpop.f32.mrb[59].mxu0  ;;  %v2951_v48 = vpop.f32.mrb[59].mxu1  ;;  %4168 = vperm.xlu1 %4968, %v5154_v61   ;;  %v3628_v61 = vmul.f32 0.0, %v6908_v54 }
 0x3c7   : > { %7833 = vst [vmem:[#allocation44_spill] sm:$0xff] %v7126_v37  ;;  %v7130_v60 = vadd.f32 %v3620_v44, %v2878_v7  ;;  %v7132_v62 = vadd.f32 %v3620_v44, %v2951_v48  ;;  %v5156_v3 = vpop.eup %5155 }
 0x3c8   : > { %7834 = vst [vmem:[#allocation42_spill] sm:$0xff] %v7128_v47 }
 0x3c9   : > { %7835 = vst [vmem:[#allocation46_spill] sm:$0xff] %v7132_v62  ;;  %v5158_v34 = vpop.eup %5157  ;;  %4173 = vperm.xlu0 %4967, %v5156_v3  }
 0x3ca   : > { %4208 = vperm.xlu1 %4968, %v5158_v34   ;;  %v2882_v49 = vpop.f32.mrb[60].mxu0  ;;  %v2955_v24 = vpop.f32.mrb[60].mxu1 }
 0x3cb   : > { %v5160_v39 = vpop.eup %5159  ;;  %v7135_v13 = vadd.f32 %v3624_v22, %v2882_v49  ;;  %v7137_v8 = vadd.f32 %v3624_v22, %v2955_v24  ;;  %v2884_v47 = vpop.f32.mrb[61].mxu0 }
 0x3cc   : > { %v2957_v37 = vpop.f32.mrb[61].mxu1  ;;  %v7140_v7 = vadd.f32 %v3624_v22, %v2884_v47  ;;  %v2886_v44 = vpop.f32.mrb[62].mxu0 }
 0x3cd   : > { %7836 = vst [vmem:[#allocation19_spill] sm:$0xff] %v7135_v13  ;;  %7837 = vst [vmem:[#allocation48_spill] sm:$0xff] %v7137_v8  ;;  %v7142_v48 = vadd.f32 %v3624_v22, %v2957_v37  ;;  %v2959_v3 = vpop.f32.mrb[62].mxu1  ;;  %4213 = vperm.xlu0 %4967, %v5160_v39   ;;  %v7144_v34 = vadd.f32 %v3628_v61, %v2886_v44  ;;  %v2888_v62 = vpop.f32.mrb[63].mxu0  ;;  %v3632_v8 = vmul.f32 0.0, %v6914_v1  ;;  %v3636_v44 = vmul.f32 0.0, %v6912_v9 }
 0x3ce   : > { %7838 = vst [vmem:[#allocation47_spill] sm:$0xff] %v7140_v7  ;;  %v7146_v59 = vadd.f32 %v3628_v61, %v2959_v3  ;;  %v2961_v49 = vpop.f32.mrb[63].mxu1  ;;  %v7148_v13 = vadd.f32 %v3628_v61, %v2888_v62 }
 0x3cf   : > { %v7150_v24 = vadd.f32 %v3628_v61, %v2961_v49 }
 0x3d0   : > { %7839 = vst [vmem:[#allocation49_spill] sm:$0xff] %v7146_v59  ;;  %7840 = vst [vmem:[#allocation21_spill] sm:$0xff] %v7148_v13 }
 0x3d1   : > { %7841 = vst [vmem:[#allocation50_spill] sm:$0xff] %v7150_v24 }
 0x3d2   : > { %v3010_v54 = vpop.f32.mrb[64].mxu0  ;;  %v3083_v47 = vpop.f32.mrb[64].mxu1 }
 0x3d3   : > { %v7153_v7 = vadd.f32 %v3632_v8, %v3010_v54  ;;  %v7155_v37 = vadd.f32 %v3632_v8, %v3083_v47  ;;  %v3012_v22 = vpop.f32.mrb[65].mxu0  ;;  %v3085_v39 = vpop.f32.mrb[65].mxu1 }
 0x3d4   : > { %v7158_v3 = vadd.f32 %v3632_v8, %v3012_v22  ;;  %v7160_v59 = vadd.f32 %v3632_v8, %v3085_v39  ;;  %v3014_v62 = vpop.f32.mrb[66].mxu0  ;;  %v3087_v13 = vpop.f32.mrb[66].mxu1 }
 0x3d5   : > { %7842 = vst [vmem:[#allocation51_spill] sm:$0xff] %v7153_v7  ;;  %7843 = vst [vmem:[#allocation52_spill] sm:$0xff] %v7155_v37  ;;  %v7162_v61 = vadd.f32 %v3636_v44, %v3014_v62  ;;  %v7164_v49 = vadd.f32 %v3636_v44, %v3087_v13  ;;  %v3016_v1 = vpop.f32.mrb[67].mxu0  ;;  %v3089_v24 = vpop.f32.mrb[67].mxu1  ;;  %v3640_v37 = vmul.f32 0.0, %v6918_v26  ;;  %v3644_v62 = vmul.f32 0.0, %v6916_v0 }
 0x3d6   : > { %7844 = vst [vmem:[#allocation23_spill] sm:$0xff] %v7160_v59  ;;  %v7166_v54 = vadd.f32 %v3636_v44, %v3016_v1  ;;  %v7168_v47 = vadd.f32 %v3636_v44, %v3089_v24 }
 0x3d7   : > { %7845 = vst [vmem:[#allocation25_spill] sm:$0xff] %v7164_v49 }
 0x3d8   : > { %7846 = vst [vmem:[#allocation53_spill] sm:$0xff] %v7166_v54  ;;  %7847 = vst [vmem:[#allocation27_spill] sm:$0xff] %v7168_v47 }
 0x3da   : > { %v3020_v7 = vpop.f32.mrb[68].mxu0  ;;  %v3093_v9 = vpop.f32.mrb[68].mxu1 }
 0x3db   : > { %v7171_v22 = vadd.f32 %v3640_v37, %v3020_v7  ;;  %v7173_v8 = vadd.f32 %v3640_v37, %v3093_v9  ;;  %v3022_v39 = vpop.f32.mrb[69].mxu0  ;;  %v3095_v59 = vpop.f32.mrb[69].mxu1 }
 0x3dc   : > { %v7176_v13 = vadd.f32 %v3640_v37, %v3022_v39  ;;  %v7178_v49 = vadd.f32 %v3640_v37, %v3095_v59  ;;  %v3024_v1 = vpop.f32.mrb[70].mxu0  ;;  %v3097_v54 = vpop.f32.mrb[70].mxu1 }
 0x3dd   : > { %7848 = vst [vmem:[#allocation54_spill] sm:$0xff] %v7171_v22  ;;  %7849 = vst [vmem:[#allocation55_spill] sm:$0xff] %v7173_v8  ;;  %v7180_v24 = vadd.f32 %v3644_v62, %v3024_v1  ;;  %v7182_v44 = vadd.f32 %v3644_v62, %v3097_v54  ;;  %v3026_v26 = vpop.f32.mrb[71].mxu0  ;;  %v3099_v47 = vpop.f32.mrb[71].mxu1  ;;  %v3648_v8 = vmul.f32 0.0, %v6930_v6  ;;  %v3652_v1 = vmul.f32 0.0, %v6928_v27 }
 0x3de   : > { %7850 = vst [vmem:[#allocation56_spill] sm:$0xff] %v7176_v13  ;;  %7851 = vst [vmem:[#allocation57_spill] sm:$0xff] %v7178_v49  ;;  %v7184_v7 = vadd.f32 %v3644_v62, %v3026_v26  ;;  %v7186_v9 = vadd.f32 %v3644_v62, %v3099_v47 }
 0x3df   : > { %7852 = vst [vmem:[#allocation58_spill] sm:$0xff] %v7180_v24  ;;  %7853 = vst [vmem:[#allocation59_spill] sm:$0xff] %v7182_v44 }
 0x3e0   : > { %7854 = vst [vmem:[#allocation60_spill] sm:$0xff] %v7184_v7  ;;  %7855 = vst [vmem:[#allocation61_spill] sm:$0xff] %v7186_v9 }
 0x3e2   : > { %v3030_v22 = vpop.f32.mrb[72].mxu0  ;;  %v3103_v0 = vpop.f32.mrb[72].mxu1 }
 0x3e3   : > { %v7189_v39 = vadd.f32 %v3648_v8, %v3030_v22  ;;  %v7191_v59 = vadd.f32 %v3648_v8, %v3103_v0  ;;  %v3032_v37 = vpop.f32.mrb[73].mxu0  ;;  %v3105_v49 = vpop.f32.mrb[73].mxu1 }
 0x3e4   : > { %v7194_v54 = vadd.f32 %v3648_v8, %v3032_v37  ;;  %v7196_v44 = vadd.f32 %v3648_v8, %v3105_v49  ;;  %v3034_v26 = vpop.f32.mrb[74].mxu0  ;;  %v3107_v7 = vpop.f32.mrb[74].mxu1  ;;  %v3660_v8 = vmul.f32 0.0, %v6936_v51  ;;  %v3664_v51 = vmul.f32 0.0, %v6922_v12 }
 0x3e5   : > { %7856 = vst [vmem:[#allocation62_spill] sm:$0xff] %v7189_v39  ;;  %7857 = vst [vmem:[#allocation63_spill] sm:$0xff] %v7191_v59  ;;  %v7198_v47 = vadd.f32 %v3652_v1, %v3034_v26  ;;  %v7200_v62 = vadd.f32 %v3652_v1, %v3107_v7  ;;  %v3036_v6 = vpop.f32.mrb[75].mxu0  ;;  %v3109_v9 = vpop.f32.mrb[75].mxu1  ;;  %v3656_v59 = vmul.f32 0.0, %v6938_v15 }
 0x3e6   : > { %7858 = vst [vmem:[#allocation64_spill] sm:$0xff] %v7194_v54  ;;  %7859 = vst [vmem:[#allocation65_spill] sm:$0xff] %v7196_v44  ;;  %v7202_v22 = vadd.f32 %v3652_v1, %v3036_v6  ;;  %v7204_v0 = vadd.f32 %v3652_v1, %v3109_v9 }
 0x3e7   : > { %7860 = vst [vmem:[#allocation66_spill] sm:$0xff] %v7198_v47  ;;  %7861 = vst [vmem:[#allocation67_spill] sm:$0xff] %v7200_v62 }
 0x3e8   : > { %7862 = vst [vmem:[#allocation68_spill] sm:$0xff] %v7202_v22  ;;  %7863 = vst [vmem:[#allocation69_spill] sm:$0xff] %v7204_v0 }
 0x3ea   : > { %v3040_v39 = vpop.f32.mrb[76].mxu0  ;;  %v3113_v37 = vpop.f32.mrb[76].mxu1 }
 0x3eb   : > { %v7207_v27 = vadd.f32 %v3656_v59, %v3040_v39  ;;  %v3042_v49 = vpop.f32.mrb[77].mxu0  ;;  %v7210_v44 = vadd.f32 %v3656_v59, %v3113_v37  ;;  %v3115_v7 = vpop.f32.mrb[77].mxu1 }
 0x3ec   : > { %v7212_v26 = vadd.f32 %v3656_v59, %v3042_v49  ;;  %v3044_v62 = vpop.f32.mrb[78].mxu0  ;;  %v7214_v47 = vadd.f32 %v3656_v59, %v3115_v7  ;;  %v3117_v9 = vpop.f32.mrb[78].mxu1  ;;  %v3668_v59 = vmul.f32 0.0, %v6920_v29  ;;  %v3672_v29 = vmul.f32 0.0, %v6926_v52 }
 0x3ed   : > { %7864 = vst [vmem:[#allocation70_spill] sm:$0xff] %v7207_v27  ;;  %7865 = vst [vmem:[#allocation71_spill] sm:$0xff] %v7210_v44  ;;  %v7216_v6 = vadd.f32 %v3660_v8, %v3044_v62  ;;  %v3046_v1 = vpop.f32.mrb[79].mxu0  ;;  %v7218_v15 = vadd.f32 %v3660_v8, %v3117_v9  ;;  %v3119_v27 = vpop.f32.mrb[79].mxu1 }
 0x3ee   : > { %7866 = vst [vmem:[#allocation72_spill] sm:$0xff] %v7212_v26  ;;  %7867 = vst [vmem:[#allocation73_spill] sm:$0xff] %v7214_v47  ;;  %v7220_v39 = vadd.f32 %v3660_v8, %v3046_v1  ;;  %v7222_v0 = vadd.f32 %v3660_v8, %v3119_v27 }
 0x3ef   : > { %7868 = vst [vmem:[#allocation74_spill] sm:$0xff] %v7216_v6  ;;  %7869 = vst [vmem:[#allocation75_spill] sm:$0xff] %v7218_v15 }
 0x3f0   : > { %7870 = vst [vmem:[#allocation76_spill] sm:$0xff] %v7220_v39  ;;  %7871 = vst [vmem:[#allocation77_spill] sm:$0xff] %v7222_v0 }
 0x3f2   : > { %v3168_v37 = vpop.f32.mrb[80].mxu0  ;;  %v3241_v44 = vpop.f32.mrb[80].mxu1 }
 0x3f3   : > { %v7225_v49 = vadd.f32 %v3664_v51, %v3168_v37  ;;  %v3170_v26 = vpop.f32.mrb[81].mxu0  ;;  %v7228_v62 = vadd.f32 %v3664_v51, %v3241_v44  ;;  %v3243_v9 = vpop.f32.mrb[81].mxu1 }
 0x3f4   : > { %v7230_v7 = vadd.f32 %v3664_v51, %v3170_v26  ;;  %v3172_v15 = vpop.f32.mrb[82].mxu0  ;;  %v7232_v1 = vadd.f32 %v3664_v51, %v3243_v9  ;;  %v3245_v27 = vpop.f32.mrb[82].mxu1  ;;  %v3676_v51 = vmul.f32 0.0, %v6924_v41  ;;  %v3680_v41 = vmul.f32 0.0, %v6934_v58 }
 0x3f5   : > { %v7234_v39 = vadd.f32 %v3668_v59, %v3172_v15  ;;  %v3174_v8 = vpop.f32.mrb[83].mxu0  ;;  %v7236_v12 = vadd.f32 %v3668_v59, %v3245_v27  ;;  %v3247_v0 = vpop.f32.mrb[83].mxu1 }
 0x3f6   : > { %v7238_v37 = vadd.f32 %v3668_v59, %v3174_v8  ;;  %v7240_v6 = vadd.f32 %v3668_v59, %v3247_v0 }
 0x3fa   : > { %v3178_v44 = vpop.f32.mrb[84].mxu0  ;;  %v3251_v47 = vpop.f32.mrb[84].mxu1 }
 0x3fb   : > { %v7243_v26 = vadd.f32 %v3672_v29, %v3178_v44  ;;  %v3180_v22 = vpop.f32.mrb[85].mxu0  ;;  %v7246_v15 = vadd.f32 %v3672_v29, %v3251_v47  ;;  %v3253_v27 = vpop.f32.mrb[85].mxu1 }
 0x3fc   : > { %v7248_v9 = vadd.f32 %v3672_v29, %v3180_v22  ;;  %v3182_v54 = vpop.f32.mrb[86].mxu0  ;;  %v7250_v8 = vadd.f32 %v3672_v29, %v3253_v27  ;;  %v3255_v0 = vpop.f32.mrb[86].mxu1  ;;  %v7881_v29 = vld [vmem:[#allocation18_spill] sm:$0xff] }
 0x3fd   : > { %7872 = vst [vmem:[#allocation78_spill] sm:$0xff] %v7243_v26  ;;  %7873 = vst [vmem:[#allocation79_spill] sm:$0xff] %v7246_v15  ;;  %v7252_v24 = vadd.f32 %v3676_v51, %v3182_v54  ;;  %v3184_v59 = vpop.f32.mrb[87].mxu0  ;;  %v7254_v52 = vadd.f32 %v3676_v51, %v3255_v0  ;;  %v3257_v26 = vpop.f32.mrb[87].mxu1  ;;  %v3684_v27 = vmul.f32 0.0, %v7881_v29  ;;  %v7887_v29 = vld [vmem:[#allocation22_spill] sm:$0xff] }
 0x3fe   : > { %7874 = vst [vmem:[#allocation80_spill] sm:$0xff] %v7248_v9  ;;  %7875 = vst [vmem:[#allocation81_spill] sm:$0xff] %v7250_v8  ;;  %v7256_v44 = vadd.f32 %v3676_v51, %v3184_v59  ;;  %v7258_v13 = vadd.f32 %v3676_v51, %v3257_v26 }
 0x3ff   : > { %7876 = vst [vmem:[#allocation82_spill] sm:$0xff] %v7252_v24  ;;  %7877 = vst [vmem:[#allocation83_spill] sm:$0xff] %v7254_v52 }
 0x400   : > { %7878 = vst [vmem:[#allocation84_spill] sm:$0xff] %v7256_v44  ;;  %7879 = vst [vmem:[#allocation85_spill] sm:$0xff] %v7258_v13 }
 0x402   : > { %v3188_v47 = vpop.f32.mrb[88].mxu0  ;;  %v3261_v15 = vpop.f32.mrb[88].mxu1 }
 0x403   : > { %v7261_v22 = vadd.f32 %v3680_v41, %v3188_v47  ;;  %v3190_v9 = vpop.f32.mrb[89].mxu0  ;;  %v7264_v54 = vadd.f32 %v3680_v41, %v3261_v15  ;;  %v3263_v0 = vpop.f32.mrb[89].mxu1  ;;  %v3688_v15 = vmul.f32 0.0, %v7887_v29 }
 0x404   : > { %v7266_v24 = vadd.f32 %v3680_v41, %v3190_v9  ;;  %v3192_v52 = vpop.f32.mrb[90].mxu0  ;;  %v7268_v59 = vadd.f32 %v3680_v41, %v3263_v0  ;;  %v3265_v26 = vpop.f32.mrb[90].mxu1  ;;  %v7889_v41 = vld [vmem:[#allocation29_spill] sm:$0xff] }
 0x405   : > { %7880 = vst [vmem:[#allocation86_spill] sm:$0xff] %v7261_v22  ;;  %7882 = vst [vmem:[#allocation18_spill] sm:$0xff] %v7264_v54  ;;  %v7270_v44 = vadd.f32 %v3684_v27, %v3192_v52  ;;  %v3194_v51 = vpop.f32.mrb[91].mxu0  ;;  %v7272_v58 = vadd.f32 %v3684_v27, %v3265_v26  ;;  %v3267_v22 = vpop.f32.mrb[91].mxu1  ;;  %v3692_v0 = vmul.f32 0.0, %v7889_v41 }
 0x406   : > { %7883 = vst [vmem:[#allocation87_spill] sm:$0xff] %v7266_v24  ;;  %v7274_v47 = vadd.f32 %v3684_v27, %v3194_v51  ;;  %v7276_v13 = vadd.f32 %v3684_v27, %v3267_v22 }
 0x407   : > { %7884 = vst [vmem:[#allocation88_spill] sm:$0xff] %v7270_v44  ;;  %7885 = vst [vmem:[#allocation89_spill] sm:$0xff] %v7272_v58 }
 0x408   : > { %7886 = vst [vmem:[#allocation90_spill] sm:$0xff] %v7276_v13 }
 0x40a   : > { %v3198_v54 = vpop.f32.mrb[92].mxu0  ;;  %v3271_v24 = vpop.f32.mrb[92].mxu1 }
 0x40b   : > { %v7279_v9 = vadd.f32 %v3688_v15, %v3198_v54  ;;  %v3200_v8 = vpop.f32.mrb[93].mxu0  ;;  %v7282_v52 = vadd.f32 %v3688_v15, %v3271_v24  ;;  %v3273_v26 = vpop.f32.mrb[93].mxu1 }
 0x40c   : > { %v7284_v44 = vadd.f32 %v3688_v15, %v3200_v8  ;;  %v3202_v51 = vpop.f32.mrb[94].mxu0  ;;  %v7286_v58 = vadd.f32 %v3688_v15, %v3273_v26  ;;  %v3275_v27 = vpop.f32.mrb[94].mxu1 }
 0x40d   : > { %7888 = vst [vmem:[#allocation22_spill] sm:$0xff] %v7279_v9  ;;  %7890 = vst [vmem:[#allocation29_spill] sm:$0xff] %v7282_v52  ;;  %v7288_v22 = vadd.f32 %v3692_v0, %v3202_v51  ;;  %v4059_v29 = vpop.permute.xlu1 %4058  ;;  %v7290_v13 = vadd.f32 %v3692_v0, %v3275_v27  ;;  %v3204_v41 = vpop.f32.mrb[95].mxu0 }
 0x40e   : > { %7891 = vst [vmem:[#allocation91_spill] sm:$0xff] %v7284_v44  ;;  %v4216_v54 = vmul.f32 %v4059_v29, %v6966_v38  ;;  %v4217_v9 = vmul.f32 %v4059_v29, %v6971_v50  ;;  %v4218_v24 = vmul.f32 %v4059_v29, %v6968_v43  ;;  %v3277_v8 = vpop.f32.mrb[95].mxu1  ;;  %v4219_v52 = vmul.f32 %v4059_v29, %v6974_v14 }
 0x40f   : > { %v7296_v44 = vadd.f32 %v3692_v0, %v3204_v41  ;;  %v7298_v15 = vadd.f32 %v3692_v0, %v3277_v8  ;;  %v4064_v26 = vpop.permute.xlu0 %4063 }
 0x410   : > { %4344 = vst [vmem:[%s7301_s24] sm:$0xff] %v4216_v54  ;;  %4345 = vst [vmem:[%s7301_s24 + $0x8] sm:$0xff] %v4217_v9  ;;  %v4220_v38 = vmul.f32 %v4064_v26, %v6977_v56  ;;  %v4221_v43 = vmul.f32 %v4064_v26, %v6983_v45  ;;  %v4222_v50 = vmul.f32 %v4064_v26, %v6979_v35 }
 0x411   : > { %4346 = vst [vmem:[%s7301_s24 + $0x10] sm:$0xff] %v4218_v24  ;;  %v4223_v14 = vmul.f32 %v4064_v26, %v6985_v46  ;;  %4347 = vst [vmem:[%s7301_s24 + $0x18] sm:$0xff] %v4219_v52  ;;  %v4099_v0 = vpop.permute.xlu1 %4098  ;;  %v7892_v24 = vld [vmem:[#allocation34_spill] sm:$0xff]  ;;  %v7894_v26 = vld [vmem:[#allocation20_spill] sm:$0xff] }
 0x412   : > { %4348 = vst [vmem:[%s7301_s24 + $0x20] sm:$0xff] %v4220_v38  ;;  %4349 = vst [vmem:[%s7301_s24 + $0x28] sm:$0xff] %v4221_v43  ;;  %v4248_v9 = vmul.f32 %v4099_v0, %v7070_v10  ;;  %v4249_v56 = vmul.f32 %v4099_v0, %v7075_v25  ;;  %v4250_v45 = vmul.f32 %v4099_v0, %v7072_v19  ;;  %v7895_v38 = vld [vmem:[#allocation26_spill] sm:$0xff] }
 0x413   : > { %4350 = vst [vmem:[%s7301_s24 + $0x30] sm:$0xff] %v4222_v50  ;;  %4351 = vst [vmem:[%s7301_s24 + $0x38] sm:$0xff] %v4223_v14  ;;  %v4251_v35 = vmul.f32 %v4099_v0, %v7078_v17  ;;  %v4104_v51 = vpop.permute.xlu0 %4103  ;;  %v7896_v43 = vld [vmem:[#allocation30_spill] sm:$0xff]  ;;  %v7897_v14 = vld [vmem:[#allocation24_spill] sm:$0xff] }
 0x414   : > { %4376 = vst [vmem:[%s7301_s24 + $0x100] sm:$0xff] %v4248_v9  ;;  %4377 = vst [vmem:[%s7301_s24 + $0x108] sm:$0xff] %v4249_v56  ;;  %v4252_v46 = vmul.f32 %v4104_v51, %v7081_v5  ;;  %v4253_v10 = vmul.f32 %v4104_v51, %v7087_v23  ;;  %v4254_v25 = vmul.f32 %v4104_v51, %v7083_v20  ;;  %v7898_v9 = vld [vmem:[#allocation31_spill] sm:$0xff] }
 0x415   : > { %4378 = vst [vmem:[%s7301_s24 + $0x110] sm:$0xff] %v4250_v45  ;;  %4379 = vst [vmem:[%s7301_s24 + $0x118] sm:$0xff] %v4251_v35  ;;  %v4255_v52 = vmul.f32 %v4104_v51, %v7089_v42  ;;  %v4069_v19 = vpop.permute.xlu1 %4068  ;;  %v7899_v45 = vld [vmem:[#allocation28_spill] sm:$0xff]  ;;  %v7900_v51 = vld [vmem:[#allocation33_spill] sm:$0xff] }
 0x416   : > { %4380 = vst [vmem:[%s7301_s24 + $0x120] sm:$0xff] %v4252_v46  ;;  %4381 = vst [vmem:[%s7301_s24 + $0x128] sm:$0xff] %v4253_v10  ;;  %v4224_v17 = vmul.f32 %v4069_v19, %v6992_v2  ;;  %v4225_v5 = vmul.f32 %v4069_v19, %v6997_v28  ;;  %v4226_v23 = vmul.f32 %v4069_v19, %v6994_v36 }
 0x417   : > { %4382 = vst [vmem:[%s7301_s24 + $0x130] sm:$0xff] %v4254_v25  ;;  %4383 = vst [vmem:[%s7301_s24 + $0x138] sm:$0xff] %v4255_v52  ;;  %v4227_v27 = vmul.f32 %v4069_v19, %v7000_v55  ;;  %v4074_v20 = vpop.permute.xlu0 %4073  ;;  %v7901_v25 = vld [vmem:[#allocation40_spill] sm:$0xff] }
 0x418   : > { %4352 = vst [vmem:[%s7301_s24 + $0x40] sm:$0xff] %v4224_v17  ;;  %4353 = vst [vmem:[%s7301_s24 + $0x48] sm:$0xff] %v4225_v5  ;;  %v4228_v42 = vmul.f32 %v4074_v20, %v7003_v11  ;;  %v4229_v2 = vmul.f32 %v4074_v20, %v7009_v4  ;;  %v4230_v28 = vmul.f32 %v4074_v20, %v7005_v16  ;;  %v7902_v17 = vld [vmem:[#allocation38_spill] sm:$0xff] }
 0x419   : > { %4354 = vst [vmem:[%s7301_s24 + $0x50] sm:$0xff] %v4226_v23  ;;  %4355 = vst [vmem:[%s7301_s24 + $0x58] sm:$0xff] %v4227_v27  ;;  %v4231_v29 = vmul.f32 %v4074_v20, %v7011_v21  ;;  %v4109_v36 = vpop.permute.xlu1 %4108  ;;  %v7903_v20 = vld [vmem:[#allocation44_spill] sm:$0xff] }
 0x41a   : > { %4356 = vst [vmem:[%s7301_s24 + $0x60] sm:$0xff] %v4228_v42  ;;  %4357 = vst [vmem:[%s7301_s24 + $0x68] sm:$0xff] %v4229_v2  ;;  %v4256_v55 = vmul.f32 %v4109_v36, %v7096_v53  ;;  %v4257_v11 = vmul.f32 %v4109_v36, %v7101_v57  ;;  %v4258_v4 = vmul.f32 %v4109_v36, %v7098_v40 }
 0x41b   : > { %4358 = vst [vmem:[%s7301_s24 + $0x70] sm:$0xff] %v4230_v28  ;;  %4359 = vst [vmem:[%s7301_s24 + $0x78] sm:$0xff] %v4231_v29  ;;  %v4259_v54 = vmul.f32 %v4109_v36, %v7104_v32  ;;  %v4114_v16 = vpop.permute.xlu0 %4113  ;;  %v7893_v32 = vld [vmem:[#allocation17_spill] sm:$0xff]  ;;  %v7904_v28 = vld [vmem:[#allocation42_spill] sm:$0xff] }
 0x41c   : > { %4384 = vst [vmem:[%s7301_s24 + $0x140] sm:$0xff] %v4256_v55  ;;  %4385 = vst [vmem:[%s7301_s24 + $0x148] sm:$0xff] %v4257_v11  ;;  %v4260_v21 = vmul.f32 %v4114_v16, %v7107_v63  ;;  %v4261_v53 = vmul.f32 %v4114_v16, %v7112_v18  ;;  %v4262_v57 = vmul.f32 %v4114_v16, %v7109_v33  ;;  %v7905_v29 = vld [vmem:[#allocation46_spill] sm:$0xff] }
 0x41d   : > { %4386 = vst [vmem:[%s7301_s24 + $0x150] sm:$0xff] %v4258_v4  ;;  %4387 = vst [vmem:[%s7301_s24 + $0x158] sm:$0xff] %v4259_v54  ;;  %v4263_v41 = vmul.f32 %v4114_v16, %v7892_v24  ;;  %v4079_v40 = vpop.permute.xlu1 %4078  ;;  %v7907_v4 = vld [vmem:[#allocation39_spill] sm:$0xff]  ;;  %v7908_v16 = vld [vmem:[#allocation37_spill] sm:$0xff] }
 0x41e   : > { %4388 = vst [vmem:[%s7301_s24 + $0x160] sm:$0xff] %v4260_v21  ;;  %4389 = vst [vmem:[%s7301_s24 + $0x168] sm:$0xff] %v4261_v53  ;;  %v4232_v8 = vmul.f32 %v4079_v40, %v7893_v32  ;;  %v4233_v63 = vmul.f32 %v4079_v40, %v7894_v26  ;;  %v4234_v18 = vmul.f32 %v4079_v40, %v7895_v38  ;;  %v7909_v21 = vld [vmem:[#allocation41_spill] sm:$0xff]  ;;  %v7910_v24 = vld [vmem:[#allocation43_spill] sm:$0xff] }
 0x41f   : > { %4390 = vst [vmem:[%s7301_s24 + $0x170] sm:$0xff] %v4262_v57  ;;  %4391 = vst [vmem:[%s7301_s24 + $0x178] sm:$0xff] %v4263_v41  ;;  %v4235_v50 = vmul.f32 %v4079_v40, %v7896_v43  ;;  %v4084_v33 = vpop.permute.xlu0 %4083  ;;  %v7911_v40 = vld [vmem:[#allocation45_spill] sm:$0xff]  ;;  %v7914_v43 = vld [vmem:[#allocation19_spill] sm:$0xff] }
 0x420   : > { %4360 = vst [vmem:[%s7301_s24 + $0x80] sm:$0xff] %v4232_v8  ;;  %4361 = vst [vmem:[%s7301_s24 + $0x88] sm:$0xff] %v4233_v63  ;;  %v4236_v0 = vmul.f32 %v4084_v33, %v7897_v14  ;;  %v4237_v56 = vmul.f32 %v4084_v33, %v7898_v9  ;;  %v4238_v35 = vmul.f32 %v4084_v33, %v7899_v45  ;;  %v7912_v8 = vld [vmem:[#allocation32_spill] sm:$0xff] }
 0x421   : > { %4362 = vst [vmem:[%s7301_s24 + $0x90] sm:$0xff] %v4234_v18  ;;  %4363 = vst [vmem:[%s7301_s24 + $0x98] sm:$0xff] %v4235_v50  ;;  %v4239_v46 = vmul.f32 %v4084_v33, %v7900_v51  ;;  %v4119_v10 = vpop.permute.xlu1 %4118  ;;  %v7913_v63 = vld [vmem:[#allocation36_spill] sm:$0xff]  ;;  %v7915_v33 = vld [vmem:[#allocation47_spill] sm:$0xff] }
 0x422   : > { %4364 = vst [vmem:[%s7301_s24 + $0xa0] sm:$0xff] %v4236_v0  ;;  %4365 = vst [vmem:[%s7301_s24 + $0xa8] sm:$0xff] %v4237_v56  ;;  %v4264_v52 = vmul.f32 %v4119_v10, %v7901_v25  ;;  %v4265_v19 = vmul.f32 %v4119_v10, %v7122_v31  ;;  %v4266_v5 = vmul.f32 %v4119_v10, %v7902_v17  ;;  %v7916_v0 = vld [vmem:[#allocation48_spill] sm:$0xff]  ;;  %v7917_v51 = vld [vmem:[#allocation21_spill] sm:$0xff] }
 0x423   : > { %4366 = vst [vmem:[%s7301_s24 + $0xb0] sm:$0xff] %v4238_v35  ;;  %4367 = vst [vmem:[%s7301_s24 + $0xb8] sm:$0xff] %v4239_v46  ;;  %v4267_v23 = vmul.f32 %v4119_v10, %v7124_v30  ;;  %v4124_v27 = vpop.permute.xlu0 %4123  ;;  %v7906_v30 = vld [vmem:[#allocation35_spill] sm:$0xff]  ;;  %v7918_v10 = vld [vmem:[#allocation49_spill] sm:$0xff] }
 0x424   : > { %4392 = vst [vmem:[%s7301_s24 + $0x180] sm:$0xff] %v4264_v52  ;;  %4393 = vst [vmem:[%s7301_s24 + $0x188] sm:$0xff] %v4265_v19  ;;  %v4268_v42 = vmul.f32 %v4124_v27, %v7903_v20  ;;  %v4269_v2 = vmul.f32 %v4124_v27, %v7130_v60  ;;  %v4270_v31 = vmul.f32 %v4124_v27, %v7904_v28  ;;  %v7919_v52 = vld [vmem:[#allocation50_spill] sm:$0xff]  ;;  %v7922_v20 = vld [vmem:[#allocation23_spill] sm:$0xff] }
 0x425   : > { %4394 = vst [vmem:[%s7301_s24 + $0x190] sm:$0xff] %v4266_v5  ;;  %4395 = vst [vmem:[%s7301_s24 + $0x198] sm:$0xff] %v4267_v23  ;;  %v4271_v36 = vmul.f32 %v4124_v27, %v7905_v29  ;;  %v4089_v55 = vpop.permute.xlu1 %4088  ;;  %v7921_v23 = vld [vmem:[#allocation52_spill] sm:$0xff] }
 0x426   : > { %4396 = vst [vmem:[%s7301_s24 + $0x1a0] sm:$0xff] %v4268_v42  ;;  %4397 = vst [vmem:[%s7301_s24 + $0x1a8] sm:$0xff] %v4269_v2  ;;  %v4240_v11 = vmul.f32 %v4089_v55, %v7906_v30  ;;  %v4241_v54 = vmul.f32 %v4089_v55, %v7907_v4  ;;  %v4242_v60 = vmul.f32 %v4089_v55, %v7908_v16 }
 0x427   : > { %4398 = vst [vmem:[%s7301_s24 + $0x1b0] sm:$0xff] %v4270_v31  ;;  %4399 = vst [vmem:[%s7301_s24 + $0x1b8] sm:$0xff] %v4271_v36  ;;  %v4243_v53 = vmul.f32 %v4089_v55, %v7909_v21  ;;  %v7923_v31 = vld [vmem:[#allocation53_spill] sm:$0xff]  ;;  %v7925_v55 = vld [vmem:[#allocation27_spill] sm:$0xff] }
 0x428   : > { %v4094_v57 = vpop.permute.xlu0 %4093  ;;  %4368 = vst [vmem:[%s7301_s24 + $0xc0] sm:$0xff] %v4240_v11  ;;  %4369 = vst [vmem:[%s7301_s24 + $0xc8] sm:$0xff] %v4241_v54  ;;  %v7924_v36 = vld [vmem:[#allocation25_spill] sm:$0xff] }
 0x429   : > { %4370 = vst [vmem:[%s7301_s24 + $0xd0] sm:$0xff] %v4242_v60  ;;  %4371 = vst [vmem:[%s7301_s24 + $0xd8] sm:$0xff] %v4243_v53  ;;  %v4244_v41 = vmul.f32 %v4094_v57, %v7910_v24  ;;  %v4245_v32 = vmul.f32 %v4094_v57, %v7911_v40  ;;  %v4246_v26 = vmul.f32 %v4094_v57, %v7912_v8  ;;  %v4129_v18 = vpop.permute.xlu1 %4128  ;;  %v7927_v24 = vld [vmem:[#allocation56_spill] sm:$0xff]  ;;  %v7929_v40 = vld [vmem:[#allocation57_spill] sm:$0xff] }
 0x42a   : > { %v4247_v38 = vmul.f32 %v4094_v57, %v7913_v63  ;;  %v4272_v50 = vmul.f32 %v4129_v18, %v7914_v43  ;;  %v4273_v14 = vmul.f32 %v4129_v18, %v7915_v33  ;;  %v4274_v9 = vmul.f32 %v4129_v18, %v7916_v0  ;;  %v7933_v43 = vld [vmem:[#allocation61_spill] sm:$0xff] }
 0x42b   : > { %4372 = vst [vmem:[%s7301_s24 + $0xe0] sm:$0xff] %v4244_v41  ;;  %4373 = vst [vmem:[%s7301_s24 + $0xe8] sm:$0xff] %v4245_v32  ;;  %v4275_v56 = vmul.f32 %v4129_v18, %v7142_v48  ;;  %v7920_v48 = vld [vmem:[#allocation51_spill] sm:$0xff] }
 0x42c   : > { %4374 = vst [vmem:[%s7301_s24 + $0xf0] sm:$0xff] %v4246_v26  ;;  %4375 = vst [vmem:[%s7301_s24 + $0xf8] sm:$0xff] %v4247_v38  ;;  %v4134_v45 = vpop.permute.xlu0 %4133  ;;  %v7928_v41 = vld [vmem:[#allocation55_spill] sm:$0xff]  ;;  %v7931_v26 = vld [vmem:[#allocation60_spill] sm:$0xff] }
 0x42d   : > { %4400 = vst [vmem:[%s7301_s24 + $0x1c0] sm:$0xff] %v4272_v50  ;;  %4401 = vst [vmem:[%s7301_s24 + $0x1c8] sm:$0xff] %v4273_v14  ;;  %v4276_v35 = vmul.f32 %v4134_v45, %v7144_v34  ;;  %v4277_v46 = vmul.f32 %v4134_v45, %v7917_v51  ;;  %v4278_v25 = vmul.f32 %v4134_v45, %v7918_v10  ;;  %v4139_v17 = vpop.permute.xlu1 %4138  ;;  %v7932_v38 = vld [vmem:[#allocation59_spill] sm:$0xff]  ;;  %v7934_v14 = vld [vmem:[#allocation78_spill] sm:$0xff] }
 0x42e   : > { %4402 = vst [vmem:[%s7301_s24 + $0x1d0] sm:$0xff] %v4274_v9  ;;  %4403 = vst [vmem:[%s7301_s24 + $0x1d8] sm:$0xff] %v4275_v56  ;;  %v4279_v19 = vmul.f32 %v4134_v45, %v7919_v52  ;;  %v4280_v5 = vmul.f32 %v4139_v17, %v7920_v48  ;;  %v4281_v34 = vmul.f32 %v4139_v17, %v7158_v3  ;;  %v7935_v9 = vld [vmem:[#allocation80_spill] sm:$0xff]  ;;  %v7936_v45 = vld [vmem:[#allocation79_spill] sm:$0xff] }
 0x42f   : > { %4404 = vst [vmem:[%s7301_s24 + $0x1e0] sm:$0xff] %v4276_v35  ;;  %4405 = vst [vmem:[%s7301_s24 + $0x1e8] sm:$0xff] %v4277_v46  ;;  %v4282_v27 = vmul.f32 %v4139_v17, %v7921_v23  ;;  %v4283_v42 = vmul.f32 %v4139_v17, %v7922_v20  ;;  %v7937_v51 = vld [vmem:[#allocation81_spill] sm:$0xff]  ;;  %v7940_v48 = vld [vmem:[#allocation83_spill] sm:$0xff] }
 0x430   : > { %4406 = vst [vmem:[%s7301_s24 + $0x1f0] sm:$0xff] %v4278_v25  ;;  %4407 = vst [vmem:[%s7301_s24 + $0x1f8] sm:$0xff] %v4279_v19  ;;  %v4144_v2 = vpop.permute.xlu0 %4143  ;;  %v7938_v25 = vld [vmem:[#allocation82_spill] sm:$0xff]  ;;  %v7939_v19 = vld [vmem:[#allocation84_spill] sm:$0xff] }
 0x431   : > { %4408 = vst [vmem:[%s7301_s24 + $0x200] sm:$0xff] %v4280_v5  ;;  %4409 = vst [vmem:[%s7301_s24 + $0x208] sm:$0xff] %v4281_v34  ;;  %v4284_v28 = vmul.f32 %v4144_v2, %v7162_v61  ;;  %v4285_v29 = vmul.f32 %v4144_v2, %v7923_v31  ;;  %v4286_v3 = vmul.f32 %v4144_v2, %v7924_v36  ;;  %v4179_v11 = vpop.permute.xlu1 %4178  ;;  %v7941_v34 = vld [vmem:[#allocation85_spill] sm:$0xff]  ;;  %v7942_v20 = vld [vmem:[#allocation62_spill] sm:$0xff] }
 0x432   : > { %4410 = vst [vmem:[%s7301_s24 + $0x210] sm:$0xff] %v4282_v27  ;;  %4411 = vst [vmem:[%s7301_s24 + $0x218] sm:$0xff] %v4283_v42  ;;  %v4287_v30 = vmul.f32 %v4144_v2, %v7925_v55  ;;  %v4312_v4 = vmul.f32 %v4179_v11, %v7225_v49  ;;  %v4313_v61 = vmul.f32 %v4179_v11, %v7230_v7  ;;  %v7943_v2 = vld [vmem:[#allocation64_spill] sm:$0xff]  ;;  %v7944_v31 = vld [vmem:[#allocation63_spill] sm:$0xff] }
 0x433   : > { %4412 = vst [vmem:[%s7301_s24 + $0x220] sm:$0xff] %v4284_v28  ;;  %4413 = vst [vmem:[%s7301_s24 + $0x228] sm:$0xff] %v4285_v29  ;;  %v4314_v54 = vmul.f32 %v4179_v11, %v7228_v62  ;;  %v4315_v16 = vmul.f32 %v4179_v11, %v7232_v1  ;;  %v7926_v1 = vld [vmem:[#allocation54_spill] sm:$0xff]  ;;  %v7945_v36 = vld [vmem:[#allocation65_spill] sm:$0xff] }
 0x434   : > { %4414 = vst [vmem:[%s7301_s24 + $0x230] sm:$0xff] %v4286_v3  ;;  %4415 = vst [vmem:[%s7301_s24 + $0x238] sm:$0xff] %v4287_v30  ;;  %v4184_v60 = vpop.permute.xlu0 %4183  ;;  %v7946_v30 = vld [vmem:[#allocation66_spill] sm:$0xff] }
 0x435   : > { %4440 = vst [vmem:[%s7301_s24 + $0x300] sm:$0xff] %v4312_v4  ;;  %4441 = vst [vmem:[%s7301_s24 + $0x308] sm:$0xff] %v4313_v61  ;;  %v4316_v21 = vmul.f32 %v4184_v60, %v7234_v39  ;;  %v4317_v49 = vmul.f32 %v4184_v60, %v7238_v37  ;;  %v4318_v7 = vmul.f32 %v4184_v60, %v7236_v12  ;;  %v4149_v62 = vpop.permute.xlu1 %4148  ;;  %v7947_v4 = vld [vmem:[#allocation68_spill] sm:$0xff] }
 0x436   : > { %4442 = vst [vmem:[%s7301_s24 + $0x310] sm:$0xff] %v4314_v54  ;;  %4443 = vst [vmem:[%s7301_s24 + $0x318] sm:$0xff] %v4315_v16  ;;  %v4319_v53 = vmul.f32 %v4184_v60, %v7240_v6  ;;  %v4288_v57 = vmul.f32 %v4149_v62, %v7926_v1  ;;  %v4289_v39 = vmul.f32 %v4149_v62, %v7927_v24  ;;  %v7930_v6 = vld [vmem:[#allocation58_spill] sm:$0xff]  ;;  %v7948_v54 = vld [vmem:[#allocation67_spill] sm:$0xff] }
 0x437   : > { %4444 = vst [vmem:[%s7301_s24 + $0x320] sm:$0xff] %v4316_v21  ;;  %4445 = vst [vmem:[%s7301_s24 + $0x328] sm:$0xff] %v4317_v49  ;;  %v4290_v37 = vmul.f32 %v4149_v62, %v7928_v41  ;;  %v4291_v32 = vmul.f32 %v4149_v62, %v7929_v40  ;;  %v7949_v60 = vld [vmem:[#allocation69_spill] sm:$0xff]  ;;  %v7951_v62 = vld [vmem:[#allocation87_spill] sm:$0xff] }
 0x438   : > { %4446 = vst [vmem:[%s7301_s24 + $0x330] sm:$0xff] %v4318_v7  ;;  %4447 = vst [vmem:[%s7301_s24 + $0x338] sm:$0xff] %v4319_v53  ;;  %v4154_v12 = vpop.permute.xlu0 %4153  ;;  %v7950_v7 = vld [vmem:[#allocation86_spill] sm:$0xff] }
 0x439   : > { %4416 = vst [vmem:[%s7301_s24 + $0x240] sm:$0xff] %v4288_v57  ;;  %4417 = vst [vmem:[%s7301_s24 + $0x248] sm:$0xff] %v4289_v39  ;;  %v4292_v8 = vmul.f32 %v4154_v12, %v7930_v6  ;;  %v4293_v63 = vmul.f32 %v4154_v12, %v7931_v26  ;;  %v4294_v18 = vmul.f32 %v4154_v12, %v7932_v38  ;;  %v4189_v33 = vpop.permute.xlu1 %4188  ;;  %v7952_v57 = vld [vmem:[#allocation18_spill] sm:$0xff] }
 0x43a   : > { %4418 = vst [vmem:[%s7301_s24 + $0x250] sm:$0xff] %v4290_v37  ;;  %4419 = vst [vmem:[%s7301_s24 + $0x258] sm:$0xff] %v4291_v32  ;;  %v4295_v50 = vmul.f32 %v4154_v12, %v7933_v43  ;;  %v4320_v0 = vmul.f32 %v4189_v33, %v7934_v14  ;;  %v4321_v56 = vmul.f32 %v4189_v33, %v7935_v9  ;;  %v7953_v37 = vld [vmem:[#allocation88_spill] sm:$0xff]  ;;  %v7954_v12 = vld [vmem:[#allocation89_spill] sm:$0xff] }
 0x43b   : > { %4420 = vst [vmem:[%s7301_s24 + $0x260] sm:$0xff] %v4292_v8  ;;  %4421 = vst [vmem:[%s7301_s24 + $0x268] sm:$0xff] %v4293_v63  ;;  %v4322_v35 = vmul.f32 %v4189_v33, %v7936_v45  ;;  %v4323_v46 = vmul.f32 %v4189_v33, %v7937_v51  ;;  %v7955_v8 = vld [vmem:[#allocation90_spill] sm:$0xff]  ;;  %v7959_v33 = vld [vmem:[#allocation73_spill] sm:$0xff] }
 0x43c   : > { %4422 = vst [vmem:[%s7301_s24 + $0x270] sm:$0xff] %v4294_v18  ;;  %4423 = vst [vmem:[%s7301_s24 + $0x278] sm:$0xff] %v4295_v50  ;;  %v4194_v10 = vpop.permute.xlu0 %4193  ;;  %v7957_v18 = vld [vmem:[#allocation72_spill] sm:$0xff]  ;;  %v7958_v50 = vld [vmem:[#allocation71_spill] sm:$0xff] }
 0x43d   : > { %4448 = vst [vmem:[%s7301_s24 + $0x340] sm:$0xff] %v4320_v0  ;;  %4449 = vst [vmem:[%s7301_s24 + $0x348] sm:$0xff] %v4321_v56  ;;  %v4324_v52 = vmul.f32 %v4194_v10, %v7938_v25  ;;  %v4325_v17 = vmul.f32 %v4194_v10, %v7939_v19  ;;  %v4326_v5 = vmul.f32 %v4194_v10, %v7940_v48  ;;  %v4159_v27 = vpop.permute.xlu1 %4158  ;;  %v7960_v9 = vld [vmem:[#allocation74_spill] sm:$0xff]  ;;  %v7961_v45 = vld [vmem:[#allocation76_spill] sm:$0xff] }
 0x43e   : > { %4450 = vst [vmem:[%s7301_s24 + $0x350] sm:$0xff] %v4322_v35  ;;  %4451 = vst [vmem:[%s7301_s24 + $0x358] sm:$0xff] %v4323_v46  ;;  %v4327_v23 = vmul.f32 %v4194_v10, %v7941_v34  ;;  %v4296_v42 = vmul.f32 %v4159_v27, %v7942_v20  ;;  %v4297_v28 = vmul.f32 %v4159_v27, %v7943_v2  ;;  %v7962_v51 = vld [vmem:[#allocation75_spill] sm:$0xff]  ;;  %v7963_v10 = vld [vmem:[#allocation77_spill] sm:$0xff] }
 0x43f   : > { %4452 = vst [vmem:[%s7301_s24 + $0x360] sm:$0xff] %v4324_v52  ;;  %4453 = vst [vmem:[%s7301_s24 + $0x368] sm:$0xff] %v4325_v17  ;;  %v4298_v29 = vmul.f32 %v4159_v27, %v7944_v31  ;;  %v4299_v3 = vmul.f32 %v4159_v27, %v7945_v36  ;;  %v7964_v19 = vld [vmem:[#allocation22_spill] sm:$0xff]  ;;  %v7965_v48 = vld [vmem:[#allocation91_spill] sm:$0xff] }
 0x440   : > { %4454 = vst [vmem:[%s7301_s24 + $0x370] sm:$0xff] %v4326_v5  ;;  %4455 = vst [vmem:[%s7301_s24 + $0x378] sm:$0xff] %v4327_v23  ;;  %v4164_v55 = vpop.permute.xlu0 %4163  ;;  %v7966_v34 = vld [vmem:[#allocation29_spill] sm:$0xff] }
 0x441   : > { %4424 = vst [vmem:[%s7301_s24 + $0x280] sm:$0xff] %v4296_v42  ;;  %4425 = vst [vmem:[%s7301_s24 + $0x288] sm:$0xff] %v4297_v28  ;;  %v4300_v11 = vmul.f32 %v4164_v55, %v7946_v30  ;;  %v4301_v61 = vmul.f32 %v4164_v55, %v7947_v4  ;;  %v4302_v16 = vmul.f32 %v4164_v55, %v7948_v54  ;;  %v4199_v49 = vpop.permute.xlu1 %4198 }
 0x442   : > { %4426 = vst [vmem:[%s7301_s24 + $0x290] sm:$0xff] %v4298_v29  ;;  %4427 = vst [vmem:[%s7301_s24 + $0x298] sm:$0xff] %v4299_v3  ;;  %v4303_v21 = vmul.f32 %v4164_v55, %v7949_v60  ;;  %v4328_v53 = vmul.f32 %v4199_v49, %v7950_v7  ;;  %v4329_v1 = vmul.f32 %v4199_v49, %v7951_v62 }
 0x443   : > { %4428 = vst [vmem:[%s7301_s24 + $0x2a0] sm:$0xff] %v4300_v11  ;;  %4429 = vst [vmem:[%s7301_s24 + $0x2a8] sm:$0xff] %v4301_v61  ;;  %v4330_v24 = vmul.f32 %v4199_v49, %v7952_v57  ;;  %v4331_v39 = vmul.f32 %v4199_v49, %v7268_v59  ;;  %v7956_v59 = vld [vmem:[#allocation70_spill] sm:$0xff] }
 0x444   : > { %4430 = vst [vmem:[%s7301_s24 + $0x2b0] sm:$0xff] %v4302_v16  ;;  %4431 = vst [vmem:[%s7301_s24 + $0x2b8] sm:$0xff] %v4303_v21  ;;  %v4204_v41 = vpop.permute.xlu0 %4203 }
 0x445   : > { %4456 = vst [vmem:[%s7301_s24 + $0x380] sm:$0xff] %v4328_v53  ;;  %4457 = vst [vmem:[%s7301_s24 + $0x388] sm:$0xff] %v4329_v1  ;;  %v4332_v40 = vmul.f32 %v4204_v41, %v7953_v37  ;;  %v4333_v32 = vmul.f32 %v4204_v41, %v7274_v47  ;;  %v4334_v6 = vmul.f32 %v4204_v41, %v7954_v12  ;;  %v4169_v63 = vpop.permute.xlu1 %4168 }
 0x446   : > { %4458 = vst [vmem:[%s7301_s24 + $0x390] sm:$0xff] %v4330_v24  ;;  %4459 = vst [vmem:[%s7301_s24 + $0x398] sm:$0xff] %v4331_v39  ;;  %v4335_v26 = vmul.f32 %v4204_v41, %v7955_v8  ;;  %v4304_v38 = vmul.f32 %v4169_v63, %v7956_v59  ;;  %v4305_v43 = vmul.f32 %v4169_v63, %v7957_v18 }
 0x447   : > { %4460 = vst [vmem:[%s7301_s24 + $0x3a0] sm:$0xff] %v4332_v40  ;;  %4461 = vst [vmem:[%s7301_s24 + $0x3a8] sm:$0xff] %v4333_v32  ;;  %v4306_v47 = vmul.f32 %v4169_v63, %v7958_v50  ;;  %v4307_v14 = vmul.f32 %v4169_v63, %v7959_v33 }
 0x448   : > { %4462 = vst [vmem:[%s7301_s24 + $0x3b0] sm:$0xff] %v4334_v6  ;;  %4463 = vst [vmem:[%s7301_s24 + $0x3b8] sm:$0xff] %v4335_v26  ;;  %v4174_v0 = vpop.permute.xlu0 %4173 }
 0x449   : > { %4432 = vst [vmem:[%s7301_s24 + $0x2c0] sm:$0xff] %v4304_v38  ;;  %4433 = vst [vmem:[%s7301_s24 + $0x2c8] sm:$0xff] %v4305_v43  ;;  %v4308_v56 = vmul.f32 %v4174_v0, %v7960_v9  ;;  %v4309_v35 = vmul.f32 %v4174_v0, %v7961_v45  ;;  %v4310_v46 = vmul.f32 %v4174_v0, %v7962_v51  ;;  %v4209_v52 = vpop.permute.xlu1 %4208 }
 0x44a   : > { %4434 = vst [vmem:[%s7301_s24 + $0x2d0] sm:$0xff] %v4306_v47  ;;  %4435 = vst [vmem:[%s7301_s24 + $0x2d8] sm:$0xff] %v4307_v14  ;;  %v4311_v25 = vmul.f32 %v4174_v0, %v7963_v10  ;;  %v4336_v17 = vmul.f32 %v4209_v52, %v7964_v19  ;;  %v4337_v5 = vmul.f32 %v4209_v52, %v7965_v48 }
 0x44b   : > { %4436 = vst [vmem:[%s7301_s24 + $0x2e0] sm:$0xff] %v4308_v56  ;;  %4437 = vst [vmem:[%s7301_s24 + $0x2e8] sm:$0xff] %v4309_v35  ;;  %v4338_v23 = vmul.f32 %v4209_v52, %v7966_v34  ;;  %v4339_v27 = vmul.f32 %v4209_v52, %v7286_v58 }
 0x44c   : > { %4438 = vst [vmem:[%s7301_s24 + $0x2f0] sm:$0xff] %v4310_v46  ;;  %4439 = vst [vmem:[%s7301_s24 + $0x2f8] sm:$0xff] %v4311_v25  ;;  %v4214_v20 = vpop.permute.xlu0 %4213 }
 0x44d   : > { %4464 = vst [vmem:[%s7301_s24 + $0x3c0] sm:$0xff] %v4336_v17  ;;  %4465 = vst [vmem:[%s7301_s24 + $0x3c8] sm:$0xff] %v4337_v5  ;;  %v4340_v42 = vmul.f32 %v4214_v20, %v7288_v22  ;;  %v4341_v58 = vmul.f32 %v4214_v20, %v7296_v44  ;;  %v4342_v2 = vmul.f32 %v4214_v20, %v7290_v13 }
 0x44e   : > { %4466 = vst [vmem:[%s7301_s24 + $0x3d0] sm:$0xff] %v4338_v23  ;;  %4467 = vst [vmem:[%s7301_s24 + $0x3d8] sm:$0xff] %v4339_v27  ;;  %v4343_v28 = vmul.f32 %v4214_v20, %v7298_v15 }
 0x44f   : > { %4468 = vst [vmem:[%s7301_s24 + $0x3e0] sm:$0xff] %v4340_v42  ;;  %4469 = vst [vmem:[%s7301_s24 + $0x3e8] sm:$0xff] %v4341_v58 }
 0x450   : > { %4470 = vst [vmem:[%s7301_s24 + $0x3f0] sm:$0xff] %v4342_v2  ;;  %4471 = vst [vmem:[%s7301_s24 + $0x3f8] sm:$0xff] %v4343_v28 }
 0x451   : > { %5264 = shalt.err (!%p5261_p13)
}
 0x452   : > { %s5265_s28 = scalar_lea.hbm %s7548_s7, 16384  ;;  %s5269_s10 = scalar_lea.hbm %s7614_s3, 32768 }
 0x453   : > { %p5266_p11 = scmp.ne.s32.totalorder %s7548_s7, %s5265_s28  ;;  %p5270_p7 = scmp.lt.u32.totalorder %s7548_s7, %s7614_s3 }
 0x454   : > { %p5271_p4 = scmp.lt.u32.totalorder %s5269_s10, %s5265_s28  ;;  %p5273_p0 = scmp.lt.u32.totalorder %s5265_s28, %s7548_s7 }
 0x455   : > { %p5267_p2 = pnand %p5266_p11, %p7967_p10 }
 0x456   : > { %p5272_p3 = por %p5271_p4, %p5270_p7 }
 0x457   : > { %p5268_p5 = pneg %p5267_p2 }
 0x458   : > { %p5274_p8 = por %p5273_p0, %p5272_p3 }
 0x45a   : > { %p5275_p9 = pnand %p5274_p8, %p5268_p5 }
 0x45c   : > { %5278 = shalt.err (!%p5275_p9)
}
 0x45d   : > { %s5348_s11 = smov 512   ;;  %s5349_s19 = smov 32  }
 0x45e   : > { %4894 = dma.vmem_to_hbm [thread:$0]  (%p7967_p10), %s7550_s20, 16384, %s7548_s7, %s4473_s30, %s5348_s11, %s5348_s11, %s5349_s19  }
 0x45f PF: > { %s4505_s9 = sand.u32 1, %s5317_s12   ;;  %p7968_p12 = scmp.ne.s32.totalorder %s7682_s27, 0 }
 0x460   : > { %p7969_p1 = scmp.ge.s32.totalorder %s5337_s17, 2  ;;  %s4506_s18 = scalar_lea.sflag [#allocation6], %s4505_s9 }
 0x462   : > { %p4907_p6 = pnand %p7969_p1, %p7968_p12 }
 0x464   : > { %5312 = dma.done.wait (!%p4907_p6), %s4506_s18, 16384  }
 0x465   : > { %5314 = vsyncadd (!%p4907_p6), %s4506_s18, 4294950912  ;;  %s22_s17 = sadd.s32 1, %s5337_s17   ;;  %s7970_s24 = sld [smem:[#allocation16_spill]] }
 0x466   : > { %p19_p13 = scmp.ge.s32.totalorder %s22_s17, 4   ;;  %s7971_s15 = sld [smem:[#allocation14_spill]] }
 0x467   : > { %s7972_s16 = sld [smem:[#allocation15_spill]]  ;;  %s7973_s12 = smov %s5321_s13 }
 0x468   : > { %s7974_s13 = smov %s5325_s14  ;;  %21 = sbr.rel (!%p19_p13) target bundleno = 10 (0xa), region = 113 }
 0x46b   : > { %s7975_s14 = smov %s7970_s24 }
 0x46f   :  { %4511 = vsyncpa [#allocation5], 1 }
 0x470   :  { %4513 = vsyncpa [#allocation5 + $0x1], 1 }
 0x471   :  { %4514 = vsyncpa [#allocation8], 1 }
 0x472   :  { %4516 = vsyncpa [#allocation8 + $0x1], 1 }
 0x473   :  { %4517 = vsyncpa [#allocation6], 1 }
 0x474   :  { %4519 = vsyncpa [#allocation6 + $0x1], 1 }

</bundles_post_ra>
